<compile_context>
chip_gen: v6e
topology: v6e:2x2x1
jax: 0.10.0
libtpu: 0.0.40
codegen_flags: <defaults>
</compile_context>

<pallas_src>
import functools
import math

import jax
import jax.numpy as jnp
from jax.experimental import pallas as pl
from jax.experimental.pallas import tpu as pltpu


class Config:
    s_dims = [16, 16]
    a_dim = 4
    h_dim = 32
    hid = 64
    C, H, W = 3, 16, 16
    gamma = 1.0
    min_stddev = 0.1
    T = 3
    B = 2


def _z_layout(cfg):
    """Row layout of the packed posterior/prior first-layer activation z."""
    NS = len(cfg.s_dims)
    SD = max(cfg.s_dims)
    off_h = SD
    off_a = SD + NS * cfg.h_dim
    off_s = off_a + cfg.a_dim
    s_off = [off_s + sum(cfg.s_dims[:j]) for j in range(NS)]
    K = off_s + sum(cfg.s_dims)
    return SD, off_h, off_a, s_off, K


# ---------------------------------------------------------------------------
# Parameter init (canonical MLP sub-networks) + packing into the fused layout.
# ---------------------------------------------------------------------------

def init_raw_params(cfg, key):
    def dense(key, fin, fout):
        k1, k2 = jax.random.split(key)
        return (0.05 * jax.random.normal(k1, (fin, fout), jnp.float32),
                0.01 * jax.random.normal(k2, (fout,), jnp.float32))

    x_dim = cfg.C * cfg.H * cfg.W
    raw = {"enc": [], "post": [], "prior": [], "dec": []}
    for i, s_dim in enumerate(cfg.s_dims):
        key, *ks = jax.random.split(key, 11)
        w1, b1 = dense(ks[0], x_dim, cfg.hid)
        w2, b2 = dense(ks[1], cfg.hid, cfg.h_dim)
        raw["enc"].append({"w1": w1, "b1": b1, "w2": w2, "b2": b2})
        a_dims = [cfg.a_dim] + cfg.s_dims[:i]
        post_in = s_dim + cfg.h_dim + sum(a_dims)
        w1, b1 = dense(ks[2], post_in, cfg.hid)
        wm, bm = dense(ks[3], cfg.hid, s_dim)
        ws, bs = dense(ks[4], cfg.hid, s_dim)
        raw["post"].append({"w1": w1, "b1": b1, "wm": wm, "bm": bm,
                            "ws": ws, "bs": bs})
        prior_in = s_dim + sum(a_dims)
        w1, b1 = dense(ks[5], prior_in, cfg.hid)
        wm, bm = dense(ks[6], cfg.hid, s_dim)
        ws, bs = dense(ks[7], cfg.hid, s_dim)
        raw["prior"].append({"w1": w1, "b1": b1, "wm": wm, "bm": bm,
                             "ws": ws, "bs": bs})
        w1, b1 = dense(ks[8], s_dim, cfg.hid)
        w2, b2 = dense(ks[9], cfg.hid, x_dim)
        raw["dec"].append({"w1": w1, "b1": b1, "w2": w2, "b2": b2})
    return raw


def pack_params(cfg, raw):
    """Pack raw per-module weights into the fused-kernel layout (bf16 MXU ops)."""
    NS = len(cfg.s_dims)
    s_dims = cfg.s_dims
    hid, h_dim, a_dim = cfg.hid, cfg.h_dim, cfg.a_dim
    x_dim = cfg.C * cfg.H * cfg.W
    SD, off_h, off_a, s_off, K = _z_layout(cfg)
    sum_sd = sum(s_dims)
    bf = jnp.bfloat16

    # Fused encoder: one (x_dim, NS*hid) first matmul + block-diag second layer.
    ew1 = jnp.concatenate([raw["enc"][i]["w1"] for i in range(NS)], axis=1)
    eb1 = jnp.concatenate([raw["enc"][i]["b1"] for i in range(NS)])[None, :]
    ew2 = jnp.zeros((NS * hid, NS * h_dim), jnp.float32)
    for i in range(NS):
        ew2 = ew2.at[i * hid:(i + 1) * hid,
                     i * h_dim:(i + 1) * h_dim].set(raw["enc"][i]["w2"])
    eb2 = jnp.concatenate([raw["enc"][i]["b2"] for i in range(NS)])[None, :]

    # Per-state fused posterior+prior first layer (rows follow the packed
    # z layout [s_prev | h_cat | a | s_0..s_{NS-1}]) and block-diag gauss heads.
    w1_all = jnp.zeros((NS, K, 2 * hid), jnp.float32)
    b1_all = jnp.zeros((NS, 1, 2 * hid), jnp.float32)
    hw_all = jnp.zeros((NS, 2 * hid, 4 * SD), jnp.float32)
    hb_all = jnp.zeros((NS, 1, 4 * SD), jnp.float32)
    for i, sd in enumerate(s_dims):
        po, pr = raw["post"][i], raw["prior"][i]
        # posterior rows: [s_prev, h_i, a, s_<i] -> columns 0:hid
        w1, off = po["w1"], 0
        w1_all = w1_all.at[i, 0:sd, 0:hid].set(w1[off:off + sd]); off += sd
        w1_all = w1_all.at[i, off_h + i * h_dim:off_h + (i + 1) * h_dim,
                           0:hid].set(w1[off:off + h_dim]); off += h_dim
        w1_all = w1_all.at[i, off_a:off_a + a_dim,
                           0:hid].set(w1[off:off + a_dim]); off += a_dim
        for j in range(i):
            w1_all = w1_all.at[i, s_off[j]:s_off[j] + s_dims[j],
                               0:hid].set(w1[off:off + s_dims[j]])
            off += s_dims[j]
        # prior rows: [s_prev, a, s_<i] -> columns hid:2*hid (h rows stay zero)
        w1, off = pr["w1"], 0
        w1_all = w1_all.at[i, 0:sd, hid:].set(w1[off:off + sd]); off += sd
        w1_all = w1_all.at[i, off_a:off_a + a_dim,
                           hid:].set(w1[off:off + a_dim]); off += a_dim
        for j in range(i):
            w1_all = w1_all.at[i, s_off[j]:s_off[j] + s_dims[j],
                               hid:].set(w1[off:off + s_dims[j]])
            off += s_dims[j]
        b1_all = b1_all.at[i, 0, 0:hid].set(po["b1"])
        b1_all = b1_all.at[i, 0, hid:].set(pr["b1"])
        # head columns: [mu_q | raw_q | mu_p | raw_p], block-diag over q/p rows
        hw_all = hw_all.at[i, 0:hid, 0:sd].set(po["wm"])
        hw_all = hw_all.at[i, 0:hid, SD:SD + sd].set(po["ws"])
        hw_all = hw_all.at[i, hid:, 2 * SD:2 * SD + sd].set(pr["wm"])
        hw_all = hw_all.at[i, hid:, 3 * SD:3 * SD + sd].set(pr["ws"])
        hb_all = hb_all.at[i, 0, 0:sd].set(po["bm"])
        hb_all = hb_all.at[i, 0, SD:SD + sd].set(po["bs"])
        hb_all = hb_all.at[i, 0, 2 * SD:2 * SD + sd].set(pr["bm"])
        hb_all = hb_all.at[i, 0, 3 * SD:3 * SD + sd].set(pr["bs"])

    # Fused decoder (block-diag over states) applied to stacked [sq_all ; sp_all].
    dw1 = jnp.zeros((sum_sd, NS * hid), jnp.float32)
    db1 = jnp.zeros((1, NS * hid), jnp.float32)
    dw2 = jnp.zeros((NS * hid, NS * x_dim), jnp.float32)
    db2 = jnp.zeros((1, NS * x_dim), jnp.float32)
    for i, sd in enumerate(s_dims):
        de = raw["dec"][i]
        r0 = sum(s_dims[:i])
        dw1 = dw1.at[r0:r0 + sd, i * hid:(i + 1) * hid].set(de["w1"])
        db1 = db1.at[0, i * hid:(i + 1) * hid].set(de["b1"])
        dw2 = dw2.at[i * hid:(i + 1) * hid, i * x_dim:(i + 1) * x_dim].set(de["w2"])
        db2 = db2.at[0, i * x_dim:(i + 1) * x_dim].set(de["b2"])

    return dict(ew1=ew1.astype(bf), eb1=eb1, ew2=ew2.astype(bf), eb2=eb2,
                w1_all=w1_all.astype(bf), b1_all=b1_all,
                hw_all=hw_all.astype(bf), hb_all=hb_all,
                dw1=dw1.astype(bf), db1=db1, dw2=dw2.astype(bf), db2=db2)


# ---------------------------------------------------------------------------
# Fused SSM forward: one pallas_call, no grid, T loop unrolled in-kernel.
# ---------------------------------------------------------------------------

def ssm_forward(cfg, packed, x0, x, a, eps_list):
    """Mirrors SSM.forward(feed_dict, train=False) with gan=False."""
    NS = len(cfg.s_dims)
    s_dims = tuple(cfg.s_dims)
    SD, off_h, off_a, s_off, K = _z_layout(cfg)
    sum_sd = sum(s_dims)
    B = x0.shape[0]
    T = x.shape[0]
    x_dim = cfg.C * cfg.H * cfg.W
    hid, h_dim, a_dim = cfg.hid, cfg.h_dim, cfg.a_dim
    min_std = float(cfg.min_stddev)
    nll_const = 0.5 * math.log(2.0 * math.pi) * x_dim
    inv_B = 1.0 / B

    # Host-side layout plumbing: one lane-dense frame slab (x0 first), flat a/eps.
    xs = jnp.concatenate([x0.reshape(B, x_dim),
                          x.reshape(T * B, x_dim)], axis=0).astype(jnp.float32)
    af = a.reshape(T * B, a_dim).astype(jnp.float32)
    epsf = jnp.concatenate(
        [eps_list[i].reshape(T * B, s_dims[i]) for i in range(NS)],
        axis=-1).astype(jnp.float32)

    def kernel(xs_ref, a_ref, eps_ref,
               ew1_ref, eb1_ref, ew2_ref, eb2_ref,
               w1_ref, b1_ref, hw_ref, hb_ref,
               dw1_ref, db1_ref, dw2_ref, db2_ref,
               out_ref, z_ref, dec_ref):
        bf16 = jnp.bfloat16
        TB1 = (T + 1) * B

        def mm(lhs, w):                      # bf16 MXU operands, f32 accumulate
            return jnp.dot(lhs.astype(bf16), w,
                           preferred_element_type=jnp.float32)

        # ---- hoisted weight loads & bias broadcasts (loop is unrolled) -------
        ew1, ew2 = ew1_ref[...], ew2_ref[...]
        eb1 = jnp.broadcast_to(eb1_ref[...], (TB1, NS * hid))
        eb2 = jnp.broadcast_to(eb2_ref[...], (TB1, NS * h_dim))
        dw1, dw2 = dw1_ref[...], dw2_ref[...]
        db1 = jnp.broadcast_to(db1_ref[...], (2 * B, NS * hid))
        db2 = jnp.broadcast_to(db2_ref[...], (2 * B, NS * x_dim))
        w1 = [w1_ref[i] for i in range(NS)]                  # (K, 2*hid)  bf16
        hw = [hw_ref[i] for i in range(NS)]                  # (2*hid, 4*SD) bf16
        b1 = [jnp.broadcast_to(b1_ref[i], (B, 2 * hid)) for i in range(NS)]
        hb = [jnp.broadcast_to(hb_ref[i], (B, 4 * SD)) for i in range(NS)]

        # ---- encoder: x0 and every frame in ONE batched matmul chain ---------
        xs_all = xs_ref[...]                                 # ((T+1)*B, x_dim)
        h1 = jnp.maximum(mm(xs_all, ew1) + eb1, 0.0)
        h_all = mm(h1, ew2) + eb2                            # ((T+1)*B, NS*h_dim)

        a_all = a_ref[...]                                   # (T*B, a_dim)
        eps_all = eps_ref[...]                               # (T*B, sum_sd)

        def softplus(r):                                     # stable, f32
            return jnp.maximum(r, 0.0) + jnp.log(1.0 + jnp.exp(-jnp.abs(r)))

        def qp_heads(i, z):
            """Fused posterior+prior first layer + both Gaussian heads, state i."""
            pre = jnp.maximum(mm(z, w1[i]) + b1[i], 0.0)     # (B, 2*hid)
            o = mm(pre, hw[i]) + hb[i]                       # (B, 4*SD)
            sd = s_dims[i]
            return (o[:, 0:sd], o[:, SD:SD + sd],
                    o[:, 2 * SD:2 * SD + sd], o[:, 3 * SD:3 * SD + sd])

        # ---- sample_s0: s_prev = 0 and a_list = zeros in the reference, so
        # only h(x0) feeds the posterior; take its mean. -------------------------
        z_ref[...] = jnp.zeros_like(z_ref)
        z_ref[:, off_h:off_h + NS * h_dim] = h_all[0:B]
        z0 = z_ref[...]
        s_prev = [qp_heads(i, z0)[0] for i in range(NS)]

        # ---- loss accumulators carried in registers through the unrolled loop
        s_acc = [jnp.zeros((1, 1), jnp.float32) for _ in range(NS)]
        aux_acc = [jnp.zeros((1, 1), jnp.float32) for _ in range(NS)]
        xq_acc = [jnp.full((1, 1), T * nll_const, jnp.float32) for _ in range(NS)]
        xp_acc = [jnp.full((1, 1), T * nll_const, jnp.float32) for _ in range(NS)]

        # T is small & static -> full unroll (use lax.fori_loop for large T).
        for t in range(T):
            r0 = (1 + t) * B
            x_t = xs_all[r0:r0 + B]                          # (B, x_dim) f32
            # Timestep-invariant z slots (h, a).  Stale s_j slots with j >= i
            # are harmless: their fused-weight rows are zero.
            z_ref[:, off_h:off_h + NS * h_dim] = h_all[r0:r0 + B]
            z_ref[:, off_a:off_a + a_dim] = a_all[t * B:(t + 1) * B]
            eps_t = eps_all[t * B:(t + 1) * B]

            s_new = []
            for i in range(NS):
                sd = s_dims[i]
                z_ref[:, 0:sd] = s_prev[i]
                for j in range(i):
                    z_ref[:, s_off[j]:s_off[j] + s_dims[j]] = s_new[j]
                mu_q, raw_q, mu_p, raw_p = qp_heads(i, z_ref[...])

                std_q = softplus(raw_q) + min_std
                std_p = softplus(raw_p) + min_std
                log_q, log_p = jnp.log(std_q), jnp.log(std_p)
                var_q = std_q * std_q
                dmu = mu_q - mu_p
                # KL(q||p): exact reciprocal (no approx) for reference parity.
                kl_qp = (log_p - log_q - 0.5
                         + (var_q + dmu * dmu) / (2.0 * std_p * std_p))
                s_acc[i] = s_acc[i] + inv_B * jnp.sum(kl_qp, keepdims=True)

                # KL(q || N(0,1)), mean over batch * s_dim.
                kl_01 = -log_q + 0.5 * (var_q + mu_q * mu_q) - 0.5
                aux_acc[i] = aux_acc[i] + (1.0 / (B * sd)) * jnp.sum(kl_01,
                                                                     keepdims=True)

                e_off = sum(s_dims[:i])
                sq = mu_q + std_q * eps_t[:, e_off:e_off + sd]   # rsample
                s_new.append(mu_p)            # train=False: carry the prior mean
                dec_ref[0:B, e_off:e_off + sd] = sq
                dec_ref[B:2 * B, e_off:e_off + sd] = mu_p

            s_prev = s_new

            # ---- fused decoders: q & p samples of every state, one chain -----
            hdec = jnp.maximum(mm(dec_ref[...], dw1) + db1, 0.0)  # (2B, NS*hid)
            mean = mm(hdec, dw2) + db2                            # (2B, NS*x_dim)
            for i in range(NS):
                c0 = i * x_dim
                dq = mean[0:B, c0:c0 + x_dim] - x_t
                dp = mean[B:2 * B, c0:c0 + x_dim] - x_t
                xq_acc[i] = xq_acc[i] + (0.5 * inv_B) * jnp.sum(dq * dq,
                                                                keepdims=True)
                xp_acc[i] = xp_acc[i] + (0.5 * inv_B) * jnp.sum(dp * dp,
                                                                keepdims=True)

        # ---- single lane-packed write of all 4*NS loss parts (written once) ---
        for i in range(NS):
            out_ref[:, 4 * i + 0:4 * i + 1] = s_acc[i]
            out_ref[:, 4 * i + 1:4 * i + 2] = aux_acc[i]
            out_ref[:, 4 * i + 2:4 * i + 3] = xq_acc[i]
            out_ref[:, 4 * i + 3:4 * i + 4] = xp_acc[i]

    vspec = pl.BlockSpec(memory_space=pltpu.MemorySpace.VMEM)
    out = pl.pallas_call(
        kernel,
        out_shape=jax.ShapeDtypeStruct((1, 4 * NS), jnp.float32),
        in_specs=[vspec] * 15,
        out_specs=vspec,
        scratch_shapes=[
            pltpu.VMEM((B, K), jnp.float32),           # packed [s_prev|h|a|s_*]
            pltpu.VMEM((2 * B, sum_sd), jnp.float32),  # stacked [sq_all ; sp_all]
        ],
    )(xs, af, epsf,
      packed["ew1"], packed["eb1"], packed["ew2"], packed["eb2"],
      packed["w1_all"], packed["b1_all"], packed["hw_all"], packed["hb_all"],
      packed["dw1"], packed["db1"], packed["dw2"], packed["db2"])

    losses = out.reshape(NS, 4)
    s_loss, s_aux = losses[:, 0], losses[:, 1]
    xq_loss, xp_loss = losses[:, 2], losses[:, 3]
    g_loss = jnp.sum(s_loss + xq_loss + xp_loss + cfg.gamma * s_aux)
    return g_loss, {"s_loss": s_loss, "s_aux_loss": s_aux,
                    "xq_loss": xq_loss, "xp_loss": xp_loss}


# ---------------------------------------------------------------------------
# main
# ---------------------------------------------------------------------------

if __name__ == "__main__":
    cfg = Config()
    key = jax.random.PRNGKey(0)
    k_par, k_x0, k_x, k_a, k_eps = jax.random.split(key, 5)

    raw = init_raw_params(cfg, k_par)
    packed = pack_params(cfg, raw)

    # PyTorch conventions: x is (T, B, C, H, W), a is (T, B, a_dim), x0 is (B,C,H,W).
    x0 = jax.random.uniform(k_x0, (cfg.B, cfg.C, cfg.H, cfg.W), jnp.float32)
    x = jax.random.uniform(k_x, (cfg.T, cfg.B, cfg.C, cfg.H, cfg.W), jnp.float32)
    a = jax.random.normal(k_a, (cfg.T, cfg.B, cfg.a_dim), jnp.float32)
    # deterministic stand-in for posterior .rsample() noise (one array per state)
    eps_keys = jax.random.split(k_eps, len(cfg.s_dims))
    eps_list = [jax.random.normal(eps_keys[i], (cfg.T, cfg.B, sd), jnp.float32)
                for i, sd in enumerate(cfg.s_dims)]

    fwd = jax.jit(functools.partial(ssm_forward, cfg))
    g_loss, parts = fwd(packed, x0, x, a, eps_list)
    g_loss = jax.block_until_ready(g_loss)

    assert bool(jnp.isfinite(g_loss)), "non-finite loss"
    print("KERNEL_OK")
</pallas_src>

<mosaic_0001>
module attributes {stable_mosaic.version = 11 : i64} {
  func.func @kernel(%arg0: memref<8x768xf32, #tpu.memory_space<vmem>>, %arg1: memref<6x4xf32, #tpu.memory_space<vmem>>, %arg2: memref<6x32xf32, #tpu.memory_space<vmem>>, %arg3: memref<768x128xbf16, #tpu.memory_space<vmem>>, %arg4: memref<1x128xf32, #tpu.memory_space<vmem>>, %arg5: memref<128x64xbf16, #tpu.memory_space<vmem>>, %arg6: memref<1x64xf32, #tpu.memory_space<vmem>>, %arg7: memref<2x116x128xbf16, #tpu.memory_space<vmem>>, %arg8: memref<2x1x128xf32, #tpu.memory_space<vmem>>, %arg9: memref<2x128x64xbf16, #tpu.memory_space<vmem>>, %arg10: memref<2x1x64xf32, #tpu.memory_space<vmem>>, %arg11: memref<32x128xbf16, #tpu.memory_space<vmem>>, %arg12: memref<1x128xf32, #tpu.memory_space<vmem>>, %arg13: memref<128x1536xbf16, #tpu.memory_space<vmem>>, %arg14: memref<1x1536xf32, #tpu.memory_space<vmem>>, %arg15: memref<1x8xf32, #tpu.memory_space<vmem>>, %arg16: memref<2x116xf32, #tpu.memory_space<vmem>>, %arg17: memref<4x32xf32, #tpu.memory_space<vmem>>) attributes {dimension_semantics = [], scalar_prefetch = 0 : i64, scratch_operands = 2 : i64, tpu.core_type = #tpu.core_type<tc>} {
    %c0 = arith.constant 0 : index
    %c0_0 = arith.constant 0 : index
    %0 = vector.load %arg3[%c0, %c0_0] : memref<768x128xbf16, #tpu.memory_space<vmem>>, vector<768x128xbf16>
    %c0_1 = arith.constant 0 : index
    %c0_2 = arith.constant 0 : index
    %1 = vector.load %arg5[%c0_1, %c0_2] : memref<128x64xbf16, #tpu.memory_space<vmem>>, vector<128x64xbf16>
    %c0_3 = arith.constant 0 : index
    %c0_4 = arith.constant 0 : index
    %2 = vector.load %arg4[%c0_3, %c0_4] : memref<1x128xf32, #tpu.memory_space<vmem>>, vector<1x128xf32>
    %3 = vector.shape_cast %2 : vector<1x128xf32> to vector<1x128xf32>
    %4 = vector.broadcast %3 : vector<1x128xf32> to vector<8x128xf32>
    %c0_5 = arith.constant 0 : index
    %c0_6 = arith.constant 0 : index
    %5 = vector.load %arg6[%c0_5, %c0_6] : memref<1x64xf32, #tpu.memory_space<vmem>>, vector<1x64xf32>
    %6 = vector.shape_cast %5 : vector<1x64xf32> to vector<1x64xf32>
    %7 = vector.broadcast %6 : vector<1x64xf32> to vector<8x64xf32>
    %c0_7 = arith.constant 0 : index
    %c0_8 = arith.constant 0 : index
    %8 = vector.load %arg11[%c0_7, %c0_8] : memref<32x128xbf16, #tpu.memory_space<vmem>>, vector<32x128xbf16>
    %c0_9 = arith.constant 0 : index
    %c0_10 = arith.constant 0 : index
    %9 = vector.load %arg13[%c0_9, %c0_10] : memref<128x1536xbf16, #tpu.memory_space<vmem>>, vector<128x1536xbf16>
    %c0_11 = arith.constant 0 : index
    %c0_12 = arith.constant 0 : index
    %10 = vector.load %arg12[%c0_11, %c0_12] : memref<1x128xf32, #tpu.memory_space<vmem>>, vector<1x128xf32>
    %11 = vector.shape_cast %10 : vector<1x128xf32> to vector<1x128xf32>
    %12 = vector.broadcast %11 : vector<1x128xf32> to vector<4x128xf32>
    %c0_13 = arith.constant 0 : index
    %c0_14 = arith.constant 0 : index
    %13 = vector.load %arg14[%c0_13, %c0_14] : memref<1x1536xf32, #tpu.memory_space<vmem>>, vector<1x1536xf32>
    %14 = vector.shape_cast %13 : vector<1x1536xf32> to vector<1x1536xf32>
    %15 = vector.broadcast %14 : vector<1x1536xf32> to vector<4x1536xf32>
    %c0_15 = arith.constant 0 : index
    %c0_16 = arith.constant 0 : index
    %c0_17 = arith.constant 0 : index
    %16 = vector.load %arg7[%c0_15, %c0_16, %c0_17] : memref<2x116x128xbf16, #tpu.memory_space<vmem>>, vector<1x116x128xbf16>
    %17 = vector.shape_cast %16 : vector<1x116x128xbf16> to vector<116x128xbf16>
    %c1 = arith.constant 1 : index
    %c0_18 = arith.constant 0 : index
    %c0_19 = arith.constant 0 : index
    %18 = vector.load %arg7[%c1, %c0_18, %c0_19] : memref<2x116x128xbf16, #tpu.memory_space<vmem>>, vector<1x116x128xbf16>
    %19 = vector.shape_cast %18 : vector<1x116x128xbf16> to vector<116x128xbf16>
    %c0_20 = arith.constant 0 : index
    %c0_21 = arith.constant 0 : index
    %c0_22 = arith.constant 0 : index
    %20 = vector.load %arg9[%c0_20, %c0_21, %c0_22] : memref<2x128x64xbf16, #tpu.memory_space<vmem>>, vector<1x128x64xbf16>
    %21 = vector.shape_cast %20 : vector<1x128x64xbf16> to vector<128x64xbf16>
    %c1_23 = arith.constant 1 : index
    %c0_24 = arith.constant 0 : index
    %c0_25 = arith.constant 0 : index
    %22 = vector.load %arg9[%c1_23, %c0_24, %c0_25] : memref<2x128x64xbf16, #tpu.memory_space<vmem>>, vector<1x128x64xbf16>
    %23 = vector.shape_cast %22 : vector<1x128x64xbf16> to vector<128x64xbf16>
    %c0_26 = arith.constant 0 : index
    %c0_27 = arith.constant 0 : index
    %c0_28 = arith.constant 0 : index
    %24 = vector.load %arg8[%c0_26, %c0_27, %c0_28] : memref<2x1x128xf32, #tpu.memory_space<vmem>>, vector<1x1x128xf32>
    %25 = vector.shape_cast %24 : vector<1x1x128xf32> to vector<1x128xf32>
    %26 = vector.shape_cast %25 : vector<1x128xf32> to vector<1x128xf32>
    %27 = vector.broadcast %26 : vector<1x128xf32> to vector<2x128xf32>
    %c1_29 = arith.constant 1 : index
    %c0_30 = arith.constant 0 : index
    %c0_31 = arith.constant 0 : index
    %28 = vector.load %arg8[%c1_29, %c0_30, %c0_31] : memref<2x1x128xf32, #tpu.memory_space<vmem>>, vector<1x1x128xf32>
    %29 = vector.shape_cast %28 : vector<1x1x128xf32> to vector<1x128xf32>
    %30 = vector.shape_cast %29 : vector<1x128xf32> to vector<1x128xf32>
    %31 = vector.broadcast %30 : vector<1x128xf32> to vector<2x128xf32>
    %c0_32 = arith.constant 0 : index
    %c0_33 = arith.constant 0 : index
    %c0_34 = arith.constant 0 : index
    %32 = vector.load %arg10[%c0_32, %c0_33, %c0_34] : memref<2x1x64xf32, #tpu.memory_space<vmem>>, vector<1x1x64xf32>
    %33 = vector.shape_cast %32 : vector<1x1x64xf32> to vector<1x64xf32>
    %34 = vector.shape_cast %33 : vector<1x64xf32> to vector<1x64xf32>
    %35 = vector.broadcast %34 : vector<1x64xf32> to vector<2x64xf32>
    %c1_35 = arith.constant 1 : index
    %c0_36 = arith.constant 0 : index
    %c0_37 = arith.constant 0 : index
    %36 = vector.load %arg10[%c1_35, %c0_36, %c0_37] : memref<2x1x64xf32, #tpu.memory_space<vmem>>, vector<1x1x64xf32>
    %37 = vector.shape_cast %36 : vector<1x1x64xf32> to vector<1x64xf32>
    %38 = vector.shape_cast %37 : vector<1x64xf32> to vector<1x64xf32>
    %39 = vector.broadcast %38 : vector<1x64xf32> to vector<2x64xf32>
    %c0_38 = arith.constant 0 : index
    %c0_39 = arith.constant 0 : index
    %40 = vector.load %arg0[%c0_38, %c0_39] : memref<8x768xf32, #tpu.memory_space<vmem>>, vector<8x768xf32>
    %41 = arith.truncf %40 : vector<8x768xf32> to vector<8x768xbf16>
    %cst = arith.constant dense<0.000000e+00> : vector<8x128xf32>
    %42 = tpu.matmul %41, %0, %cst {dimension_numbers = #tpu.dot_dimension_numbers<[1], [0], [0], [1], [0, 0, 1, 1], [], []>} : vector<8x768xbf16>, vector<768x128xbf16>, vector<8x128xf32> -> vector<8x128xf32>
    %43 = arith.addf %42, %4 : vector<8x128xf32>
    %cst_40 = arith.constant 0.000000e+00 : f32
    %44 = vector.broadcast %cst_40 : f32 to vector<8x128xf32>
    %45 = arith.maximumf %43, %44 : vector<8x128xf32>
    %46 = arith.truncf %45 : vector<8x128xf32> to vector<8x128xbf16>
    %cst_41 = arith.constant dense<0.000000e+00> : vector<8x64xf32>
    %47 = tpu.matmul %46, %1, %cst_41 {dimension_numbers = #tpu.dot_dimension_numbers<[1], [0], [0], [1], [0, 0, 1, 1], [], []>} : vector<8x128xbf16>, vector<128x64xbf16>, vector<8x64xf32> -> vector<8x64xf32>
    %48 = arith.addf %47, %7 : vector<8x64xf32>
    %c0_42 = arith.constant 0 : index
    %c0_43 = arith.constant 0 : index
    %49 = vector.load %arg1[%c0_42, %c0_43] : memref<6x4xf32, #tpu.memory_space<vmem>>, vector<6x4xf32>
    %c0_44 = arith.constant 0 : index
    %c0_45 = arith.constant 0 : index
    %50 = vector.load %arg2[%c0_44, %c0_45] : memref<6x32xf32, #tpu.memory_space<vmem>>, vector<6x32xf32>
    %cst_46 = arith.constant 0.000000e+00 : f32
    %51 = vector.broadcast %cst_46 : f32 to vector<2x116xf32>
    %c0_47 = arith.constant 0 : index
    %c0_48 = arith.constant 0 : index
    %52 = vector.load %arg16[%c0_47, %c0_48] : memref<2x116xf32, #tpu.memory_space<vmem>>, vector<2x116xf32>
    tpu.vector_store %arg16[%c0_47, %c0_48], %51 {strides = array<i32>} : memref<2x116xf32, #tpu.memory_space<vmem>>, vector<2x116xf32>,
    %53 = vector.extract_strided_slice %48 {offsets = [0, 0], sizes = [2, 64], strides = [1, 1]} : vector<8x64xf32> to vector<2x64xf32>
    %c0_49 = arith.constant 0 : index
    %c16 = arith.constant 16 : index
    %54 = vector.load %arg16[%c0_49, %c16] : memref<2x116xf32, #tpu.memory_space<vmem>>, vector<2x64xf32>
    tpu.vector_store %arg16[%c0_49, %c16], %53 {strides = array<i32>} : memref<2x116xf32, #tpu.memory_space<vmem>>, vector<2x64xf32>,
    %c0_50 = arith.constant 0 : index
    %c0_51 = arith.constant 0 : index
    %55 = vector.load %arg16[%c0_50, %c0_51] : memref<2x116xf32, #tpu.memory_space<vmem>>, vector<2x116xf32>
    %56 = arith.truncf %55 : vector<2x116xf32> to vector<2x116xbf16>
    %cst_52 = arith.constant dense<0.000000e+00> : vector<2x128xf32>
    %57 = tpu.matmul %56, %17, %cst_52 {dimension_numbers = #tpu.dot_dimension_numbers<[1], [0], [0], [1], [0, 0, 1, 1], [], []>} : vector<2x116xbf16>, vector<116x128xbf16>, vector<2x128xf32> -> vector<2x128xf32>
    %58 = arith.addf %57, %27 : vector<2x128xf32>
    %cst_53 = arith.constant 0.000000e+00 : f32
    %59 = vector.broadcast %cst_53 : f32 to vector<2x128xf32>
    %60 = arith.maximumf %58, %59 : vector<2x128xf32>
    %61 = arith.truncf %60 : vector<2x128xf32> to vector<2x128xbf16>
    %cst_54 = arith.constant dense<0.000000e+00> : vector<2x64xf32>
    %62 = tpu.matmul %61, %21, %cst_54 {dimension_numbers = #tpu.dot_dimension_numbers<[1], [0], [0], [1], [0, 0, 1, 1], [], []>} : vector<2x128xbf16>, vector<128x64xbf16>, vector<2x64xf32> -> vector<2x64xf32>
    %63 = arith.addf %62, %35 : vector<2x64xf32>
    %64 = vector.extract_strided_slice %63 {offsets = [0, 0], sizes = [2, 16], strides = [1, 1]} : vector<2x64xf32> to vector<2x16xf32>
    %65 = arith.truncf %55 : vector<2x116xf32> to vector<2x116xbf16>
    %cst_55 = arith.constant dense<0.000000e+00> : vector<2x128xf32>
    %66 = tpu.matmul %65, %19, %cst_55 {dimension_numbers = #tpu.dot_dimension_numbers<[1], [0], [0], [1], [0, 0, 1, 1], [], []>} : vector<2x116xbf16>, vector<116x128xbf16>, vector<2x128xf32> -> vector<2x128xf32>
    %67 = arith.addf %66, %31 : vector<2x128xf32>
    %cst_56 = arith.constant 0.000000e+00 : f32
    %68 = vector.broadcast %cst_56 : f32 to vector<2x128xf32>
    %69 = arith.maximumf %67, %68 : vector<2x128xf32>
    %70 = arith.truncf %69 : vector<2x128xf32> to vector<2x128xbf16>
    %cst_57 = arith.constant dense<0.000000e+00> : vector<2x64xf32>
    %71 = tpu.matmul %70, %23, %cst_57 {dimension_numbers = #tpu.dot_dimension_numbers<[1], [0], [0], [1], [0, 0, 1, 1], [], []>} : vector<2x128xbf16>, vector<128x64xbf16>, vector<2x64xf32> -> vector<2x64xf32>
    %72 = arith.addf %71, %39 : vector<2x64xf32>
    %73 = vector.extract_strided_slice %72 {offsets = [0, 0], sizes = [2, 16], strides = [1, 1]} : vector<2x64xf32> to vector<2x16xf32>
    %cst_58 = arith.constant 0.000000e+00 : f32
    %74 = vector.broadcast %cst_58 : f32 to vector<1x1xf32>
    %cst_59 = arith.constant 0.000000e+00 : f32
    %75 = vector.broadcast %cst_59 : f32 to vector<1x1xf32>
    %cst_60 = arith.constant 0.000000e+00 : f32
    %76 = vector.broadcast %cst_60 : f32 to vector<1x1xf32>
    %cst_61 = arith.constant 0.000000e+00 : f32
    %77 = vector.broadcast %cst_61 : f32 to vector<1x1xf32>
    %cst_62 = arith.constant 2117.23438 : f32
    %78 = vector.broadcast %cst_62 : f32 to vector<1x1xf32>
    %cst_63 = arith.constant 2117.23438 : f32
    %79 = vector.broadcast %cst_63 : f32 to vector<1x1xf32>
    %cst_64 = arith.constant 2117.23438 : f32
    %80 = vector.broadcast %cst_64 : f32 to vector<1x1xf32>
    %cst_65 = arith.constant 2117.23438 : f32
    %81 = vector.broadcast %cst_65 : f32 to vector<1x1xf32>
    %82 = vector.extract_strided_slice %40 {offsets = [2, 0], sizes = [2, 768], strides = [1, 1]} : vector<8x768xf32> to vector<2x768xf32>
    %83 = vector.extract_strided_slice %48 {offsets = [2, 0], sizes = [2, 64], strides = [1, 1]} : vector<8x64xf32> to vector<2x64xf32>
    %c0_66 = arith.constant 0 : index
    %c16_67 = arith.constant 16 : index
    %84 = vector.load %arg16[%c0_66, %c16_67] : memref<2x116xf32, #tpu.memory_space<vmem>>, vector<2x64xf32>
    tpu.vector_store %arg16[%c0_66, %c16_67], %83 {strides = array<i32>} : memref<2x116xf32, #tpu.memory_space<vmem>>, vector<2x64xf32>,
    %85 = vector.extract_strided_slice %49 {offsets = [0, 0], sizes = [2, 4], strides = [1, 1]} : vector<6x4xf32> to vector<2x4xf32>
    %c0_68 = arith.constant 0 : index
    %c80 = arith.constant 80 : index
    %86 = vector.load %arg16[%c0_68, %c80] : memref<2x116xf32, #tpu.memory_space<vmem>>, vector<2x4xf32>
    tpu.vector_store %arg16[%c0_68, %c80], %85 {strides = array<i32>} : memref<2x116xf32, #tpu.memory_space<vmem>>, vector<2x4xf32>,
    %87 = vector.extract_strided_slice %50 {offsets = [0, 0], sizes = [2, 32], strides = [1, 1]} : vector<6x32xf32> to vector<2x32xf32>
    %c0_69 = arith.constant 0 : index
    %c0_70 = arith.constant 0 : index
    %88 = vector.load %arg16[%c0_69, %c0_70] : memref<2x116xf32, #tpu.memory_space<vmem>>, vector<2x16xf32>
    tpu.vector_store %arg16[%c0_69, %c0_70], %64 {strides = array<i32>} : memref<2x116xf32, #tpu.memory_space<vmem>>, vector<2x16xf32>,
    %c0_71 = arith.constant 0 : index
    %c0_72 = arith.constant 0 : index
    %89 = vector.load %arg16[%c0_71, %c0_72] : memref<2x116xf32, #tpu.memory_space<vmem>>, vector<2x116xf32>
    %90 = arith.truncf %89 : vector<2x116xf32> to vector<2x116xbf16>
    %cst_73 = arith.constant dense<0.000000e+00> : vector<2x128xf32>
    %91 = tpu.matmul %90, %17, %cst_73 {dimension_numbers = #tpu.dot_dimension_numbers<[1], [0], [0], [1], [0, 0, 1, 1], [], []>} : vector<2x116xbf16>, vector<116x128xbf16>, vector<2x128xf32> -> vector<2x128xf32>
    %92 = arith.addf %91, %27 : vector<2x128xf32>
    %cst_74 = arith.constant 0.000000e+00 : f32
    %93 = vector.broadcast %cst_74 : f32 to vector<2x128xf32>
    %94 = arith.maximumf %92, %93 : vector<2x128xf32>
    %95 = arith.truncf %94 : vector<2x128xf32> to vector<2x128xbf16>
    %cst_75 = arith.constant dense<0.000000e+00> : vector<2x64xf32>
    %96 = tpu.matmul %95, %21, %cst_75 {dimension_numbers = #tpu.dot_dimension_numbers<[1], [0], [0], [1], [0, 0, 1, 1], [], []>} : vector<2x128xbf16>, vector<128x64xbf16>, vector<2x64xf32> -> vector<2x64xf32>
    %97 = arith.addf %96, %35 : vector<2x64xf32>
    %98 = vector.extract_strided_slice %97 {offsets = [0, 0], sizes = [2, 16], strides = [1, 1]} : vector<2x64xf32> to vector<2x16xf32>
    %99 = vector.extract_strided_slice %97 {offsets = [0, 16], sizes = [2, 16], strides = [1, 1]} : vector<2x64xf32> to vector<2x16xf32>
    %100 = vector.extract_strided_slice %97 {offsets = [0, 32], sizes = [2, 16], strides = [1, 1]} : vector<2x64xf32> to vector<2x16xf32>
    %101 = vector.extract_strided_slice %97 {offsets = [0, 48], sizes = [2, 16], strides = [1, 1]} : vector<2x64xf32> to vector<2x16xf32>
    %cst_76 = arith.constant 0.000000e+00 : f32
    %102 = vector.broadcast %cst_76 : f32 to vector<2x16xf32>
    %103 = arith.maximumf %99, %102 : vector<2x16xf32>
    %104 = math.absf %99 : vector<2x16xf32>
    %cst_77 = arith.constant 0.000000e+00 : f32
    %105 = vector.broadcast %cst_77 : f32 to vector<2x16xf32>
    %106 = arith.subf %105, %104 : vector<2x16xf32>
    %107 = math.exp %106 : vector<2x16xf32>
    %cst_78 = arith.constant 1.000000e+00 : f32
    %108 = vector.broadcast %cst_78 : f32 to vector<2x16xf32>
    %109 = arith.addf %108, %107 : vector<2x16xf32>
    %110 = math.log %109 : vector<2x16xf32>
    %111 = arith.addf %103, %110 : vector<2x16xf32>
    %cst_79 = arith.constant 1.000000e-01 : f32
    %112 = vector.broadcast %cst_79 : f32 to vector<2x16xf32>
    %113 = arith.addf %111, %112 : vector<2x16xf32>
    %cst_80 = arith.constant 0.000000e+00 : f32
    %114 = vector.broadcast %cst_80 : f32 to vector<2x16xf32>
    %115 = arith.maximumf %101, %114 : vector<2x16xf32>
    %116 = math.absf %101 : vector<2x16xf32>
    %cst_81 = arith.constant 0.000000e+00 : f32
    %117 = vector.broadcast %cst_81 : f32 to vector<2x16xf32>
    %118 = arith.subf %117, %116 : vector<2x16xf32>
    %119 = math.exp %118 : vector<2x16xf32>
    %cst_82 = arith.constant 1.000000e+00 : f32
    %120 = vector.broadcast %cst_82 : f32 to vector<2x16xf32>
    %121 = arith.addf %120, %119 : vector<2x16xf32>
    %122 = math.log %121 : vector<2x16xf32>
    %123 = arith.addf %115, %122 : vector<2x16xf32>
    %cst_83 = arith.constant 1.000000e-01 : f32
    %124 = vector.broadcast %cst_83 : f32 to vector<2x16xf32>
    %125 = arith.addf %123, %124 : vector<2x16xf32>
    %126 = math.log %113 : vector<2x16xf32>
    %127 = math.log %125 : vector<2x16xf32>
    %128 = arith.mulf %113, %113 : vector<2x16xf32>
    %129 = arith.subf %98, %100 : vector<2x16xf32>
    %130 = arith.subf %127, %126 : vector<2x16xf32>
    %cst_84 = arith.constant 5.000000e-01 : f32
    %131 = vector.broadcast %cst_84 : f32 to vector<2x16xf32>
    %132 = arith.subf %130, %131 : vector<2x16xf32>
    %133 = arith.mulf %129, %129 : vector<2x16xf32>
    %134 = arith.addf %128, %133 : vector<2x16xf32>
    %cst_85 = arith.constant 2.000000e+00 : f32
    %135 = vector.broadcast %cst_85 : f32 to vector<2x16xf32>
    %136 = arith.mulf %135, %125 : vector<2x16xf32>
    %137 = arith.mulf %136, %125 : vector<2x16xf32>
    %138 = arith.divf %134, %137 : vector<2x16xf32>
    %139 = arith.addf %132, %138 : vector<2x16xf32>
    %140 = vector.shape_cast %139 : vector<2x16xf32> to vector<1x2x16xf32>
    %cst_86 = arith.constant dense<0.000000e+00> : vector<1xf32>
    %141 = vector.multi_reduction <add>, %140, %cst_86 [1, 2] : vector<1x2x16xf32> to vector<1xf32>
    %142 = vector.shape_cast %141 : vector<1xf32> to vector<1x1x1xf32>
    %143 = vector.extract %142[0, 0, 0] : f32 from vector<1x1x1xf32>
    %144 = vector.broadcast %143 : f32 to vector<1x1xf32>
    %cst_87 = arith.constant 5.000000e-01 : f32
    %145 = vector.broadcast %cst_87 : f32 to vector<1x1xf32>
    %146 = arith.mulf %145, %144 : vector<1x1xf32>
    %147 = arith.addf %74, %146 : vector<1x1xf32>
    %cst_88 = arith.constant 0.000000e+00 : f32
    %148 = vector.broadcast %cst_88 : f32 to vector<2x16xf32>
    %149 = arith.subf %148, %126 : vector<2x16xf32>
    %150 = arith.mulf %98, %98 : vector<2x16xf32>
    %151 = arith.addf %128, %150 : vector<2x16xf32>
    %cst_89 = arith.constant 5.000000e-01 : f32
    %152 = vector.broadcast %cst_89 : f32 to vector<2x16xf32>
    %153 = arith.mulf %152, %151 : vector<2x16xf32>
    %154 = arith.addf %149, %153 : vector<2x16xf32>
    %cst_90 = arith.constant 5.000000e-01 : f32
    %155 = vector.broadcast %cst_90 : f32 to vector<2x16xf32>
    %156 = arith.subf %154, %155 : vector<2x16xf32>
    %157 = vector.shape_cast %156 : vector<2x16xf32> to vector<1x2x16xf32>
    %cst_91 = arith.constant dense<0.000000e+00> : vector<1xf32>
    %158 = vector.multi_reduction <add>, %157, %cst_91 [1, 2] : vector<1x2x16xf32> to vector<1xf32>
    %159 = vector.shape_cast %158 : vector<1xf32> to vector<1x1x1xf32>
    %160 = vector.extract %159[0, 0, 0] : f32 from vector<1x1x1xf32>
    %161 = vector.broadcast %160 : f32 to vector<1x1xf32>
    %cst_92 = arith.constant 3.125000e-02 : f32
    %162 = vector.broadcast %cst_92 : f32 to vector<1x1xf32>
    %163 = arith.mulf %162, %161 : vector<1x1xf32>
    %164 = arith.addf %76, %163 : vector<1x1xf32>
    %165 = vector.extract_strided_slice %87 {offsets = [0, 0], sizes = [2, 16], strides = [1, 1]} : vector<2x32xf32> to vector<2x16xf32>
    %166 = arith.mulf %113, %165 : vector<2x16xf32>
    %167 = arith.addf %98, %166 : vector<2x16xf32>
    %c0_93 = arith.constant 0 : index
    %c0_94 = arith.constant 0 : index
    %168 = vector.load %arg17[%c0_93, %c0_94] : memref<4x32xf32, #tpu.memory_space<vmem>>, vector<2x16xf32>
    tpu.vector_store %arg17[%c0_93, %c0_94], %167 {strides = array<i32>} : memref<4x32xf32, #tpu.memory_space<vmem>>, vector<2x16xf32>,
    %c2 = arith.constant 2 : index
    %c0_95 = arith.constant 0 : index
    %169 = vector.load %arg17[%c2, %c0_95] : memref<4x32xf32, #tpu.memory_space<vmem>>, vector<2x16xf32>
    tpu.vector_store %arg17[%c2, %c0_95], %100 {strides = array<i32>} : memref<4x32xf32, #tpu.memory_space<vmem>>, vector<2x16xf32>,
    %c0_96 = arith.constant 0 : index
    %c0_97 = arith.constant 0 : index
    %170 = vector.load %arg16[%c0_96, %c0_97] : memref<2x116xf32, #tpu.memory_space<vmem>>, vector<2x16xf32>
    tpu.vector_store %arg16[%c0_96, %c0_97], %73 {strides = array<i32>} : memref<2x116xf32, #tpu.memory_space<vmem>>, vector<2x16xf32>,
    %c0_98 = arith.constant 0 : index
    %c84 = arith.constant 84 : index
    %171 = vector.load %arg16[%c0_98, %c84] : memref<2x116xf32, #tpu.memory_space<vmem>>, vector<2x16xf32>
    tpu.vector_store %arg16[%c0_98, %c84], %100 {strides = array<i32>} : memref<2x116xf32, #tpu.memory_space<vmem>>, vector<2x16xf32>,
    %c0_99 = arith.constant 0 : index
    %c0_100 = arith.constant 0 : index
    %172 = vector.load %arg16[%c0_99, %c0_100] : memref<2x116xf32, #tpu.memory_space<vmem>>, vector<2x116xf32>
    %173 = arith.truncf %172 : vector<2x116xf32> to vector<2x116xbf16>
    %cst_101 = arith.constant dense<0.000000e+00> : vector<2x128xf32>
    %174 = tpu.matmul %173, %19, %cst_101 {dimension_numbers = #tpu.dot_dimension_numbers<[1], [0], [0], [1], [0, 0, 1, 1], [], []>} : vector<2x116xbf16>, vector<116x128xbf16>, vector<2x128xf32> -> vector<2x128xf32>
    %175 = arith.addf %174, %31 : vector<2x128xf32>
    %cst_102 = arith.constant 0.000000e+00 : f32
    %176 = vector.broadcast %cst_102 : f32 to vector<2x128xf32>
    %177 = arith.maximumf %175, %176 : vector<2x128xf32>
    %178 = arith.truncf %177 : vector<2x128xf32> to vector<2x128xbf16>
    %cst_103 = arith.constant dense<0.000000e+00> : vector<2x64xf32>
    %179 = tpu.matmul %178, %23, %cst_103 {dimension_numbers = #tpu.dot_dimension_numbers<[1], [0], [0], [1], [0, 0, 1, 1], [], []>} : vector<2x128xbf16>, vector<128x64xbf16>, vector<2x64xf32> -> vector<2x64xf32>
    %180 = arith.addf %179, %39 : vector<2x64xf32>
    %181 = vector.extract_strided_slice %180 {offsets = [0, 0], sizes = [2, 16], strides = [1, 1]} : vector<2x64xf32> to vector<2x16xf32>
    %182 = vector.extract_strided_slice %180 {offsets = [0, 16], sizes = [2, 16], strides = [1, 1]} : vector<2x64xf32> to vector<2x16xf32>
    %183 = vector.extract_strided_slice %180 {offsets = [0, 32], sizes = [2, 16], strides = [1, 1]} : vector<2x64xf32> to vector<2x16xf32>
    %184 = vector.extract_strided_slice %180 {offsets = [0, 48], sizes = [2, 16], strides = [1, 1]} : vector<2x64xf32> to vector<2x16xf32>
    %cst_104 = arith.constant 0.000000e+00 : f32
    %185 = vector.broadcast %cst_104 : f32 to vector<2x16xf32>
    %186 = arith.maximumf %182, %185 : vector<2x16xf32>
    %187 = math.absf %182 : vector<2x16xf32>
    %cst_105 = arith.constant 0.000000e+00 : f32
    %188 = vector.broadcast %cst_105 : f32 to vector<2x16xf32>
    %189 = arith.subf %188, %187 : vector<2x16xf32>
    %190 = math.exp %189 : vector<2x16xf32>
    %cst_106 = arith.constant 1.000000e+00 : f32
    %191 = vector.broadcast %cst_106 : f32 to vector<2x16xf32>
    %192 = arith.addf %191, %190 : vector<2x16xf32>
    %193 = math.log %192 : vector<2x16xf32>
    %194 = arith.addf %186, %193 : vector<2x16xf32>
    %cst_107 = arith.constant 1.000000e-01 : f32
    %195 = vector.broadcast %cst_107 : f32 to vector<2x16xf32>
    %196 = arith.addf %194, %195 : vector<2x16xf32>
    %cst_108 = arith.constant 0.000000e+00 : f32
    %197 = vector.broadcast %cst_108 : f32 to vector<2x16xf32>
    %198 = arith.maximumf %184, %197 : vector<2x16xf32>
    %199 = math.absf %184 : vector<2x16xf32>
    %cst_109 = arith.constant 0.000000e+00 : f32
    %200 = vector.broadcast %cst_109 : f32 to vector<2x16xf32>
    %201 = arith.subf %200, %199 : vector<2x16xf32>
    %202 = math.exp %201 : vector<2x16xf32>
    %cst_110 = arith.constant 1.000000e+00 : f32
    %203 = vector.broadcast %cst_110 : f32 to vector<2x16xf32>
    %204 = arith.addf %203, %202 : vector<2x16xf32>
    %205 = math.log %204 : vector<2x16xf32>
    %206 = arith.addf %198, %205 : vector<2x16xf32>
    %cst_111 = arith.constant 1.000000e-01 : f32
    %207 = vector.broadcast %cst_111 : f32 to vector<2x16xf32>
    %208 = arith.addf %206, %207 : vector<2x16xf32>
    %209 = math.log %196 : vector<2x16xf32>
    %210 = math.log %208 : vector<2x16xf32>
    %211 = arith.mulf %196, %196 : vector<2x16xf32>
    %212 = arith.subf %181, %183 : vector<2x16xf32>
    %213 = arith.subf %210, %209 : vector<2x16xf32>
    %cst_112 = arith.constant 5.000000e-01 : f32
    %214 = vector.broadcast %cst_112 : f32 to vector<2x16xf32>
    %215 = arith.subf %213, %214 : vector<2x16xf32>
    %216 = arith.mulf %212, %212 : vector<2x16xf32>
    %217 = arith.addf %211, %216 : vector<2x16xf32>
    %cst_113 = arith.constant 2.000000e+00 : f32
    %218 = vector.broadcast %cst_113 : f32 to vector<2x16xf32>
    %219 = arith.mulf %218, %208 : vector<2x16xf32>
    %220 = arith.mulf %219, %208 : vector<2x16xf32>
    %221 = arith.divf %217, %220 : vector<2x16xf32>
    %222 = arith.addf %215, %221 : vector<2x16xf32>
    %223 = vector.shape_cast %222 : vector<2x16xf32> to vector<1x2x16xf32>
    %cst_114 = arith.constant dense<0.000000e+00> : vector<1xf32>
    %224 = vector.multi_reduction <add>, %223, %cst_114 [1, 2] : vector<1x2x16xf32> to vector<1xf32>
    %225 = vector.shape_cast %224 : vector<1xf32> to vector<1x1x1xf32>
    %226 = vector.extract %225[0, 0, 0] : f32 from vector<1x1x1xf32>
    %227 = vector.broadcast %226 : f32 to vector<1x1xf32>
    %cst_115 = arith.constant 5.000000e-01 : f32
    %228 = vector.broadcast %cst_115 : f32 to vector<1x1xf32>
    %229 = arith.mulf %228, %227 : vector<1x1xf32>
    %230 = arith.addf %75, %229 : vector<1x1xf32>
    %cst_116 = arith.constant 0.000000e+00 : f32
    %231 = vector.broadcast %cst_116 : f32 to vector<2x16xf32>
    %232 = arith.subf %231, %209 : vector<2x16xf32>
    %233 = arith.mulf %181, %181 : vector<2x16xf32>
    %234 = arith.addf %211, %233 : vector<2x16xf32>
    %cst_117 = arith.constant 5.000000e-01 : f32
    %235 = vector.broadcast %cst_117 : f32 to vector<2x16xf32>
    %236 = arith.mulf %235, %234 : vector<2x16xf32>
    %237 = arith.addf %232, %236 : vector<2x16xf32>
    %cst_118 = arith.constant 5.000000e-01 : f32
    %238 = vector.broadcast %cst_118 : f32 to vector<2x16xf32>
    %239 = arith.subf %237, %238 : vector<2x16xf32>
    %240 = vector.shape_cast %239 : vector<2x16xf32> to vector<1x2x16xf32>
    %cst_119 = arith.constant dense<0.000000e+00> : vector<1xf32>
    %241 = vector.multi_reduction <add>, %240, %cst_119 [1, 2] : vector<1x2x16xf32> to vector<1xf32>
    %242 = vector.shape_cast %241 : vector<1xf32> to vector<1x1x1xf32>
    %243 = vector.extract %242[0, 0, 0] : f32 from vector<1x1x1xf32>
    %244 = vector.broadcast %243 : f32 to vector<1x1xf32>
    %cst_120 = arith.constant 3.125000e-02 : f32
    %245 = vector.broadcast %cst_120 : f32 to vector<1x1xf32>
    %246 = arith.mulf %245, %244 : vector<1x1xf32>
    %247 = arith.addf %77, %246 : vector<1x1xf32>
    %248 = vector.extract_strided_slice %87 {offsets = [0, 16], sizes = [2, 16], strides = [1, 1]} : vector<2x32xf32> to vector<2x16xf32>
    %249 = arith.mulf %196, %248 : vector<2x16xf32>
    %250 = arith.addf %181, %249 : vector<2x16xf32>
    %c0_121 = arith.constant 0 : index
    %c16_122 = arith.constant 16 : index
    %251 = vector.load %arg17[%c0_121, %c16_122] : memref<4x32xf32, #tpu.memory_space<vmem>>, vector<2x16xf32>
    tpu.vector_store %arg17[%c0_121, %c16_122], %250 {strides = array<i32>} : memref<4x32xf32, #tpu.memory_space<vmem>>, vector<2x16xf32>,
    %c2_123 = arith.constant 2 : index
    %c16_124 = arith.constant 16 : index
    %252 = vector.load %arg17[%c2_123, %c16_124] : memref<4x32xf32, #tpu.memory_space<vmem>>, vector<2x16xf32>
    tpu.vector_store %arg17[%c2_123, %c16_124], %183 {strides = array<i32>} : memref<4x32xf32, #tpu.memory_space<vmem>>, vector<2x16xf32>,
    %c0_125 = arith.constant 0 : index
    %c0_126 = arith.constant 0 : index
    %253 = vector.load %arg17[%c0_125, %c0_126] : memref<4x32xf32, #tpu.memory_space<vmem>>, vector<4x32xf32>
    %254 = arith.truncf %253 : vector<4x32xf32> to vector<4x32xbf16>
    %cst_127 = arith.constant dense<0.000000e+00> : vector<4x128xf32>
    %255 = tpu.matmul %254, %8, %cst_127 {dimension_numbers = #tpu.dot_dimension_numbers<[1], [0], [0], [1], [0, 0, 1, 1], [], []>} : vector<4x32xbf16>, vector<32x128xbf16>, vector<4x128xf32> -> vector<4x128xf32>
    %256 = arith.addf %255, %12 : vector<4x128xf32>
    %cst_128 = arith.constant 0.000000e+00 : f32
    %257 = vector.broadcast %cst_128 : f32 to vector<4x128xf32>
    %258 = arith.maximumf %256, %257 : vector<4x128xf32>
    %259 = arith.truncf %258 : vector<4x128xf32> to vector<4x128xbf16>
    %cst_129 = arith.constant dense<0.000000e+00> : vector<4x1536xf32>
    %260 = tpu.matmul %259, %9, %cst_129 {dimension_numbers = #tpu.dot_dimension_numbers<[1], [0], [0], [1], [0, 0, 1, 1], [], []>} : vector<4x128xbf16>, vector<128x1536xbf16>, vector<4x1536xf32> -> vector<4x1536xf32>
    %261 = arith.addf %260, %15 : vector<4x1536xf32>
    %262 = vector.extract_strided_slice %261 {offsets = [0, 0], sizes = [2, 768], strides = [1, 1]} : vector<4x1536xf32> to vector<2x768xf32>
    %263 = arith.subf %262, %82 : vector<2x768xf32>
    %264 = vector.extract_strided_slice %261 {offsets = [2, 0], sizes = [2, 768], strides = [1, 1]} : vector<4x1536xf32> to vector<2x768xf32>
    %265 = arith.subf %264, %82 : vector<2x768xf32>
    %266 = arith.mulf %263, %263 : vector<2x768xf32>
    %267 = vector.shape_cast %266 : vector<2x768xf32> to vector<1x2x768xf32>
    %cst_130 = arith.constant dense<0.000000e+00> : vector<1xf32>
    %268 = vector.multi_reduction <add>, %267, %cst_130 [1, 2] : vector<1x2x768xf32> to vector<1xf32>
    %269 = vector.shape_cast %268 : vector<1xf32> to vector<1x1x1xf32>
    %270 = vector.extract %269[0, 0, 0] : f32 from vector<1x1x1xf32>
    %271 = vector.broadcast %270 : f32 to vector<1x1xf32>
    %cst_131 = arith.constant 2.500000e-01 : f32
    %272 = vector.broadcast %cst_131 : f32 to vector<1x1xf32>
    %273 = arith.mulf %272, %271 : vector<1x1xf32>
    %274 = arith.addf %78, %273 : vector<1x1xf32>
    %275 = arith.mulf %265, %265 : vector<2x768xf32>
    %276 = vector.shape_cast %275 : vector<2x768xf32> to vector<1x2x768xf32>
    %cst_132 = arith.constant dense<0.000000e+00> : vector<1xf32>
    %277 = vector.multi_reduction <add>, %276, %cst_132 [1, 2] : vector<1x2x768xf32> to vector<1xf32>
    %278 = vector.shape_cast %277 : vector<1xf32> to vector<1x1x1xf32>
    %279 = vector.extract %278[0, 0, 0] : f32 from vector<1x1x1xf32>
    %280 = vector.broadcast %279 : f32 to vector<1x1xf32>
    %cst_133 = arith.constant 2.500000e-01 : f32
    %281 = vector.broadcast %cst_133 : f32 to vector<1x1xf32>
    %282 = arith.mulf %281, %280 : vector<1x1xf32>
    %283 = arith.addf %80, %282 : vector<1x1xf32>
    %284 = vector.extract_strided_slice %261 {offsets = [0, 768], sizes = [2, 768], strides = [1, 1]} : vector<4x1536xf32> to vector<2x768xf32>
    %285 = arith.subf %284, %82 : vector<2x768xf32>
    %286 = vector.extract_strided_slice %261 {offsets = [2, 768], sizes = [2, 768], strides = [1, 1]} : vector<4x1536xf32> to vector<2x768xf32>
    %287 = arith.subf %286, %82 : vector<2x768xf32>
    %288 = arith.mulf %285, %285 : vector<2x768xf32>
    %289 = vector.shape_cast %288 : vector<2x768xf32> to vector<1x2x768xf32>
    %cst_134 = arith.constant dense<0.000000e+00> : vector<1xf32>
    %290 = vector.multi_reduction <add>, %289, %cst_134 [1, 2] : vector<1x2x768xf32> to vector<1xf32>
    %291 = vector.shape_cast %290 : vector<1xf32> to vector<1x1x1xf32>
    %292 = vector.extract %291[0, 0, 0] : f32 from vector<1x1x1xf32>
    %293 = vector.broadcast %292 : f32 to vector<1x1xf32>
    %cst_135 = arith.constant 2.500000e-01 : f32
    %294 = vector.broadcast %cst_135 : f32 to vector<1x1xf32>
    %295 = arith.mulf %294, %293 : vector<1x1xf32>
    %296 = arith.addf %79, %295 : vector<1x1xf32>
    %297 = arith.mulf %287, %287 : vector<2x768xf32>
    %298 = vector.shape_cast %297 : vector<2x768xf32> to vector<1x2x768xf32>
    %cst_136 = arith.constant dense<0.000000e+00> : vector<1xf32>
    %299 = vector.multi_reduction <add>, %298, %cst_136 [1, 2] : vector<1x2x768xf32> to vector<1xf32>
    %300 = vector.shape_cast %299 : vector<1xf32> to vector<1x1x1xf32>
    %301 = vector.extract %300[0, 0, 0] : f32 from vector<1x1x1xf32>
    %302 = vector.broadcast %301 : f32 to vector<1x1xf32>
    %cst_137 = arith.constant 2.500000e-01 : f32
    %303 = vector.broadcast %cst_137 : f32 to vector<1x1xf32>
    %304 = arith.mulf %303, %302 : vector<1x1xf32>
    %305 = arith.addf %81, %304 : vector<1x1xf32>
    %306 = vector.extract_strided_slice %40 {offsets = [4, 0], sizes = [2, 768], strides = [1, 1]} : vector<8x768xf32> to vector<2x768xf32>
    %307 = vector.extract_strided_slice %48 {offsets = [4, 0], sizes = [2, 64], strides = [1, 1]} : vector<8x64xf32> to vector<2x64xf32>
    %c0_138 = arith.constant 0 : index
    %c16_139 = arith.constant 16 : index
    %308 = vector.load %arg16[%c0_138, %c16_139] : memref<2x116xf32, #tpu.memory_space<vmem>>, vector<2x64xf32>
    tpu.vector_store %arg16[%c0_138, %c16_139], %307 {strides = array<i32>} : memref<2x116xf32, #tpu.memory_space<vmem>>, vector<2x64xf32>,
    %309 = vector.extract_strided_slice %49 {offsets = [2, 0], sizes = [2, 4], strides = [1, 1]} : vector<6x4xf32> to vector<2x4xf32>
    %c0_140 = arith.constant 0 : index
    %c80_141 = arith.constant 80 : index
    %310 = vector.load %arg16[%c0_140, %c80_141] : memref<2x116xf32, #tpu.memory_space<vmem>>, vector<2x4xf32>
    tpu.vector_store %arg16[%c0_140, %c80_141], %309 {strides = array<i32>} : memref<2x116xf32, #tpu.memory_space<vmem>>, vector<2x4xf32>,
    %311 = vector.extract_strided_slice %50 {offsets = [2, 0], sizes = [2, 32], strides = [1, 1]} : vector<6x32xf32> to vector<2x32xf32>
    %c0_142 = arith.constant 0 : index
    %c0_143 = arith.constant 0 : index
    %312 = vector.load %arg16[%c0_142, %c0_143] : memref<2x116xf32, #tpu.memory_space<vmem>>, vector<2x16xf32>
    tpu.vector_store %arg16[%c0_142, %c0_143], %100 {strides = array<i32>} : memref<2x116xf32, #tpu.memory_space<vmem>>, vector<2x16xf32>,
    %c0_144 = arith.constant 0 : index
    %c0_145 = arith.constant 0 : index
    %313 = vector.load %arg16[%c0_144, %c0_145] : memref<2x116xf32, #tpu.memory_space<vmem>>, vector<2x116xf32>
    %314 = arith.truncf %313 : vector<2x116xf32> to vector<2x116xbf16>
    %cst_146 = arith.constant dense<0.000000e+00> : vector<2x128xf32>
    %315 = tpu.matmul %314, %17, %cst_146 {dimension_numbers = #tpu.dot_dimension_numbers<[1], [0], [0], [1], [0, 0, 1, 1], [], []>} : vector<2x116xbf16>, vector<116x128xbf16>, vector<2x128xf32> -> vector<2x128xf32>
    %316 = arith.addf %315, %27 : vector<2x128xf32>
    %cst_147 = arith.constant 0.000000e+00 : f32
    %317 = vector.broadcast %cst_147 : f32 to vector<2x128xf32>
    %318 = arith.maximumf %316, %317 : vector<2x128xf32>
    %319 = arith.truncf %318 : vector<2x128xf32> to vector<2x128xbf16>
    %cst_148 = arith.constant dense<0.000000e+00> : vector<2x64xf32>
    %320 = tpu.matmul %319, %21, %cst_148 {dimension_numbers = #tpu.dot_dimension_numbers<[1], [0], [0], [1], [0, 0, 1, 1], [], []>} : vector<2x128xbf16>, vector<128x64xbf16>, vector<2x64xf32> -> vector<2x64xf32>
    %321 = arith.addf %320, %35 : vector<2x64xf32>
    %322 = vector.extract_strided_slice %321 {offsets = [0, 0], sizes = [2, 16], strides = [1, 1]} : vector<2x64xf32> to vector<2x16xf32>
    %323 = vector.extract_strided_slice %321 {offsets = [0, 16], sizes = [2, 16], strides = [1, 1]} : vector<2x64xf32> to vector<2x16xf32>
    %324 = vector.extract_strided_slice %321 {offsets = [0, 32], sizes = [2, 16], strides = [1, 1]} : vector<2x64xf32> to vector<2x16xf32>
    %325 = vector.extract_strided_slice %321 {offsets = [0, 48], sizes = [2, 16], strides = [1, 1]} : vector<2x64xf32> to vector<2x16xf32>
    %cst_149 = arith.constant 0.000000e+00 : f32
    %326 = vector.broadcast %cst_149 : f32 to vector<2x16xf32>
    %327 = arith.maximumf %323, %326 : vector<2x16xf32>
    %328 = math.absf %323 : vector<2x16xf32>
    %cst_150 = arith.constant 0.000000e+00 : f32
    %329 = vector.broadcast %cst_150 : f32 to vector<2x16xf32>
    %330 = arith.subf %329, %328 : vector<2x16xf32>
    %331 = math.exp %330 : vector<2x16xf32>
    %cst_151 = arith.constant 1.000000e+00 : f32
    %332 = vector.broadcast %cst_151 : f32 to vector<2x16xf32>
    %333 = arith.addf %332, %331 : vector<2x16xf32>
    %334 = math.log %333 : vector<2x16xf32>
    %335 = arith.addf %327, %334 : vector<2x16xf32>
    %cst_152 = arith.constant 1.000000e-01 : f32
    %336 = vector.broadcast %cst_152 : f32 to vector<2x16xf32>
    %337 = arith.addf %335, %336 : vector<2x16xf32>
    %cst_153 = arith.constant 0.000000e+00 : f32
    %338 = vector.broadcast %cst_153 : f32 to vector<2x16xf32>
    %339 = arith.maximumf %325, %338 : vector<2x16xf32>
    %340 = math.absf %325 : vector<2x16xf32>
    %cst_154 = arith.constant 0.000000e+00 : f32
    %341 = vector.broadcast %cst_154 : f32 to vector<2x16xf32>
    %342 = arith.subf %341, %340 : vector<2x16xf32>
    %343 = math.exp %342 : vector<2x16xf32>
    %cst_155 = arith.constant 1.000000e+00 : f32
    %344 = vector.broadcast %cst_155 : f32 to vector<2x16xf32>
    %345 = arith.addf %344, %343 : vector<2x16xf32>
    %346 = math.log %345 : vector<2x16xf32>
    %347 = arith.addf %339, %346 : vector<2x16xf32>
    %cst_156 = arith.constant 1.000000e-01 : f32
    %348 = vector.broadcast %cst_156 : f32 to vector<2x16xf32>
    %349 = arith.addf %347, %348 : vector<2x16xf32>
    %350 = math.log %337 : vector<2x16xf32>
    %351 = math.log %349 : vector<2x16xf32>
    %352 = arith.mulf %337, %337 : vector<2x16xf32>
    %353 = arith.subf %322, %324 : vector<2x16xf32>
    %354 = arith.subf %351, %350 : vector<2x16xf32>
    %cst_157 = arith.constant 5.000000e-01 : f32
    %355 = vector.broadcast %cst_157 : f32 to vector<2x16xf32>
    %356 = arith.subf %354, %355 : vector<2x16xf32>
    %357 = arith.mulf %353, %353 : vector<2x16xf32>
    %358 = arith.addf %352, %357 : vector<2x16xf32>
    %cst_158 = arith.constant 2.000000e+00 : f32
    %359 = vector.broadcast %cst_158 : f32 to vector<2x16xf32>
    %360 = arith.mulf %359, %349 : vector<2x16xf32>
    %361 = arith.mulf %360, %349 : vector<2x16xf32>
    %362 = arith.divf %358, %361 : vector<2x16xf32>
    %363 = arith.addf %356, %362 : vector<2x16xf32>
    %364 = vector.shape_cast %363 : vector<2x16xf32> to vector<1x2x16xf32>
    %cst_159 = arith.constant dense<0.000000e+00> : vector<1xf32>
    %365 = vector.multi_reduction <add>, %364, %cst_159 [1, 2] : vector<1x2x16xf32> to vector<1xf32>
    %366 = vector.shape_cast %365 : vector<1xf32> to vector<1x1x1xf32>
    %367 = vector.extract %366[0, 0, 0] : f32 from vector<1x1x1xf32>
    %368 = vector.broadcast %367 : f32 to vector<1x1xf32>
    %cst_160 = arith.constant 5.000000e-01 : f32
    %369 = vector.broadcast %cst_160 : f32 to vector<1x1xf32>
    %370 = arith.mulf %369, %368 : vector<1x1xf32>
    %371 = arith.addf %147, %370 : vector<1x1xf32>
    %cst_161 = arith.constant 0.000000e+00 : f32
    %372 = vector.broadcast %cst_161 : f32 to vector<2x16xf32>
    %373 = arith.subf %372, %350 : vector<2x16xf32>
    %374 = arith.mulf %322, %322 : vector<2x16xf32>
    %375 = arith.addf %352, %374 : vector<2x16xf32>
    %cst_162 = arith.constant 5.000000e-01 : f32
    %376 = vector.broadcast %cst_162 : f32 to vector<2x16xf32>
    %377 = arith.mulf %376, %375 : vector<2x16xf32>
    %378 = arith.addf %373, %377 : vector<2x16xf32>
    %cst_163 = arith.constant 5.000000e-01 : f32
    %379 = vector.broadcast %cst_163 : f32 to vector<2x16xf32>
    %380 = arith.subf %378, %379 : vector<2x16xf32>
    %381 = vector.shape_cast %380 : vector<2x16xf32> to vector<1x2x16xf32>
    %cst_164 = arith.constant dense<0.000000e+00> : vector<1xf32>
    %382 = vector.multi_reduction <add>, %381, %cst_164 [1, 2] : vector<1x2x16xf32> to vector<1xf32>
    %383 = vector.shape_cast %382 : vector<1xf32> to vector<1x1x1xf32>
    %384 = vector.extract %383[0, 0, 0] : f32 from vector<1x1x1xf32>
    %385 = vector.broadcast %384 : f32 to vector<1x1xf32>
    %cst_165 = arith.constant 3.125000e-02 : f32
    %386 = vector.broadcast %cst_165 : f32 to vector<1x1xf32>
    %387 = arith.mulf %386, %385 : vector<1x1xf32>
    %388 = arith.addf %164, %387 : vector<1x1xf32>
    %389 = vector.extract_strided_slice %311 {offsets = [0, 0], sizes = [2, 16], strides = [1, 1]} : vector<2x32xf32> to vector<2x16xf32>
    %390 = arith.mulf %337, %389 : vector<2x16xf32>
    %391 = arith.addf %322, %390 : vector<2x16xf32>
    %c0_166 = arith.constant 0 : index
    %c0_167 = arith.constant 0 : index
    %392 = vector.load %arg17[%c0_166, %c0_167] : memref<4x32xf32, #tpu.memory_space<vmem>>, vector<2x16xf32>
    tpu.vector_store %arg17[%c0_166, %c0_167], %391 {strides = array<i32>} : memref<4x32xf32, #tpu.memory_space<vmem>>, vector<2x16xf32>,
    %c2_168 = arith.constant 2 : index
    %c0_169 = arith.constant 0 : index
    %393 = vector.load %arg17[%c2_168, %c0_169] : memref<4x32xf32, #tpu.memory_space<vmem>>, vector<2x16xf32>
    tpu.vector_store %arg17[%c2_168, %c0_169], %324 {strides = array<i32>} : memref<4x32xf32, #tpu.memory_space<vmem>>, vector<2x16xf32>,
    %c0_170 = arith.constant 0 : index
    %c0_171 = arith.constant 0 : index
    %394 = vector.load %arg16[%c0_170, %c0_171] : memref<2x116xf32, #tpu.memory_space<vmem>>, vector<2x16xf32>
    tpu.vector_store %arg16[%c0_170, %c0_171], %183 {strides = array<i32>} : memref<2x116xf32, #tpu.memory_space<vmem>>, vector<2x16xf32>,
    %c0_172 = arith.constant 0 : index
    %c84_173 = arith.constant 84 : index
    %395 = vector.load %arg16[%c0_172, %c84_173] : memref<2x116xf32, #tpu.memory_space<vmem>>, vector<2x16xf32>
    tpu.vector_store %arg16[%c0_172, %c84_173], %324 {strides = array<i32>} : memref<2x116xf32, #tpu.memory_space<vmem>>, vector<2x16xf32>,
    %c0_174 = arith.constant 0 : index
    %c0_175 = arith.constant 0 : index
    %396 = vector.load %arg16[%c0_174, %c0_175] : memref<2x116xf32, #tpu.memory_space<vmem>>, vector<2x116xf32>
    %397 = arith.truncf %396 : vector<2x116xf32> to vector<2x116xbf16>
    %cst_176 = arith.constant dense<0.000000e+00> : vector<2x128xf32>
    %398 = tpu.matmul %397, %19, %cst_176 {dimension_numbers = #tpu.dot_dimension_numbers<[1], [0], [0], [1], [0, 0, 1, 1], [], []>} : vector<2x116xbf16>, vector<116x128xbf16>, vector<2x128xf32> -> vector<2x128xf32>
    %399 = arith.addf %398, %31 : vector<2x128xf32>
    %cst_177 = arith.constant 0.000000e+00 : f32
    %400 = vector.broadcast %cst_177 : f32 to vector<2x128xf32>
    %401 = arith.maximumf %399, %400 : vector<2x128xf32>
    %402 = arith.truncf %401 : vector<2x128xf32> to vector<2x128xbf16>
    %cst_178 = arith.constant dense<0.000000e+00> : vector<2x64xf32>
    %403 = tpu.matmul %402, %23, %cst_178 {dimension_numbers = #tpu.dot_dimension_numbers<[1], [0], [0], [1], [0, 0, 1, 1], [], []>} : vector<2x128xbf16>, vector<128x64xbf16>, vector<2x64xf32> -> vector<2x64xf32>
    %404 = arith.addf %403, %39 : vector<2x64xf32>
    %405 = vector.extract_strided_slice %404 {offsets = [0, 0], sizes = [2, 16], strides = [1, 1]} : vector<2x64xf32> to vector<2x16xf32>
    %406 = vector.extract_strided_slice %404 {offsets = [0, 16], sizes = [2, 16], strides = [1, 1]} : vector<2x64xf32> to vector<2x16xf32>
    %407 = vector.extract_strided_slice %404 {offsets = [0, 32], sizes = [2, 16], strides = [1, 1]} : vector<2x64xf32> to vector<2x16xf32>
    %408 = vector.extract_strided_slice %404 {offsets = [0, 48], sizes = [2, 16], strides = [1, 1]} : vector<2x64xf32> to vector<2x16xf32>
    %cst_179 = arith.constant 0.000000e+00 : f32
    %409 = vector.broadcast %cst_179 : f32 to vector<2x16xf32>
    %410 = arith.maximumf %406, %409 : vector<2x16xf32>
    %411 = math.absf %406 : vector<2x16xf32>
    %cst_180 = arith.constant 0.000000e+00 : f32
    %412 = vector.broadcast %cst_180 : f32 to vector<2x16xf32>
    %413 = arith.subf %412, %411 : vector<2x16xf32>
    %414 = math.exp %413 : vector<2x16xf32>
    %cst_181 = arith.constant 1.000000e+00 : f32
    %415 = vector.broadcast %cst_181 : f32 to vector<2x16xf32>
    %416 = arith.addf %415, %414 : vector<2x16xf32>
    %417 = math.log %416 : vector<2x16xf32>
    %418 = arith.addf %410, %417 : vector<2x16xf32>
    %cst_182 = arith.constant 1.000000e-01 : f32
    %419 = vector.broadcast %cst_182 : f32 to vector<2x16xf32>
    %420 = arith.addf %418, %419 : vector<2x16xf32>
    %cst_183 = arith.constant 0.000000e+00 : f32
    %421 = vector.broadcast %cst_183 : f32 to vector<2x16xf32>
    %422 = arith.maximumf %408, %421 : vector<2x16xf32>
    %423 = math.absf %408 : vector<2x16xf32>
    %cst_184 = arith.constant 0.000000e+00 : f32
    %424 = vector.broadcast %cst_184 : f32 to vector<2x16xf32>
    %425 = arith.subf %424, %423 : vector<2x16xf32>
    %426 = math.exp %425 : vector<2x16xf32>
    %cst_185 = arith.constant 1.000000e+00 : f32
    %427 = vector.broadcast %cst_185 : f32 to vector<2x16xf32>
    %428 = arith.addf %427, %426 : vector<2x16xf32>
    %429 = math.log %428 : vector<2x16xf32>
    %430 = arith.addf %422, %429 : vector<2x16xf32>
    %cst_186 = arith.constant 1.000000e-01 : f32
    %431 = vector.broadcast %cst_186 : f32 to vector<2x16xf32>
    %432 = arith.addf %430, %431 : vector<2x16xf32>
    %433 = math.log %420 : vector<2x16xf32>
    %434 = math.log %432 : vector<2x16xf32>
    %435 = arith.mulf %420, %420 : vector<2x16xf32>
    %436 = arith.subf %405, %407 : vector<2x16xf32>
    %437 = arith.subf %434, %433 : vector<2x16xf32>
    %cst_187 = arith.constant 5.000000e-01 : f32
    %438 = vector.broadcast %cst_187 : f32 to vector<2x16xf32>
    %439 = arith.subf %437, %438 : vector<2x16xf32>
    %440 = arith.mulf %436, %436 : vector<2x16xf32>
    %441 = arith.addf %435, %440 : vector<2x16xf32>
    %cst_188 = arith.constant 2.000000e+00 : f32
    %442 = vector.broadcast %cst_188 : f32 to vector<2x16xf32>
    %443 = arith.mulf %442, %432 : vector<2x16xf32>
    %444 = arith.mulf %443, %432 : vector<2x16xf32>
    %445 = arith.divf %441, %444 : vector<2x16xf32>
    %446 = arith.addf %439, %445 : vector<2x16xf32>
    %447 = vector.shape_cast %446 : vector<2x16xf32> to vector<1x2x16xf32>
    %cst_189 = arith.constant dense<0.000000e+00> : vector<1xf32>
    %448 = vector.multi_reduction <add>, %447, %cst_189 [1, 2] : vector<1x2x16xf32> to vector<1xf32>
    %449 = vector.shape_cast %448 : vector<1xf32> to vector<1x1x1xf32>
    %450 = vector.extract %449[0, 0, 0] : f32 from vector<1x1x1xf32>
    %451 = vector.broadcast %450 : f32 to vector<1x1xf32>
    %cst_190 = arith.constant 5.000000e-01 : f32
    %452 = vector.broadcast %cst_190 : f32 to vector<1x1xf32>
    %453 = arith.mulf %452, %451 : vector<1x1xf32>
    %454 = arith.addf %230, %453 : vector<1x1xf32>
    %cst_191 = arith.constant 0.000000e+00 : f32
    %455 = vector.broadcast %cst_191 : f32 to vector<2x16xf32>
    %456 = arith.subf %455, %433 : vector<2x16xf32>
    %457 = arith.mulf %405, %405 : vector<2x16xf32>
    %458 = arith.addf %435, %457 : vector<2x16xf32>
    %cst_192 = arith.constant 5.000000e-01 : f32
    %459 = vector.broadcast %cst_192 : f32 to vector<2x16xf32>
    %460 = arith.mulf %459, %458 : vector<2x16xf32>
    %461 = arith.addf %456, %460 : vector<2x16xf32>
    %cst_193 = arith.constant 5.000000e-01 : f32
    %462 = vector.broadcast %cst_193 : f32 to vector<2x16xf32>
    %463 = arith.subf %461, %462 : vector<2x16xf32>
    %464 = vector.shape_cast %463 : vector<2x16xf32> to vector<1x2x16xf32>
    %cst_194 = arith.constant dense<0.000000e+00> : vector<1xf32>
    %465 = vector.multi_reduction <add>, %464, %cst_194 [1, 2] : vector<1x2x16xf32> to vector<1xf32>
    %466 = vector.shape_cast %465 : vector<1xf32> to vector<1x1x1xf32>
    %467 = vector.extract %466[0, 0, 0] : f32 from vector<1x1x1xf32>
    %468 = vector.broadcast %467 : f32 to vector<1x1xf32>
    %cst_195 = arith.constant 3.125000e-02 : f32
    %469 = vector.broadcast %cst_195 : f32 to vector<1x1xf32>
    %470 = arith.mulf %469, %468 : vector<1x1xf32>
    %471 = arith.addf %247, %470 : vector<1x1xf32>
    %472 = vector.extract_strided_slice %311 {offsets = [0, 16], sizes = [2, 16], strides = [1, 1]} : vector<2x32xf32> to vector<2x16xf32>
    %473 = arith.mulf %420, %472 : vector<2x16xf32>
    %474 = arith.addf %405, %473 : vector<2x16xf32>
    %c0_196 = arith.constant 0 : index
    %c16_197 = arith.constant 16 : index
    %475 = vector.load %arg17[%c0_196, %c16_197] : memref<4x32xf32, #tpu.memory_space<vmem>>, vector<2x16xf32>
    tpu.vector_store %arg17[%c0_196, %c16_197], %474 {strides = array<i32>} : memref<4x32xf32, #tpu.memory_space<vmem>>, vector<2x16xf32>,
    %c2_198 = arith.constant 2 : index
    %c16_199 = arith.constant 16 : index
    %476 = vector.load %arg17[%c2_198, %c16_199] : memref<4x32xf32, #tpu.memory_space<vmem>>, vector<2x16xf32>
    tpu.vector_store %arg17[%c2_198, %c16_199], %407 {strides = array<i32>} : memref<4x32xf32, #tpu.memory_space<vmem>>, vector<2x16xf32>,
    %c0_200 = arith.constant 0 : index
    %c0_201 = arith.constant 0 : index
    %477 = vector.load %arg17[%c0_200, %c0_201] : memref<4x32xf32, #tpu.memory_space<vmem>>, vector<4x32xf32>
    %478 = arith.truncf %477 : vector<4x32xf32> to vector<4x32xbf16>
    %cst_202 = arith.constant dense<0.000000e+00> : vector<4x128xf32>
    %479 = tpu.matmul %478, %8, %cst_202 {dimension_numbers = #tpu.dot_dimension_numbers<[1], [0], [0], [1], [0, 0, 1, 1], [], []>} : vector<4x32xbf16>, vector<32x128xbf16>, vector<4x128xf32> -> vector<4x128xf32>
    %480 = arith.addf %479, %12 : vector<4x128xf32>
    %cst_203 = arith.constant 0.000000e+00 : f32
    %481 = vector.broadcast %cst_203 : f32 to vector<4x128xf32>
    %482 = arith.maximumf %480, %481 : vector<4x128xf32>
    %483 = arith.truncf %482 : vector<4x128xf32> to vector<4x128xbf16>
    %cst_204 = arith.constant dense<0.000000e+00> : vector<4x1536xf32>
    %484 = tpu.matmul %483, %9, %cst_204 {dimension_numbers = #tpu.dot_dimension_numbers<[1], [0], [0], [1], [0, 0, 1, 1], [], []>} : vector<4x128xbf16>, vector<128x1536xbf16>, vector<4x1536xf32> -> vector<4x1536xf32>
    %485 = arith.addf %484, %15 : vector<4x1536xf32>
    %486 = vector.extract_strided_slice %485 {offsets = [0, 0], sizes = [2, 768], strides = [1, 1]} : vector<4x1536xf32> to vector<2x768xf32>
    %487 = arith.subf %486, %306 : vector<2x768xf32>
    %488 = vector.extract_strided_slice %485 {offsets = [2, 0], sizes = [2, 768], strides = [1, 1]} : vector<4x1536xf32> to vector<2x768xf32>
    %489 = arith.subf %488, %306 : vector<2x768xf32>
    %490 = arith.mulf %487, %487 : vector<2x768xf32>
    %491 = vector.shape_cast %490 : vector<2x768xf32> to vector<1x2x768xf32>
    %cst_205 = arith.constant dense<0.000000e+00> : vector<1xf32>
    %492 = vector.multi_reduction <add>, %491, %cst_205 [1, 2] : vector<1x2x768xf32> to vector<1xf32>
    %493 = vector.shape_cast %492 : vector<1xf32> to vector<1x1x1xf32>
    %494 = vector.extract %493[0, 0, 0] : f32 from vector<1x1x1xf32>
    %495 = vector.broadcast %494 : f32 to vector<1x1xf32>
    %cst_206 = arith.constant 2.500000e-01 : f32
    %496 = vector.broadcast %cst_206 : f32 to vector<1x1xf32>
    %497 = arith.mulf %496, %495 : vector<1x1xf32>
    %498 = arith.addf %274, %497 : vector<1x1xf32>
    %499 = arith.mulf %489, %489 : vector<2x768xf32>
    %500 = vector.shape_cast %499 : vector<2x768xf32> to vector<1x2x768xf32>
    %cst_207 = arith.constant dense<0.000000e+00> : vector<1xf32>
    %501 = vector.multi_reduction <add>, %500, %cst_207 [1, 2] : vector<1x2x768xf32> to vector<1xf32>
    %502 = vector.shape_cast %501 : vector<1xf32> to vector<1x1x1xf32>
    %503 = vector.extract %502[0, 0, 0] : f32 from vector<1x1x1xf32>
    %504 = vector.broadcast %503 : f32 to vector<1x1xf32>
    %cst_208 = arith.constant 2.500000e-01 : f32
    %505 = vector.broadcast %cst_208 : f32 to vector<1x1xf32>
    %506 = arith.mulf %505, %504 : vector<1x1xf32>
    %507 = arith.addf %283, %506 : vector<1x1xf32>
    %508 = vector.extract_strided_slice %485 {offsets = [0, 768], sizes = [2, 768], strides = [1, 1]} : vector<4x1536xf32> to vector<2x768xf32>
    %509 = arith.subf %508, %306 : vector<2x768xf32>
    %510 = vector.extract_strided_slice %485 {offsets = [2, 768], sizes = [2, 768], strides = [1, 1]} : vector<4x1536xf32> to vector<2x768xf32>
    %511 = arith.subf %510, %306 : vector<2x768xf32>
    %512 = arith.mulf %509, %509 : vector<2x768xf32>
    %513 = vector.shape_cast %512 : vector<2x768xf32> to vector<1x2x768xf32>
    %cst_209 = arith.constant dense<0.000000e+00> : vector<1xf32>
    %514 = vector.multi_reduction <add>, %513, %cst_209 [1, 2] : vector<1x2x768xf32> to vector<1xf32>
    %515 = vector.shape_cast %514 : vector<1xf32> to vector<1x1x1xf32>
    %516 = vector.extract %515[0, 0, 0] : f32 from vector<1x1x1xf32>
    %517 = vector.broadcast %516 : f32 to vector<1x1xf32>
    %cst_210 = arith.constant 2.500000e-01 : f32
    %518 = vector.broadcast %cst_210 : f32 to vector<1x1xf32>
    %519 = arith.mulf %518, %517 : vector<1x1xf32>
    %520 = arith.addf %296, %519 : vector<1x1xf32>
    %521 = arith.mulf %511, %511 : vector<2x768xf32>
    %522 = vector.shape_cast %521 : vector<2x768xf32> to vector<1x2x768xf32>
    %cst_211 = arith.constant dense<0.000000e+00> : vector<1xf32>
    %523 = vector.multi_reduction <add>, %522, %cst_211 [1, 2] : vector<1x2x768xf32> to vector<1xf32>
    %524 = vector.shape_cast %523 : vector<1xf32> to vector<1x1x1xf32>
    %525 = vector.extract %524[0, 0, 0] : f32 from vector<1x1x1xf32>
    %526 = vector.broadcast %525 : f32 to vector<1x1xf32>
    %cst_212 = arith.constant 2.500000e-01 : f32
    %527 = vector.broadcast %cst_212 : f32 to vector<1x1xf32>
    %528 = arith.mulf %527, %526 : vector<1x1xf32>
    %529 = arith.addf %305, %528 : vector<1x1xf32>
    %530 = vector.extract_strided_slice %40 {offsets = [6, 0], sizes = [2, 768], strides = [1, 1]} : vector<8x768xf32> to vector<2x768xf32>
    %531 = vector.extract_strided_slice %48 {offsets = [6, 0], sizes = [2, 64], strides = [1, 1]} : vector<8x64xf32> to vector<2x64xf32>
    %c0_213 = arith.constant 0 : index
    %c16_214 = arith.constant 16 : index
    %532 = vector.load %arg16[%c0_213, %c16_214] : memref<2x116xf32, #tpu.memory_space<vmem>>, vector<2x64xf32>
    tpu.vector_store %arg16[%c0_213, %c16_214], %531 {strides = array<i32>} : memref<2x116xf32, #tpu.memory_space<vmem>>, vector<2x64xf32>,
    %533 = vector.extract_strided_slice %49 {offsets = [4, 0], sizes = [2, 4], strides = [1, 1]} : vector<6x4xf32> to vector<2x4xf32>
    %c0_215 = arith.constant 0 : index
    %c80_216 = arith.constant 80 : index
    %534 = vector.load %arg16[%c0_215, %c80_216] : memref<2x116xf32, #tpu.memory_space<vmem>>, vector<2x4xf32>
    tpu.vector_store %arg16[%c0_215, %c80_216], %533 {strides = array<i32>} : memref<2x116xf32, #tpu.memory_space<vmem>>, vector<2x4xf32>,
    %535 = vector.extract_strided_slice %50 {offsets = [4, 0], sizes = [2, 32], strides = [1, 1]} : vector<6x32xf32> to vector<2x32xf32>
    %c0_217 = arith.constant 0 : index
    %c0_218 = arith.constant 0 : index
    %536 = vector.load %arg16[%c0_217, %c0_218] : memref<2x116xf32, #tpu.memory_space<vmem>>, vector<2x16xf32>
    tpu.vector_store %arg16[%c0_217, %c0_218], %324 {strides = array<i32>} : memref<2x116xf32, #tpu.memory_space<vmem>>, vector<2x16xf32>,
    %c0_219 = arith.constant 0 : index
    %c0_220 = arith.constant 0 : index
    %537 = vector.load %arg16[%c0_219, %c0_220] : memref<2x116xf32, #tpu.memory_space<vmem>>, vector<2x116xf32>
    %538 = arith.truncf %537 : vector<2x116xf32> to vector<2x116xbf16>
    %cst_221 = arith.constant dense<0.000000e+00> : vector<2x128xf32>
    %539 = tpu.matmul %538, %17, %cst_221 {dimension_numbers = #tpu.dot_dimension_numbers<[1], [0], [0], [1], [0, 0, 1, 1], [], []>} : vector<2x116xbf16>, vector<116x128xbf16>, vector<2x128xf32> -> vector<2x128xf32>
    %540 = arith.addf %539, %27 : vector<2x128xf32>
    %cst_222 = arith.constant 0.000000e+00 : f32
    %541 = vector.broadcast %cst_222 : f32 to vector<2x128xf32>
    %542 = arith.maximumf %540, %541 : vector<2x128xf32>
    %543 = arith.truncf %542 : vector<2x128xf32> to vector<2x128xbf16>
    %cst_223 = arith.constant dense<0.000000e+00> : vector<2x64xf32>
    %544 = tpu.matmul %543, %21, %cst_223 {dimension_numbers = #tpu.dot_dimension_numbers<[1], [0], [0], [1], [0, 0, 1, 1], [], []>} : vector<2x128xbf16>, vector<128x64xbf16>, vector<2x64xf32> -> vector<2x64xf32>
    %545 = arith.addf %544, %35 : vector<2x64xf32>
    %546 = vector.extract_strided_slice %545 {offsets = [0, 0], sizes = [2, 16], strides = [1, 1]} : vector<2x64xf32> to vector<2x16xf32>
    %547 = vector.extract_strided_slice %545 {offsets = [0, 16], sizes = [2, 16], strides = [1, 1]} : vector<2x64xf32> to vector<2x16xf32>
    %548 = vector.extract_strided_slice %545 {offsets = [0, 32], sizes = [2, 16], strides = [1, 1]} : vector<2x64xf32> to vector<2x16xf32>
    %549 = vector.extract_strided_slice %545 {offsets = [0, 48], sizes = [2, 16], strides = [1, 1]} : vector<2x64xf32> to vector<2x16xf32>
    %cst_224 = arith.constant 0.000000e+00 : f32
    %550 = vector.broadcast %cst_224 : f32 to vector<2x16xf32>
    %551 = arith.maximumf %547, %550 : vector<2x16xf32>
    %552 = math.absf %547 : vector<2x16xf32>
    %cst_225 = arith.constant 0.000000e+00 : f32
    %553 = vector.broadcast %cst_225 : f32 to vector<2x16xf32>
    %554 = arith.subf %553, %552 : vector<2x16xf32>
    %555 = math.exp %554 : vector<2x16xf32>
    %cst_226 = arith.constant 1.000000e+00 : f32
    %556 = vector.broadcast %cst_226 : f32 to vector<2x16xf32>
    %557 = arith.addf %556, %555 : vector<2x16xf32>
    %558 = math.log %557 : vector<2x16xf32>
    %559 = arith.addf %551, %558 : vector<2x16xf32>
    %cst_227 = arith.constant 1.000000e-01 : f32
    %560 = vector.broadcast %cst_227 : f32 to vector<2x16xf32>
    %561 = arith.addf %559, %560 : vector<2x16xf32>
    %cst_228 = arith.constant 0.000000e+00 : f32
    %562 = vector.broadcast %cst_228 : f32 to vector<2x16xf32>
    %563 = arith.maximumf %549, %562 : vector<2x16xf32>
    %564 = math.absf %549 : vector<2x16xf32>
    %cst_229 = arith.constant 0.000000e+00 : f32
    %565 = vector.broadcast %cst_229 : f32 to vector<2x16xf32>
    %566 = arith.subf %565, %564 : vector<2x16xf32>
    %567 = math.exp %566 : vector<2x16xf32>
    %cst_230 = arith.constant 1.000000e+00 : f32
    %568 = vector.broadcast %cst_230 : f32 to vector<2x16xf32>
    %569 = arith.addf %568, %567 : vector<2x16xf32>
    %570 = math.log %569 : vector<2x16xf32>
    %571 = arith.addf %563, %570 : vector<2x16xf32>
    %cst_231 = arith.constant 1.000000e-01 : f32
    %572 = vector.broadcast %cst_231 : f32 to vector<2x16xf32>
    %573 = arith.addf %571, %572 : vector<2x16xf32>
    %574 = math.log %561 : vector<2x16xf32>
    %575 = math.log %573 : vector<2x16xf32>
    %576 = arith.mulf %561, %561 : vector<2x16xf32>
    %577 = arith.subf %546, %548 : vector<2x16xf32>
    %578 = arith.subf %575, %574 : vector<2x16xf32>
    %cst_232 = arith.constant 5.000000e-01 : f32
    %579 = vector.broadcast %cst_232 : f32 to vector<2x16xf32>
    %580 = arith.subf %578, %579 : vector<2x16xf32>
    %581 = arith.mulf %577, %577 : vector<2x16xf32>
    %582 = arith.addf %576, %581 : vector<2x16xf32>
    %cst_233 = arith.constant 2.000000e+00 : f32
    %583 = vector.broadcast %cst_233 : f32 to vector<2x16xf32>
    %584 = arith.mulf %583, %573 : vector<2x16xf32>
    %585 = arith.mulf %584, %573 : vector<2x16xf32>
    %586 = arith.divf %582, %585 : vector<2x16xf32>
    %587 = arith.addf %580, %586 : vector<2x16xf32>
    %588 = vector.shape_cast %587 : vector<2x16xf32> to vector<1x2x16xf32>
    %cst_234 = arith.constant dense<0.000000e+00> : vector<1xf32>
    %589 = vector.multi_reduction <add>, %588, %cst_234 [1, 2] : vector<1x2x16xf32> to vector<1xf32>
    %590 = vector.shape_cast %589 : vector<1xf32> to vector<1x1x1xf32>
    %591 = vector.extract %590[0, 0, 0] : f32 from vector<1x1x1xf32>
    %592 = vector.broadcast %591 : f32 to vector<1x1xf32>
    %cst_235 = arith.constant 5.000000e-01 : f32
    %593 = vector.broadcast %cst_235 : f32 to vector<1x1xf32>
    %594 = arith.mulf %593, %592 : vector<1x1xf32>
    %595 = arith.addf %371, %594 : vector<1x1xf32>
    %cst_236 = arith.constant 0.000000e+00 : f32
    %596 = vector.broadcast %cst_236 : f32 to vector<2x16xf32>
    %597 = arith.subf %596, %574 : vector<2x16xf32>
    %598 = arith.mulf %546, %546 : vector<2x16xf32>
    %599 = arith.addf %576, %598 : vector<2x16xf32>
    %cst_237 = arith.constant 5.000000e-01 : f32
    %600 = vector.broadcast %cst_237 : f32 to vector<2x16xf32>
    %601 = arith.mulf %600, %599 : vector<2x16xf32>
    %602 = arith.addf %597, %601 : vector<2x16xf32>
    %cst_238 = arith.constant 5.000000e-01 : f32
    %603 = vector.broadcast %cst_238 : f32 to vector<2x16xf32>
    %604 = arith.subf %602, %603 : vector<2x16xf32>
    %605 = vector.shape_cast %604 : vector<2x16xf32> to vector<1x2x16xf32>
    %cst_239 = arith.constant dense<0.000000e+00> : vector<1xf32>
    %606 = vector.multi_reduction <add>, %605, %cst_239 [1, 2] : vector<1x2x16xf32> to vector<1xf32>
    %607 = vector.shape_cast %606 : vector<1xf32> to vector<1x1x1xf32>
    %608 = vector.extract %607[0, 0, 0] : f32 from vector<1x1x1xf32>
    %609 = vector.broadcast %608 : f32 to vector<1x1xf32>
    %cst_240 = arith.constant 3.125000e-02 : f32
    %610 = vector.broadcast %cst_240 : f32 to vector<1x1xf32>
    %611 = arith.mulf %610, %609 : vector<1x1xf32>
    %612 = arith.addf %388, %611 : vector<1x1xf32>
    %613 = vector.extract_strided_slice %535 {offsets = [0, 0], sizes = [2, 16], strides = [1, 1]} : vector<2x32xf32> to vector<2x16xf32>
    %614 = arith.mulf %561, %613 : vector<2x16xf32>
    %615 = arith.addf %546, %614 : vector<2x16xf32>
    %c0_241 = arith.constant 0 : index
    %c0_242 = arith.constant 0 : index
    %616 = vector.load %arg17[%c0_241, %c0_242] : memref<4x32xf32, #tpu.memory_space<vmem>>, vector<2x16xf32>
    tpu.vector_store %arg17[%c0_241, %c0_242], %615 {strides = array<i32>} : memref<4x32xf32, #tpu.memory_space<vmem>>, vector<2x16xf32>,
    %c2_243 = arith.constant 2 : index
    %c0_244 = arith.constant 0 : index
    %617 = vector.load %arg17[%c2_243, %c0_244] : memref<4x32xf32, #tpu.memory_space<vmem>>, vector<2x16xf32>
    tpu.vector_store %arg17[%c2_243, %c0_244], %548 {strides = array<i32>} : memref<4x32xf32, #tpu.memory_space<vmem>>, vector<2x16xf32>,
    %c0_245 = arith.constant 0 : index
    %c0_246 = arith.constant 0 : index
    %618 = vector.load %arg16[%c0_245, %c0_246] : memref<2x116xf32, #tpu.memory_space<vmem>>, vector<2x16xf32>
    tpu.vector_store %arg16[%c0_245, %c0_246], %407 {strides = array<i32>} : memref<2x116xf32, #tpu.memory_space<vmem>>, vector<2x16xf32>,
    %c0_247 = arith.constant 0 : index
    %c84_248 = arith.constant 84 : index
    %619 = vector.load %arg16[%c0_247, %c84_248] : memref<2x116xf32, #tpu.memory_space<vmem>>, vector<2x16xf32>
    tpu.vector_store %arg16[%c0_247, %c84_248], %548 {strides = array<i32>} : memref<2x116xf32, #tpu.memory_space<vmem>>, vector<2x16xf32>,
    %c0_249 = arith.constant 0 : index
    %c0_250 = arith.constant 0 : index
    %620 = vector.load %arg16[%c0_249, %c0_250] : memref<2x116xf32, #tpu.memory_space<vmem>>, vector<2x116xf32>
    %621 = arith.truncf %620 : vector<2x116xf32> to vector<2x116xbf16>
    %cst_251 = arith.constant dense<0.000000e+00> : vector<2x128xf32>
    %622 = tpu.matmul %621, %19, %cst_251 {dimension_numbers = #tpu.dot_dimension_numbers<[1], [0], [0], [1], [0, 0, 1, 1], [], []>} : vector<2x116xbf16>, vector<116x128xbf16>, vector<2x128xf32> -> vector<2x128xf32>
    %623 = arith.addf %622, %31 : vector<2x128xf32>
    %cst_252 = arith.constant 0.000000e+00 : f32
    %624 = vector.broadcast %cst_252 : f32 to vector<2x128xf32>
    %625 = arith.maximumf %623, %624 : vector<2x128xf32>
    %626 = arith.truncf %625 : vector<2x128xf32> to vector<2x128xbf16>
    %cst_253 = arith.constant dense<0.000000e+00> : vector<2x64xf32>
    %627 = tpu.matmul %626, %23, %cst_253 {dimension_numbers = #tpu.dot_dimension_numbers<[1], [0], [0], [1], [0, 0, 1, 1], [], []>} : vector<2x128xbf16>, vector<128x64xbf16>, vector<2x64xf32> -> vector<2x64xf32>
    %628 = arith.addf %627, %39 : vector<2x64xf32>
    %629 = vector.extract_strided_slice %628 {offsets = [0, 0], sizes = [2, 16], strides = [1, 1]} : vector<2x64xf32> to vector<2x16xf32>
    %630 = vector.extract_strided_slice %628 {offsets = [0, 16], sizes = [2, 16], strides = [1, 1]} : vector<2x64xf32> to vector<2x16xf32>
    %631 = vector.extract_strided_slice %628 {offsets = [0, 32], sizes = [2, 16], strides = [1, 1]} : vector<2x64xf32> to vector<2x16xf32>
    %632 = vector.extract_strided_slice %628 {offsets = [0, 48], sizes = [2, 16], strides = [1, 1]} : vector<2x64xf32> to vector<2x16xf32>
    %cst_254 = arith.constant 0.000000e+00 : f32
    %633 = vector.broadcast %cst_254 : f32 to vector<2x16xf32>
    %634 = arith.maximumf %630, %633 : vector<2x16xf32>
    %635 = math.absf %630 : vector<2x16xf32>
    %cst_255 = arith.constant 0.000000e+00 : f32
    %636 = vector.broadcast %cst_255 : f32 to vector<2x16xf32>
    %637 = arith.subf %636, %635 : vector<2x16xf32>
    %638 = math.exp %637 : vector<2x16xf32>
    %cst_256 = arith.constant 1.000000e+00 : f32
    %639 = vector.broadcast %cst_256 : f32 to vector<2x16xf32>
    %640 = arith.addf %639, %638 : vector<2x16xf32>
    %641 = math.log %640 : vector<2x16xf32>
    %642 = arith.addf %634, %641 : vector<2x16xf32>
    %cst_257 = arith.constant 1.000000e-01 : f32
    %643 = vector.broadcast %cst_257 : f32 to vector<2x16xf32>
    %644 = arith.addf %642, %643 : vector<2x16xf32>
    %cst_258 = arith.constant 0.000000e+00 : f32
    %645 = vector.broadcast %cst_258 : f32 to vector<2x16xf32>
    %646 = arith.maximumf %632, %645 : vector<2x16xf32>
    %647 = math.absf %632 : vector<2x16xf32>
    %cst_259 = arith.constant 0.000000e+00 : f32
    %648 = vector.broadcast %cst_259 : f32 to vector<2x16xf32>
    %649 = arith.subf %648, %647 : vector<2x16xf32>
    %650 = math.exp %649 : vector<2x16xf32>
    %cst_260 = arith.constant 1.000000e+00 : f32
    %651 = vector.broadcast %cst_260 : f32 to vector<2x16xf32>
    %652 = arith.addf %651, %650 : vector<2x16xf32>
    %653 = math.log %652 : vector<2x16xf32>
    %654 = arith.addf %646, %653 : vector<2x16xf32>
    %cst_261 = arith.constant 1.000000e-01 : f32
    %655 = vector.broadcast %cst_261 : f32 to vector<2x16xf32>
    %656 = arith.addf %654, %655 : vector<2x16xf32>
    %657 = math.log %644 : vector<2x16xf32>
    %658 = math.log %656 : vector<2x16xf32>
    %659 = arith.mulf %644, %644 : vector<2x16xf32>
    %660 = arith.subf %629, %631 : vector<2x16xf32>
    %661 = arith.subf %658, %657 : vector<2x16xf32>
    %cst_262 = arith.constant 5.000000e-01 : f32
    %662 = vector.broadcast %cst_262 : f32 to vector<2x16xf32>
    %663 = arith.subf %661, %662 : vector<2x16xf32>
    %664 = arith.mulf %660, %660 : vector<2x16xf32>
    %665 = arith.addf %659, %664 : vector<2x16xf32>
    %cst_263 = arith.constant 2.000000e+00 : f32
    %666 = vector.broadcast %cst_263 : f32 to vector<2x16xf32>
    %667 = arith.mulf %666, %656 : vector<2x16xf32>
    %668 = arith.mulf %667, %656 : vector<2x16xf32>
    %669 = arith.divf %665, %668 : vector<2x16xf32>
    %670 = arith.addf %663, %669 : vector<2x16xf32>
    %671 = vector.shape_cast %670 : vector<2x16xf32> to vector<1x2x16xf32>
    %cst_264 = arith.constant dense<0.000000e+00> : vector<1xf32>
    %672 = vector.multi_reduction <add>, %671, %cst_264 [1, 2] : vector<1x2x16xf32> to vector<1xf32>
    %673 = vector.shape_cast %672 : vector<1xf32> to vector<1x1x1xf32>
    %674 = vector.extract %673[0, 0, 0] : f32 from vector<1x1x1xf32>
    %675 = vector.broadcast %674 : f32 to vector<1x1xf32>
    %cst_265 = arith.constant 5.000000e-01 : f32
    %676 = vector.broadcast %cst_265 : f32 to vector<1x1xf32>
    %677 = arith.mulf %676, %675 : vector<1x1xf32>
    %678 = arith.addf %454, %677 : vector<1x1xf32>
    %cst_266 = arith.constant 0.000000e+00 : f32
    %679 = vector.broadcast %cst_266 : f32 to vector<2x16xf32>
    %680 = arith.subf %679, %657 : vector<2x16xf32>
    %681 = arith.mulf %629, %629 : vector<2x16xf32>
    %682 = arith.addf %659, %681 : vector<2x16xf32>
    %cst_267 = arith.constant 5.000000e-01 : f32
    %683 = vector.broadcast %cst_267 : f32 to vector<2x16xf32>
    %684 = arith.mulf %683, %682 : vector<2x16xf32>
    %685 = arith.addf %680, %684 : vector<2x16xf32>
    %cst_268 = arith.constant 5.000000e-01 : f32
    %686 = vector.broadcast %cst_268 : f32 to vector<2x16xf32>
    %687 = arith.subf %685, %686 : vector<2x16xf32>
    %688 = vector.shape_cast %687 : vector<2x16xf32> to vector<1x2x16xf32>
    %cst_269 = arith.constant dense<0.000000e+00> : vector<1xf32>
    %689 = vector.multi_reduction <add>, %688, %cst_269 [1, 2] : vector<1x2x16xf32> to vector<1xf32>
    %690 = vector.shape_cast %689 : vector<1xf32> to vector<1x1x1xf32>
    %691 = vector.extract %690[0, 0, 0] : f32 from vector<1x1x1xf32>
    %692 = vector.broadcast %691 : f32 to vector<1x1xf32>
    %cst_270 = arith.constant 3.125000e-02 : f32
    %693 = vector.broadcast %cst_270 : f32 to vector<1x1xf32>
    %694 = arith.mulf %693, %692 : vector<1x1xf32>
    %695 = arith.addf %471, %694 : vector<1x1xf32>
    %696 = vector.extract_strided_slice %535 {offsets = [0, 16], sizes = [2, 16], strides = [1, 1]} : vector<2x32xf32> to vector<2x16xf32>
    %697 = arith.mulf %644, %696 : vector<2x16xf32>
    %698 = arith.addf %629, %697 : vector<2x16xf32>
    %c0_271 = arith.constant 0 : index
    %c16_272 = arith.constant 16 : index
    %699 = vector.load %arg17[%c0_271, %c16_272] : memref<4x32xf32, #tpu.memory_space<vmem>>, vector<2x16xf32>
    tpu.vector_store %arg17[%c0_271, %c16_272], %698 {strides = array<i32>} : memref<4x32xf32, #tpu.memory_space<vmem>>, vector<2x16xf32>,
    %c2_273 = arith.constant 2 : index
    %c16_274 = arith.constant 16 : index
    %700 = vector.load %arg17[%c2_273, %c16_274] : memref<4x32xf32, #tpu.memory_space<vmem>>, vector<2x16xf32>
    tpu.vector_store %arg17[%c2_273, %c16_274], %631 {strides = array<i32>} : memref<4x32xf32, #tpu.memory_space<vmem>>, vector<2x16xf32>,
    %c0_275 = arith.constant 0 : index
    %c0_276 = arith.constant 0 : index
    %701 = vector.load %arg17[%c0_275, %c0_276] : memref<4x32xf32, #tpu.memory_space<vmem>>, vector<4x32xf32>
    %702 = arith.truncf %701 : vector<4x32xf32> to vector<4x32xbf16>
    %cst_277 = arith.constant dense<0.000000e+00> : vector<4x128xf32>
    %703 = tpu.matmul %702, %8, %cst_277 {dimension_numbers = #tpu.dot_dimension_numbers<[1], [0], [0], [1], [0, 0, 1, 1], [], []>} : vector<4x32xbf16>, vector<32x128xbf16>, vector<4x128xf32> -> vector<4x128xf32>
    %704 = arith.addf %703, %12 : vector<4x128xf32>
    %cst_278 = arith.constant 0.000000e+00 : f32
    %705 = vector.broadcast %cst_278 : f32 to vector<4x128xf32>
    %706 = arith.maximumf %704, %705 : vector<4x128xf32>
    %707 = arith.truncf %706 : vector<4x128xf32> to vector<4x128xbf16>
    %cst_279 = arith.constant dense<0.000000e+00> : vector<4x1536xf32>
    %708 = tpu.matmul %707, %9, %cst_279 {dimension_numbers = #tpu.dot_dimension_numbers<[1], [0], [0], [1], [0, 0, 1, 1], [], []>} : vector<4x128xbf16>, vector<128x1536xbf16>, vector<4x1536xf32> -> vector<4x1536xf32>
    %709 = arith.addf %708, %15 : vector<4x1536xf32>
    %710 = vector.extract_strided_slice %709 {offsets = [0, 0], sizes = [2, 768], strides = [1, 1]} : vector<4x1536xf32> to vector<2x768xf32>
    %711 = arith.subf %710, %530 : vector<2x768xf32>
    %712 = vector.extract_strided_slice %709 {offsets = [2, 0], sizes = [2, 768], strides = [1, 1]} : vector<4x1536xf32> to vector<2x768xf32>
    %713 = arith.subf %712, %530 : vector<2x768xf32>
    %714 = arith.mulf %711, %711 : vector<2x768xf32>
    %715 = vector.shape_cast %714 : vector<2x768xf32> to vector<1x2x768xf32>
    %cst_280 = arith.constant dense<0.000000e+00> : vector<1xf32>
    %716 = vector.multi_reduction <add>, %715, %cst_280 [1, 2] : vector<1x2x768xf32> to vector<1xf32>
    %717 = vector.shape_cast %716 : vector<1xf32> to vector<1x1x1xf32>
    %718 = vector.extract %717[0, 0, 0] : f32 from vector<1x1x1xf32>
    %719 = vector.broadcast %718 : f32 to vector<1x1xf32>
    %cst_281 = arith.constant 2.500000e-01 : f32
    %720 = vector.broadcast %cst_281 : f32 to vector<1x1xf32>
    %721 = arith.mulf %720, %719 : vector<1x1xf32>
    %722 = arith.addf %498, %721 : vector<1x1xf32>
    %723 = arith.mulf %713, %713 : vector<2x768xf32>
    %724 = vector.shape_cast %723 : vector<2x768xf32> to vector<1x2x768xf32>
    %cst_282 = arith.constant dense<0.000000e+00> : vector<1xf32>
    %725 = vector.multi_reduction <add>, %724, %cst_282 [1, 2] : vector<1x2x768xf32> to vector<1xf32>
    %726 = vector.shape_cast %725 : vector<1xf32> to vector<1x1x1xf32>
    %727 = vector.extract %726[0, 0, 0] : f32 from vector<1x1x1xf32>
    %728 = vector.broadcast %727 : f32 to vector<1x1xf32>
    %cst_283 = arith.constant 2.500000e-01 : f32
    %729 = vector.broadcast %cst_283 : f32 to vector<1x1xf32>
    %730 = arith.mulf %729, %728 : vector<1x1xf32>
    %731 = arith.addf %507, %730 : vector<1x1xf32>
    %732 = vector.extract_strided_slice %709 {offsets = [0, 768], sizes = [2, 768], strides = [1, 1]} : vector<4x1536xf32> to vector<2x768xf32>
    %733 = arith.subf %732, %530 : vector<2x768xf32>
    %734 = vector.extract_strided_slice %709 {offsets = [2, 768], sizes = [2, 768], strides = [1, 1]} : vector<4x1536xf32> to vector<2x768xf32>
    %735 = arith.subf %734, %530 : vector<2x768xf32>
    %736 = arith.mulf %733, %733 : vector<2x768xf32>
    %737 = vector.shape_cast %736 : vector<2x768xf32> to vector<1x2x768xf32>
    %cst_284 = arith.constant dense<0.000000e+00> : vector<1xf32>
    %738 = vector.multi_reduction <add>, %737, %cst_284 [1, 2] : vector<1x2x768xf32> to vector<1xf32>
    %739 = vector.shape_cast %738 : vector<1xf32> to vector<1x1x1xf32>
    %740 = vector.extract %739[0, 0, 0] : f32 from vector<1x1x1xf32>
    %741 = vector.broadcast %740 : f32 to vector<1x1xf32>
    %cst_285 = arith.constant 2.500000e-01 : f32
    %742 = vector.broadcast %cst_285 : f32 to vector<1x1xf32>
    %743 = arith.mulf %742, %741 : vector<1x1xf32>
    %744 = arith.addf %520, %743 : vector<1x1xf32>
    %745 = arith.mulf %735, %735 : vector<2x768xf32>
    %746 = vector.shape_cast %745 : vector<2x768xf32> to vector<1x2x768xf32>
    %cst_286 = arith.constant dense<0.000000e+00> : vector<1xf32>
    %747 = vector.multi_reduction <add>, %746, %cst_286 [1, 2] : vector<1x2x768xf32> to vector<1xf32>
    %748 = vector.shape_cast %747 : vector<1xf32> to vector<1x1x1xf32>
    %749 = vector.extract %748[0, 0, 0] : f32 from vector<1x1x1xf32>
    %750 = vector.broadcast %749 : f32 to vector<1x1xf32>
    %cst_287 = arith.constant 2.500000e-01 : f32
    %751 = vector.broadcast %cst_287 : f32 to vector<1x1xf32>
    %752 = arith.mulf %751, %750 : vector<1x1xf32>
    %753 = arith.addf %529, %752 : vector<1x1xf32>
    %c0_288 = arith.constant 0 : index
    %c0_289 = arith.constant 0 : index
    %754 = vector.load %arg15[%c0_288, %c0_289] : memref<1x8xf32, #tpu.memory_space<vmem>>, vector<1x1xf32>
    tpu.vector_store %arg15[%c0_288, %c0_289], %595 {strides = array<i32>} : memref<1x8xf32, #tpu.memory_space<vmem>>, vector<1x1xf32>,
    %c0_290 = arith.constant 0 : index
    %c1_291 = arith.constant 1 : index
    %755 = vector.load %arg15[%c0_290, %c1_291] : memref<1x8xf32, #tpu.memory_space<vmem>>, vector<1x1xf32>
    tpu.vector_store %arg15[%c0_290, %c1_291], %612 {strides = array<i32>} : memref<1x8xf32, #tpu.memory_space<vmem>>, vector<1x1xf32>,
    %c0_292 = arith.constant 0 : index
    %c2_293 = arith.constant 2 : index
    %756 = vector.load %arg15[%c0_292, %c2_293] : memref<1x8xf32, #tpu.memory_space<vmem>>, vector<1x1xf32>
    tpu.vector_store %arg15[%c0_292, %c2_293], %722 {strides = array<i32>} : memref<1x8xf32, #tpu.memory_space<vmem>>, vector<1x1xf32>,
    %c0_294 = arith.constant 0 : index
    %c3 = arith.constant 3 : index
    %757 = vector.load %arg15[%c0_294, %c3] : memref<1x8xf32, #tpu.memory_space<vmem>>, vector<1x1xf32>
    tpu.vector_store %arg15[%c0_294, %c3], %731 {strides = array<i32>} : memref<1x8xf32, #tpu.memory_space<vmem>>, vector<1x1xf32>,
    %c0_295 = arith.constant 0 : index
    %c4 = arith.constant 4 : index
    %758 = vector.load %arg15[%c0_295, %c4] : memref<1x8xf32, #tpu.memory_space<vmem>>, vector<1x1xf32>
    tpu.vector_store %arg15[%c0_295, %c4], %678 {strides = array<i32>} : memref<1x8xf32, #tpu.memory_space<vmem>>, vector<1x1xf32>,
    %c0_296 = arith.constant 0 : index
    %c5 = arith.constant 5 : index
    %759 = vector.load %arg15[%c0_296, %c5] : memref<1x8xf32, #tpu.memory_space<vmem>>, vector<1x1xf32>
    tpu.vector_store %arg15[%c0_296, %c5], %695 {strides = array<i32>} : memref<1x8xf32, #tpu.memory_space<vmem>>, vector<1x1xf32>,
    %c0_297 = arith.constant 0 : index
    %c6 = arith.constant 6 : index
    %760 = vector.load %arg15[%c0_297, %c6] : memref<1x8xf32, #tpu.memory_space<vmem>>, vector<1x1xf32>
    tpu.vector_store %arg15[%c0_297, %c6], %744 {strides = array<i32>} : memref<1x8xf32, #tpu.memory_space<vmem>>, vector<1x1xf32>,
    %c0_298 = arith.constant 0 : index
    %c7 = arith.constant 7 : index
    %761 = vector.load %arg15[%c0_298, %c7] : memref<1x8xf32, #tpu.memory_space<vmem>>, vector<1x1xf32>
    tpu.vector_store %arg15[%c0_298, %c7], %753 {strides = array<i32>} : memref<1x8xf32, #tpu.memory_space<vmem>>, vector<1x1xf32>,
    return
  }
}

</mosaic_0001>

<bundles_post_ra>
// kernel: ssm_forward.1
= control target key start
LH: loop header
LB: loop body
LE: loop exit
PB: predicated region body
PF: predicated region fallthrough
CT: control target
= control target key end

     0   :  { %20 = vsyncpa [#allocation5], 0  ;;  %s8672_s0 = inlined_call_operand.vmem [shape: f32[8,768], index: 0, kind: input, shape index: {}]   ;;  %s8673_s1 = inlined_call_operand.vmem [shape: f32[6,4], index: 1, kind: input, shape index: {}]   ;;  %s8674_s2 = inlined_call_operand.vmem [shape: f32[6,32], index: 2, kind: input, shape index: {}]   ;;  %s8675_s3 = inlined_call_operand.vmem [shape: bf16[768,128], index: 3, kind: input, shape index: {}]   ;;  %s8676_s4 = inlined_call_operand.vmem [shape: f32[1,128], index: 4, kind: input, shape index: {}]   ;;  %s8677_s5 = inlined_call_operand.vmem [shape: bf16[128,64], index: 5, kind: input, shape index: {}]   ;;  %s8678_s6 = inlined_call_operand.vmem [shape: f32[1,64], index: 6, kind: input, shape index: {}]   ;;  %s8679_s7 = inlined_call_operand.vmem [shape: bf16[2,116,128], index: 7, kind: input, shape index: {}]   ;;  %s8680_s8 = inlined_call_operand.hbm [shape: f32[2,1,128], index: 8, kind: input, shape index: {}]   ;;  %s8681_s9 = inlined_call_operand.vmem [shape: bf16[2,128,64], index: 9, kind: input, shape index: {}]   ;;  %s8682_s10 = inlined_call_operand.hbm [shape: f32[2,1,64], index: 10, kind: input, shape index: {}]   ;;  %s8683_s11 = inlined_call_operand.hbm [shape: bf16[32,128], index: 11, kind: input, shape index: {}]   ;;  %s8684_s12 = inlined_call_operand.hbm [shape: f32[1,128], index: 12, kind: input, shape index: {}]   ;;  %s8685_s13 = inlined_call_operand.vmem [shape: bf16[128,1536], index: 13, kind: input, shape index: {}]   ;;  %s8686_s14 = inlined_call_operand.hbm [shape: f32[1,1536], index: 14, kind: input, shape index: {}]   ;;  %s8687_s15 = inlined_call_operand.vmem [shape: f32[1,8], index: 15, kind: output, shape index: {}]  }
   0x1   :  { %21 = vsyncpa [#allocation7], 0 }
   0x2   :  { %22 = vsyncpa [#allocation10], 0  ;;  %s5956_s18 = smov [#allocation6]   ;;  %s5957_s20 = smov [#allocation9]  }
   0x3   :  { %s58_s19 = sshll.u32 %s5956_s18, 4  ;;  %s83_s21 = sshll.u32 %s5957_s20, 4  ;;  %s59_s19 = int_to_ptr.vmem [resolvable:$true] %s58_s19  ;;  %s84_s21 = int_to_ptr.vmem [resolvable:$true] %s83_s21 }
   0x4   :  { %s5858_s22 = scalar_lea.vmem %s59_s19, 32  ;;  %p5863_p1 = scmp.lt.s32.totalorder %s59_s19, %s59_s19 }
   0x5   :  { %p5859_p0 = scmp.ne.s32.totalorder %s59_s19, %s5858_s22  ;;  %p5864_p2 = scmp.lt.s32.totalorder %s5858_s22, %s5858_s22 }
   0x7   :  { %p5865_p3 = por %p5864_p2, %p5863_p1 }
   0x9   :  { %p5866_p4 = pnand %p5865_p3, %p5859_p0 }
   0xb   :  { %5869 = shalt.err (!%p5866_p4)
}
   0xc   :  { %s5958_s23 = smov 16   ;;  %s5959_s24 = smov 1  }
   0xd   :  { %64 = dma.hbm_to_vmem [thread:$0]  %s8682_s10, 32, %s59_s19, [#allocation7], %s5958_s23, %s5958_s23, %s5959_s24  }
   0xe   :  { %s5878_s27 = scalar_lea.vmem %s84_s21, 16  ;;  %s5882_s28 = scalar_lea.vmem %s84_s21, 32 }
   0xf   :  { %p5879_p5 = scmp.ne.s32.totalorder %s84_s21, %s5878_s27  ;;  %p5883_p6 = scmp.lt.s32.totalorder %s84_s21, %s84_s21 }
  0x10   :  { %p5884_p7 = scmp.lt.s32.totalorder %s5882_s28, %s5878_s27 }
  0x12   :  { %p5885_p8 = por %p5884_p7, %p5883_p6 }
  0x14   :  { %p5886_p9 = pnand %p5885_p8, %p5879_p5 }
  0x16   :  { %5889 = shalt.err (!%p5886_p9)
}
  0x17   :  { %86 = dma.hbm_to_vmem [thread:$0]  %s8684_s12, 16, %s84_s21, [#allocation10]  }
  0x18   :  { %s5960_s16 = smov [#allocation4]   ;;  %s5961_s18 = smov [#allocation8]  }
  0x19   :  { %s44_s17 = sshll.u32 %s5960_s16, 4  ;;  %s70_s20 = sshll.u32 %s5961_s18, 4  ;;  %s45_s17 = int_to_ptr.vmem [resolvable:$true] %s44_s17  ;;  %s71_s20 = int_to_ptr.vmem [resolvable:$true] %s70_s20 }
  0x1a   :  { %s5898_s22 = scalar_lea.vmem %s45_s17, 32  ;;  %p5903_p11 = scmp.lt.s32.totalorder %s45_s17, %s45_s17 }
  0x1b   :  { %p5899_p10 = scmp.ne.s32.totalorder %s45_s17, %s5898_s22  ;;  %p5904_p12 = scmp.lt.s32.totalorder %s5898_s22, %s5898_s22 }
  0x1d   :  { %p5905_p13 = por %p5904_p12, %p5903_p11 }
  0x1f   :  { %p5906_p0 = pnand %p5905_p13, %p5899_p10 }
  0x21   :  { %5909 = shalt.err (!%p5906_p0)
}
  0x22   :  { %50 = dma.hbm_to_vmem [thread:$0]  %s8680_s8, 32, %s45_s17, [#allocation5], %s5958_s23, %s5958_s23, %s5959_s24  }
  0x23   :  { %s5918_s12 = scalar_lea.vmem %s71_s20, 256  ;;  %p5923_p2 = scmp.lt.s32.totalorder %s71_s20, %s71_s20 }
  0x24   :  { %p5919_p1 = scmp.ne.s32.totalorder %s71_s20, %s5918_s12  ;;  %p5924_p3 = scmp.lt.s32.totalorder %s5918_s12, %s5918_s12 }
  0x26   :  { %p5925_p4 = por %p5924_p3, %p5923_p2 }
  0x28   :  { %p5926_p5 = pnand %p5925_p4, %p5919_p1 }
  0x2a   :  { %5929 = shalt.err (!%p5926_p5)
}
  0x2b   :  { %s5962_s21 = smov 64   ;;  %s5963_s25 = smov 4  }
  0x2c   :  { %76 = dma.hbm_to_vmem [thread:$0]  %s8683_s11, 256, %s71_s20, [#allocation7], %s5962_s21, %s5962_s21, %s5963_s25  }
  0x2d   :  { %s5964_s28 = smov [#allocation11]  }
  0x2e   :  { %s95_s29 = sshll.u32 %s5964_s28, 4  ;;  %s96_s29 = int_to_ptr.vmem [resolvable:$true] %s95_s29 }
  0x2f   :  { %s5938_s30 = scalar_lea.vmem %s96_s29, 192  ;;  %p5943_p7 = scmp.lt.s32.totalorder %s96_s29, %s96_s29 }
  0x30   :  { %p5939_p6 = scmp.ne.s32.totalorder %s96_s29, %s5938_s30  ;;  %p5944_p8 = scmp.lt.s32.totalorder %s5938_s30, %s5938_s30 }
  0x32   :  { %p5945_p9 = por %p5944_p8, %p5943_p7 }
  0x34   :  { %p5946_p10 = pnand %p5945_p9, %p5939_p6 }
  0x36   :  { %5949 = shalt.err (!%p5946_p10)
}
  0x37   :  { %98 = dma.hbm_to_vmem [thread:$0]  %s8686_s14, 192, %s96_s29, [#allocation10]  }
  0x38   :  { %5950 = dma.done.wait [#allocation5], 32  }
  0x39   :  { %5951 = vsyncadd [#allocation5], 4294967264 }
  0x3a   :  { %5952 = dma.done.wait [#allocation7], 288  }
  0x3b   :  { %5953 = vsyncadd [#allocation7], 4294967008 }
  0x3c   :  { %5954 = dma.done.wait [#allocation10], 208  }
  0x3d   :  { %5955 = vsyncadd [#allocation10], 4294967088  ;;  %v5422_v0 = vld [vmem:[%s8675_s3 + $0x78] sm:$0xff]   ;;  %v5426_v4 = vld [vmem:[%s8675_s3 + $0x70] sm:$0xff]   ;;  %v8688_v61 = vmov 0.0   ;;  %vm5966_vm0 = vmmov 0  }
  0x3e   :  { %v5423_v1 = vld [vmem:[%s8675_s3 + $0x38] sm:$0xff]   ;;  %4765 = vmatprep.subr.bf16.mxu0 %v5422_v0  ;;  %v5427_v5 = vld [vmem:[%s8675_s3 + $0x30] sm:$0xff]   ;;  %v5430_v8 = vld [vmem:[%s8675_s3 + $0x68] sm:$0xff]   ;;  %vm1077_vm1 = vcmask 1041408   ;;  %vm1018_vm2 = vcmask 943104   ;;  %vm1024_vm3 = vcmask 648320  }
  0x3f   :  { %v5424_v2 = vld [vmem:[%s8675_s3 + $0xf8] sm:$0xff]   ;;  %4766 = vmatpush3.bf16.msra.mxu0 %v5423_v1  ;;  %v5428_v6 = vld [vmem:[%s8675_s3 + $0xf0] sm:$0xff]   ;;  %v5431_v9 = vld [vmem:[%s8675_s3 + $0x28] sm:$0xff]   ;;  %1019 = vst.msk [vmem:[#allocation2] sm:$0x3] %vm1018_vm2, %v8688_v61  ;;  %vm1389_vm4 = vcmask 650370  }
  0x40   :  { %v5425_v3 = vld [vmem:[%s8675_s3 + $0xb8] sm:$0xff]   ;;  %4787 = vmatprep.subr.bf16.mxu1 %v5424_v2  ;;  %4767 = vmatprep.subr.bf16.mxu0 %v5426_v4  ;;  %v5429_v7 = vld [vmem:[%s8675_s3 + $0xb0] sm:$0xff]   ;;  %v5432_v10 = vld [vmem:[%s8675_s3 + $0xe8] sm:$0xff]   ;;  %vm1073_vm5 = vcmask 949248   ;;  %s5967_s29 = smov 80   ;;  %vm1395_vm6 = vcmask 681600  }
  0x41   :  { %4788 = vmatpush3.bf16.msra.mxu1 %v5425_v3  ;;  %v5433_v11 = vld [vmem:[%s8675_s3 + $0xa8] sm:$0xff]   ;;  %v5434_v12 = vld [vmem:[%s8675_s3 + $0x60] sm:$0xff]   ;;  %v5438_v16 = vld [vmem:[%s8675_s3 + $0x58] sm:$0xff]   ;;  %vm1397_vm7 = vcmask 123904   ;;  %vm1589_vm8 = vcmask 812704   ;;  %vm2761_vm9 = vcmask 652420  }
  0x42   :  { %4789 = vmatprep.subr.bf16.mxu1 %v5428_v6  ;;  %v5435_v13 = vld [vmem:[%s8675_s3 + $0x20] sm:$0xff]   ;;  %v5439_v17 = vld [vmem:[%s8675_s3 + $0x18] sm:$0xff]   ;;  %v5442_v20 = vld [vmem:[%s8675_s3 + $0x50] sm:$0xff]   ;;  %vm2763_vm10 = vcmask 683650   ;;  %s5970_s26 = smov 96   ;;  %vm1775_vm11 = vcmask 255104  }
  0x43   :  { %4768 = vmatpush3.bf16.msra.mxu0 %v5427_v5  ;;  %v5436_v14 = vld [vmem:[%s8675_s3 + $0xe0] sm:$0xff]   ;;  %v5440_v18 = vld [vmem:[%s8675_s3 + $0xd8] sm:$0xff]   ;;  %v5443_v21 = vld [vmem:[%s8675_s3 + $0x10] sm:$0xff]   ;;  %vm1795_vm12 = vcmask 261120   ;;  %vm3628_vm13 = vcmask 654470   ;;  %vm3630_vm14 = vcmask 685700  }
  0x44   :  { %4769 = vmatprep.subr.bf16.mxu0 %v5430_v8  ;;  %v5437_v15 = vld [vmem:[%s8675_s3 + $0xa0] sm:$0xff]   ;;  %v5441_v19 = vld [vmem:[%s8675_s3 + $0x98] sm:$0xff]   ;;  %v5444_v22 = vld [vmem:[%s8675_s3 + $0xd0] sm:$0xff]   ;;  %s5972_s12 = smov 32   ;;  %vm4495_vm15 = vcmask 0   ;;  %vm4501_vm2 = vcmask 24600  }
  0x45   :  { %4790 = vmatpush3.bf16.msra.mxu1 %v5429_v7  ;;  %v5445_v23 = vld [vmem:[%s8675_s3 + $0x90] sm:$0xff]   ;;  %v5446_v24 = vld [vmem:[%s8675_s3 + $0x48] sm:$0xff]   ;;  %v5450_v28 = vld [vmem:[%s8675_s3 + $0x40] sm:$0xff]  }
  0x46   :  { %4791 = vmatprep.subr.bf16.mxu1 %v5432_v10  ;;  %v5447_v25 = vld [vmem:[%s8675_s3 + $0x8] sm:$0xff]   ;;  %v5451_v29 = vld [vmem:[%s8675_s3] sm:$0xff]   ;;  %v5454_v36 = vld [vmem:[%s8675_s3 + $0x178] sm:$0xff]  }
  0x47   :  { %4770 = vmatpush3.bf16.msra.mxu0 %v5431_v9  ;;  %v5448_v26 = vld [vmem:[%s8675_s3 + $0xc8] sm:$0xff]   ;;  %v5452_v30 = vld [vmem:[%s8675_s3 + $0xc0] sm:$0xff]   ;;  %v509_v37 = vld [vmem:[%s8672_s0 + $0x18] sm:$0xff] }
  0x48   :  { %4771 = vmatprep.subr.bf16.mxu0 %v5434_v12  ;;  %v5449_v27 = vld [vmem:[%s8675_s3 + $0x88] sm:$0xff]   ;;  %v5453_v33 = vld [vmem:[%s8675_s3 + $0x80] sm:$0xff]   ;;  %v515_v38 = vpack.c.bf16 %v509_v37, %v509_v37  ;;  %v5455_v39 = vld [vmem:[%s8675_s3 + $0x138] sm:$0xff]  }
  0x49   :  { %4792 = vmatpush3.bf16.msra.mxu1 %v5433_v11  ;;  %v507_v31 = vld [vmem:[%s8672_s0 + $0x8] sm:$0xff]  ;;  %v506_v34 = vld [vmem:[%s8672_s0] sm:$0xff]  ;;  %v508_v40 = vld [vmem:[%s8672_s0 + $0x10] sm:$0xff] }
  0x4a   :  { %4793 = vmatprep.subr.bf16.mxu1 %v5436_v14  ;;  %v513_v32 = vpack.c.bf16 %v507_v31, %v507_v31  ;;  %v512_v35 = vpack.c.bf16 %v506_v34, %v506_v34  ;;  %878 = vmatprep.mubr.bf16.mxu1 %v515_v38  ;;  %v514_v41 = vpack.c.bf16 %v508_v40, %v508_v40  ;;  %v5456_v42 = vld [vmem:[%s8675_s3 + $0x170] sm:$0xff]   ;;  %v5458_v44 = vld [vmem:[%s8675_s3 + $0x168] sm:$0xff]   ;;  %v5460_v46 = vld [vmem:[%s8675_s3 + $0x160] sm:$0xff]  }
  0x4b   :  { %4772 = vmatpush3.bf16.msra.mxu0 %v5435_v13  ;;  %v5457_v43 = vld [vmem:[%s8675_s3 + $0x130] sm:$0xff]   ;;  %v5459_v45 = vld [vmem:[%s8675_s3 + $0x128] sm:$0xff]   ;;  %v5461_v47 = vld [vmem:[%s8675_s3 + $0x120] sm:$0xff]  }
  0x4c   :  { %4773 = vmatprep.subr.bf16.mxu0 %v5438_v16  ;;  %838 = vmatprep.mubr.bf16.mxu0 %v513_v32  ;;  %v5462_v48 = vld [vmem:[%s8675_s3 + $0x158] sm:$0xff]   ;;  %v5464_v50 = vld [vmem:[%s8675_s3 + $0x150] sm:$0xff]   ;;  %v511_v51 = vld [vmem:[%s8672_s0 + $0x28] sm:$0xff] }
  0x4d   :  { %4794 = vmatpush3.bf16.msra.mxu1 %v5437_v15  ;;  %v5463_v49 = vld [vmem:[%s8675_s3 + $0x118] sm:$0xff]   ;;  %v5465_v52 = vld [vmem:[%s8675_s3 + $0x110] sm:$0xff]   ;;  %v517_v53 = vpack.c.bf16 %v511_v51, %v511_v51  ;;  %v5466_v54 = vld [vmem:[%s8675_s3 + $0x148] sm:$0xff]  }
  0x4e   :  { %4795 = vmatprep.subr.bf16.mxu1 %v5440_v18  ;;  %v5467_v55 = vld [vmem:[%s8675_s3 + $0x108] sm:$0xff]   ;;  %v5468_v56 = vld [vmem:[%s8675_s3 + $0x140] sm:$0xff]   ;;  %v5470_v60 = vld [vmem:[%s8677_s5 + $0x38] sm:$0xff]  }
  0x4f   :  { %4774 = vmatpush3.bf16.msra.mxu0 %v5439_v17  ;;  %v5469_v57 = vld [vmem:[%s8675_s3 + $0x100] sm:$0xff]   ;;  %v5471_v62 = vld [vmem:[%s8677_s5 + $0x30] sm:$0xff]   ;;  %v5472_v63 = vld [vmem:[%s8677_s5 + $0x28] sm:$0xff]  }
  0x50   :  { %4775 = vmatprep.subr.bf16.mxu0 %v5442_v20  ;;  %v510_v58 = vld [vmem:[%s8672_s0 + $0x20] sm:$0xff]  ;;  %v5474_v1 = vld [vmem:[%s8677_s5 + $0x18] sm:$0xff]   ;;  %v5475_v2 = vld [vmem:[%s8677_s5 + $0x10] sm:$0xff]  }
  0x51   :  { %4796 = vmatpush3.bf16.msra.mxu1 %v5441_v19  ;;  %v516_v59 = vpack.c.bf16 %v510_v58, %v510_v58  ;;  %v5473_v0 = vld [vmem:[%s8677_s5 + $0x20] sm:$0xff]   ;;  %v5476_v3 = vld [vmem:[%s8677_s5 + $0x8] sm:$0xff]   ;;  %v6309_v31 = vld [vmem:[%s8679_s7 + $0x18] sm:$0xff]  }
  0x52   :  { %4797 = vmatprep.subr.bf16.mxu1 %v5444_v22  ;;  %v5477_v4 = vld [vmem:[%s8677_s5] sm:$0xff]   ;;  %v6316_v32 = vld [vmem:[%s8679_s7 + $0x10] sm:$0xff]  }
  0x53   :  { %4776 = vmatpush3.bf16.msra.mxu0 %v5443_v21  ;;  %v4518_v14 = vld [vmem:[%s8676_s4] ss:$0 sm:$0xff]  ;;  %v6440_v58 = vld [vmem:[%s8679_s7 + $0x44] sm:$0xff]   ;;  %s5969_s4 = smov 112  }
  0x54   :  { %4777 = vmatprep.subr.bf16.mxu0 %v5446_v24  ;;  %v6331_v34 = vld [vmem:[%s8679_s7] sm:$0xff]  }
  0x55   :  { %4798 = vmatpush3.bf16.msra.mxu1 %v5445_v23 }
  0x56   :  { %4799 = vmatprep.subr.bf16.mxu1 %v5448_v26  ;;  %v5478_v26 = vld [vmem:[%s8679_s7 + $0x38] ss:$0 sps:$4 sm:$0x33]  }
  0x57   :  { %4778 = vmatpush3.bf16.msra.mxu0 %v5447_v25 }
  0x58   :  { %4779 = vmatprep.subr.bf16.mxu0 %v5450_v28  ;;  %v6288_v28 = vld [vmem:[%s8679_s7 + $0x30] sm:$0xff]  }
  0x59   :  { %4800 = vmatpush3.bf16.msra.mxu1 %v5449_v27  ;;  %v6281_v27 = vsel %vm1077_vm1, %v5478_v26, 0 }
  0x5a   :  { %4801 = vmatprep.subr.bf16.mxu1 %v5452_v30  ;;  %8829 = vst [vmem:[#allocation15_spill] sm:$0xff] %v6281_v27  ;;  %v6302_v30 = vld [vmem:[%s8679_s7 + $0x20] sm:$0xff]  }
  0x5b   :  { %4780 = vmatpush3.bf16.msra.mxu0 %v5451_v29  ;;  %v6295_v29 = vld [vmem:[%s8679_s7 + $0x28] sm:$0xff]  }
  0x5c   :  { %4809 = vmatprep.subr.bf16.mxu0 %v5454_v36 }
  0x5d   :  { %4802 = vmatpush3.bf16.msra.mxu1 %v5453_v33  ;;  %v6324_v33 = vld [vmem:[%s8679_s7 + $0x8] sm:$0xff]  }
  0x5e   :  { %839 = vmatmul.mubr.bf16.vlgmr.msra.gmra.mxu0 %v512_v35  ;;  %4993 = vmatprep.subr.bf16.mxu1 %v8688_v61  ;;  %v4519_v35 = vld [vmem:[%s8678_s6] ss:$0 sm:$0xff]  ;;  %s5968_s6 = smov 52  }
  0x5f   :  { %4810 = vmatpush3.bf16.msra.mxu0 %v5455_v39  ;;  %918 = vmatprep.mubr.bf16.mxu0 %v517_v53  ;;  %v6403_v53 = vld [vmem:[%s8679_s7 + $0x6c] sm:$0xff]  }
  0x60   :  { %879 = vmatmul.mubr.bf16.vlgmr.msra.gmra.mxu1 %v514_v41  ;;  %4811 = vmatprep.subr.bf16.mxu0 %v5456_v42  ;;  %v6342_v41 = vld [vmem:[%s8681_s9 + $0x38] sm:$0xff]   ;;  %v6348_v42 = vld [vmem:[%s8681_s9 + $0x30] sm:$0xff]  }
  0x61   :  { %4994 = vmatpush3.bf16.msra.mxu1 %v5470_v60  ;;  %5009 = vmatprep.mubr.msk.bf16.mxu1 %vm5966_vm0, %v8688_v61  ;;  %v6474_v60 = vld [vmem:[%s8681_s9] sm:$0xff]  }
  0x62   :  { %4995 = vmatprep.subr.bf16.mxu1 %v8688_v61 }
  0x63   :  { %4812 = vmatpush3.bf16.msra.mxu0 %v5457_v43  ;;  %v6355_v43 = vld [vmem:[%s8681_s9 + $0x28] sm:$0xff]  }
  0x64   :  { %4813 = vmatprep.subr.bf16.mxu0 %v5458_v44  ;;  %v6362_v44 = vld [vmem:[%s8681_s9 + $0x20] sm:$0xff]  }
  0x65   :  { %4996 = vmatpush3.bf16.msra.mxu1 %v5471_v62  ;;  %v1016_v62 = vld [vmem:[%s8673_s1] sm:$0x3f] }
  0x66   :  { %4997 = vmatprep.subr.bf16.mxu1 %v8688_v61 }
  0x67   :  { %4814 = vmatpush3.bf16.msra.mxu0 %v5459_v45  ;;  %v6369_v45 = vld [vmem:[%s8681_s9 + $0x18] sm:$0xff]  }
  0x68   :  { %4815 = vmatprep.subr.bf16.mxu0 %v5460_v46  ;;  %v6376_v46 = vld [vmem:[%s8681_s9 + $0x10] sm:$0xff]  }
  0x69   :  { %4998 = vmatpush3.bf16.msra.mxu1 %v5472_v63  ;;  %v6482_v63 = vld [vmem:[#allocation4] ss:$0 sm:$0xff] }
  0x6a   :  { %4999 = vmatprep.subr.bf16.mxu1 %v8688_v61 }
  0x6b   :  { %4816 = vmatpush3.bf16.msra.mxu0 %v5461_v47  ;;  %v6383_v47 = vld [vmem:[%s8681_s9 + $0x8] sm:$0xff]  }
  0x6c   :  { %4817 = vmatprep.subr.bf16.mxu0 %v5462_v48 }
  0x6d   :  { %5000 = vmatpush3.bf16.msra.mxu1 %v5473_v0 }
  0x6e   :  { %5001 = vmatprep.subr.bf16.mxu1 %v8688_v61 }
  0x6f   :  { %4818 = vmatpush3.bf16.msra.mxu0 %v5463_v49  ;;  %v5486_v49 = vld [vmem:[%s8679_s7 + $0x74] ss:$0 sps:$4 sm:$0x33]  }
  0x70   :  { %4819 = vmatprep.subr.bf16.mxu0 %v5464_v50 }
  0x71   :  { %5002 = vmatpush3.bf16.msra.mxu1 %v5474_v1 }
  0x72   :  { %5003 = vmatprep.subr.bf16.mxu1 %v8688_v61 }
  0x73   :  { %4820 = vmatpush3.bf16.msra.mxu0 %v5465_v52  ;;  %v6396_v52 = vsel %vm1077_vm1, %v5486_v49, 0 }
  0x74   :  { %4821 = vmatprep.subr.bf16.mxu0 %v5466_v54  ;;  %8830 = vst [vmem:[#allocation16_spill] sm:$0xff] %v6396_v52  ;;  %v6412_v54 = vld [vmem:[%s8679_s7 + $0x64] sm:$0xff]  }
  0x75   :  { %5004 = vmatpush3.bf16.msra.mxu1 %v5475_v2 }
  0x76   :  { %5005 = vmatprep.subr.bf16.mxu1 %v8688_v61 }
  0x77   :  { %4822 = vmatpush3.bf16.msra.mxu0 %v5467_v55  ;;  %v6419_v55 = vld [vmem:[%s8679_s7 + $0x5c] sm:$0xff]  }
  0x78   :  { %4823 = vmatprep.subr.bf16.mxu0 %v5468_v56  ;;  %v6426_v56 = vld [vmem:[%s8679_s7 + $0x54] sm:$0xff]  }
  0x79   :  { %5006 = vmatpush3.bf16.msra.mxu1 %v5476_v3 }
  0x7a   :  { %5007 = vmatprep.subr.bf16.mxu1 %v8688_v61 }
  0x7b   :  { %4824 = vmatpush3.bf16.msra.mxu0 %v5469_v57  ;;  %v6433_v57 = vld [vmem:[%s8679_s7 + $0x4c] sm:$0xff]  }
  0x7c   :  { %5013 = vmatprep.subr.bf16.mxu0 %v8688_v61 }
  0x7d   :  { %5008 = vmatpush3.bf16.msra.mxu1 %v5477_v4 }
  0x7e   :  { %919 = vmatmul.mubr.bf16.vlgmr.msra.gmra.mxu0 %v516_v59  ;;  %5033 = vmatprep.subr.bf16.mxu1 %v8688_v61  ;;  %v6447_v59 = vld [vmem:[%s8679_s7 + $0x3c] sm:$0xff]  }
  0x7f   :  { %5029 = vmatprep.mubr.msk.bf16.mxu0 %vm5966_vm0, %v8688_v61  ;;  %5014 = vmatpush3.bf16.msra.mxu0 %v6281_v27 }
  0x80   :  { %5015 = vmatprep.subr.bf16.mxu0 %v8688_v61 }
  0x83   :  { %5016 = vmatpush3.bf16.msra.mxu0 %v6288_v28 }
  0x84   :  { %5017 = vmatprep.subr.bf16.mxu0 %v8688_v61 }
  0x87   :  { %5018 = vmatpush3.bf16.msra.mxu0 %v6295_v29 }
  0x88   :  { %5019 = vmatprep.subr.bf16.mxu0 %v8688_v61 }
  0x8b   :  { %5020 = vmatpush3.bf16.msra.mxu0 %v6302_v30 }
  0x8c   :  { %5021 = vmatprep.subr.bf16.mxu0 %v8688_v61 }
  0x8f   :  { %5022 = vmatpush3.bf16.msra.mxu0 %v6309_v31 }
  0x90   :  { %5023 = vmatprep.subr.bf16.mxu0 %v8688_v61 }
  0x93   :  { %5024 = vmatpush3.bf16.msra.mxu0 %v6316_v32 }
  0x94   :  { %5025 = vmatprep.subr.bf16.mxu0 %v8688_v61 }
  0x97   :  { %5026 = vmatpush3.bf16.msra.mxu0 %v6324_v33 }
  0x98   :  { %5027 = vmatprep.subr.bf16.mxu0 %v8688_v61 }
  0x9b   :  { %5028 = vmatpush3.bf16.msra.mxu0 %v6331_v34 }
  0x9c   :  { %5053 = vmatprep.subr.bf16.mxu0 %v8688_v61 }
 0x11e   :  { %v4781_v5 = vpop.f32.mrf.mxu0 }
 0x120   :  { %v4782_v6 = vpop.f32.mrf.mxu0  ;;  %v4803_v7 = vpop.f32.mrf.mxu1 }
 0x121   :  { %v4783_v13 = vadd.f32 %v4782_v6, %v4781_v5  ;;  %v6488_v5 = vld [vmem:[%s8681_s9 + $0x78] sm:$0xff]  }
 0x122   :  { %v4784_v8 = vpop.f32.mrf.mxu0  ;;  %v4804_v9 = vpop.f32.mrf.mxu1 }
 0x123   :  { %v841_v15 = vadd.f32 %v4783_v13, %v4518_v14  ;;  %v4805_v16 = vadd.f32 %v4804_v9, %v4803_v7  ;;  %v6494_v8 = vld [vmem:[%s8681_s9 + $0x70] sm:$0xff]   ;;  %v6503_v9 = vld [vmem:[%s8681_s9 + $0x68] sm:$0xff]   ;;  %v6534_v14 = vld [vmem:[#allocation4 + $0x1] ss:$0 sm:$0xff] }
 0x124   :  { %v4785_v10 = vpop.f32.mrf.mxu0  ;;  %v4806_v11 = vpop.f32.mrf.mxu1  ;;  %v6531_v13 = vld [vmem:[%s8681_s9 + $0x48] sm:$0xff]  }
 0x125   :  { %v881_v19 = vadd.f32 %v4805_v16, %v841_v15  ;;  %v6510_v10 = vld [vmem:[%s8681_s9 + $0x60] sm:$0xff]   ;;  %v6517_v11 = vld [vmem:[%s8681_s9 + $0x58] sm:$0xff]  }
 0x126   :  { %v4807_v12 = vpop.f32.mrf.mxu1  ;;  %v6540_v16 = vld [vmem:[%s8681_s9 + $0x40] sm:$0xff]  }
 0x127   :  { %v6524_v12 = vld [vmem:[%s8681_s9 + $0x50] sm:$0xff]  }
 0x13e   :  { %v4825_v17 = vpop.f32.mrf.mxu0 }
 0x140   :  { %v4826_v18 = vpop.f32.mrf.mxu0 }
 0x141   :  { %v4827_v20 = vadd.f32 %v4826_v18, %v4825_v17 }
 0x142   :  { %v4828_v21 = vpop.f32.mrf.mxu0 }
 0x143   :  { %v921_v22 = vadd.f32 %v4827_v20, %v881_v19 }
 0x144   :  { %v4829_v23 = vpop.f32.mrf.mxu0 }
 0x145   :  { %v926_v24 = vmax.f32 %v921_v22, 0.0 }
 0x147   :  { %v927_v25 = vpack.c.bf16 %v926_v24, %v926_v24  ;;  %v4554_v24 = vld [vmem:[#allocation6] ss:$0 sm:$0xff] }
 0x149   :  { %5010 = vmatmul.mubr.bf16.vlgmr.msra.gmra.mxu1 %v927_v25 }
 0x14a   :  { %5049 = vmatprep.mubr.msk.bf16.mxu1 %vm5966_vm0, %v8688_v61  ;;  %5034 = vmatpush3.bf16.msra.mxu1 %v6342_v41 }
 0x14b   :  { %5035 = vmatprep.subr.bf16.mxu1 %v8688_v61 }
 0x14e   :  { %5036 = vmatpush3.bf16.msra.mxu1 %v6348_v42 }
 0x14f   :  { %5037 = vmatprep.subr.bf16.mxu1 %v8688_v61 }
 0x152   :  { %5038 = vmatpush3.bf16.msra.mxu1 %v6355_v43 }
 0x153   :  { %5039 = vmatprep.subr.bf16.mxu1 %v8688_v61 }
 0x156   :  { %5040 = vmatpush3.bf16.msra.mxu1 %v6362_v44 }
 0x157   :  { %5041 = vmatprep.subr.bf16.mxu1 %v8688_v61 }
 0x15a   :  { %5042 = vmatpush3.bf16.msra.mxu1 %v6369_v45 }
 0x15b   :  { %5043 = vmatprep.subr.bf16.mxu1 %v8688_v61 }
 0x15e   :  { %5044 = vmatpush3.bf16.msra.mxu1 %v6376_v46 }
 0x15f   :  { %5045 = vmatprep.subr.bf16.mxu1 %v8688_v61 }
 0x162   :  { %5046 = vmatpush3.bf16.msra.mxu1 %v6383_v47 }
 0x163   :  { %5047 = vmatprep.subr.bf16.mxu1 %v8688_v61 }
 0x166   :  { %5048 = vmatpush3.bf16.msra.mxu1 %v6474_v60 }
 0x167   :  { %5073 = vmatprep.subr.bf16.mxu1 %v8688_v61 }
 0x209   :  { %v1010_v36 = vpop.f32.mrf.mxu1 }
 0x20a   :  { %v1011_v37 = vadd.f32 %v4519_v35, %v1010_v36 }
 0x20b   :  { %v5011_v38 = vpop.f32.mrf.mxu1 }
 0x20c   :  { %1021 = vrot.lane.b32.xlu0 %v1011_v37, %s5958_s23 }
 0x20d   :  { %v1013_v39 = vpop.f32.mrf.mxu1 }
 0x20f   :  { %v5012_v40 = vpop.f32.mrf.mxu1 }
 0x210   :  { %1392 = vrot.lane.b32.xlu0 %v1016_v62, %s5967_s29 }
 0x27e   :  { %v6388_v48 = vpop.permute.xlu0 %1021 }
 0x27f   :  { %1025 = vst.msk [vmem:[#allocation2] sm:$0x3] %vm1024_vm3, %v6388_v48  ;;  %vm4503_vm3 = vcmask 32800  }
 0x282   :  { %v6564_v23 = vpop.permute.xlu0 %1392 }
 0x286   :  { %v1026_v50 = vld [vmem:[#allocation2] sm:$0x3] }
 0x287   :  { %1390 = vst.msk [vmem:[#allocation2 - $0x2] sm:$0xc] %vm1389_vm4, %v6388_v48  ;;  %v1027_v51 = vpack.c.bf16 %v1026_v50, %v1026_v50  ;;  %vm4505_vm4 = vcmask 41000  }
 0x288   :  { %1396 = vst.msk [vmem:[#allocation2] sm:$0x3] %vm1395_vm6, %v6564_v23  ;;  %vm4509_vm6 = vcmask 57400  }
 0x289   :  { %5030 = vmatmul.mubr.msk.bf16.vlgmr.msra.gmra.mxu0 %vm1073_vm5, %v1027_v51 }
 0x28a   :  { %5054 = vmatpush3.bf16.msra.mxu0 %v6396_v52  ;;  %5069 = vmatprep.mubr.msk.bf16.mxu0 %vm5966_vm0, %v8688_v61 }
 0x28b   :  { %5055 = vmatprep.subr.bf16.mxu0 %v8688_v61 }
 0x28e   :  { %5056 = vmatpush3.bf16.msra.mxu0 %v6403_v53 }
 0x28f   :  { %5057 = vmatprep.subr.bf16.mxu0 %v8688_v61 }
 0x292   :  { %5058 = vmatpush3.bf16.msra.mxu0 %v6412_v54 }
 0x293   :  { %5059 = vmatprep.subr.bf16.mxu0 %v8688_v61 }
 0x296   :  { %5060 = vmatpush3.bf16.msra.mxu0 %v6419_v55 }
 0x297   :  { %5061 = vmatprep.subr.bf16.mxu0 %v8688_v61 }
 0x29a   :  { %5062 = vmatpush3.bf16.msra.mxu0 %v6426_v56 }
 0x29b   :  { %5063 = vmatprep.subr.bf16.mxu0 %v8688_v61 }
 0x29e   :  { %5064 = vmatpush3.bf16.msra.mxu0 %v6433_v57 }
 0x29f   :  { %5065 = vmatprep.subr.bf16.mxu0 %v8688_v61 }
 0x2a2   :  { %5066 = vmatpush3.bf16.msra.mxu0 %v6440_v58 }
 0x2a3   :  { %5067 = vmatprep.subr.bf16.mxu0 %v8688_v61 }
 0x2a6   :  { %5068 = vmatpush3.bf16.msra.mxu0 %v6447_v59 }
 0x2a7   :  { %5093 = vmatprep.subr.bf16.mxu0 %v8688_v61 }
 0x2a9   :  { %5070 = vmatmul.mubr.msk.bf16.vlgmr.msra.gmra.mxu0 %vm1073_vm5, %v1027_v51  ;;  %v6616_v51 = vld [vmem:[%s8674_s2] sm:$0x3f] }
 0x2aa   :  { %5094 = vmatpush3.bf16.msra.mxu0 %v6281_v27  ;;  %5109 = vmatprep.mubr.msk.bf16.mxu0 %vm5966_vm0, %v8688_v61 }
 0x2ab   :  { %5095 = vmatprep.subr.bf16.mxu0 %v8688_v61 }
 0x2ae   :  { %5096 = vmatpush3.bf16.msra.mxu0 %v6288_v28 }
 0x2af   :  { %5097 = vmatprep.subr.bf16.mxu0 %v8688_v61 }
 0x2b2   :  { %5098 = vmatpush3.bf16.msra.mxu0 %v6295_v29 }
 0x2b3   :  { %5099 = vmatprep.subr.bf16.mxu0 %v8688_v61 }
 0x2b6   :  { %5100 = vmatpush3.bf16.msra.mxu0 %v6302_v30 }
 0x2b7   :  { %5101 = vmatprep.subr.bf16.mxu0 %v8688_v61 }
 0x2ba   :  { %5102 = vmatpush3.bf16.msra.mxu0 %v6309_v31 }
 0x2bb   :  { %5103 = vmatprep.subr.bf16.mxu0 %v8688_v61 }
 0x2be   :  { %5104 = vmatpush3.bf16.msra.mxu0 %v6316_v32 }
 0x2bf   :  { %5105 = vmatprep.subr.bf16.mxu0 %v8688_v61 }
 0x2c2   :  { %5106 = vmatpush3.bf16.msra.mxu0 %v6324_v33  ;;  %v6579_v33 = vld [vmem:[#allocation6 + $0x1] ss:$0 sm:$0xff] }
 0x2c3   :  { %5107 = vmatprep.subr.bf16.mxu0 %v8688_v61 }
 0x2c6   :  { %5108 = vmatpush3.bf16.msra.mxu0 %v6331_v34 }
 0x2c7   :  { %5133 = vmatprep.subr.bf16.mxu0 %v8688_v61 }
 0x349   :  { %v1115_v0 = vpop.f32.mrf.mxu0 }
 0x34a   :  { %v1116_v1 = vadd.f32 %v6482_v63, %v1115_v0 }
 0x34b   :  { %v5031_v2 = vpop.f32.mrf.mxu0 }
 0x34c   :  { %v1121_v3 = vmax.f32 %v1116_v1, 0.0 }
 0x34d   :  { %v1118_v4 = vpop.f32.mrf.mxu0 }
 0x34e   :  { %v1122_v6 = vpack.c.bf16 %v1121_v3, %v1121_v3 }
 0x34f   :  { %v5032_v7 = vpop.f32.mrf.mxu0 }
 0x350   :  { %5050 = vmatmul.mubr.bf16.vlgmr.msra.gmra.mxu1 %v1122_v6 }
 0x351   :  { %5074 = vmatpush3.bf16.msra.mxu1 %v6488_v5  ;;  %5089 = vmatprep.mubr.msk.bf16.mxu1 %vm5966_vm0, %v8688_v61 }
 0x352   :  { %5075 = vmatprep.subr.bf16.mxu1 %v8688_v61 }
 0x355   :  { %5076 = vmatpush3.bf16.msra.mxu1 %v6494_v8 }
 0x356   :  { %5077 = vmatprep.subr.bf16.mxu1 %v8688_v61 }
 0x359   :  { %5078 = vmatpush3.bf16.msra.mxu1 %v6503_v9 }
 0x35a   :  { %5079 = vmatprep.subr.bf16.mxu1 %v8688_v61 }
 0x35d   :  { %5080 = vmatpush3.bf16.msra.mxu1 %v6510_v10 }
 0x35e   :  { %5081 = vmatprep.subr.bf16.mxu1 %v8688_v61 }
 0x361   :  { %5082 = vmatpush3.bf16.msra.mxu1 %v6517_v11 }
 0x362   :  { %5083 = vmatprep.subr.bf16.mxu1 %v8688_v61 }
 0x365   :  { %5084 = vmatpush3.bf16.msra.mxu1 %v6524_v12 }
 0x366   :  { %5085 = vmatprep.subr.bf16.mxu1 %v8688_v61 }
 0x369   :  { %v1293_v15 = vpop.f32.mrf.mxu0  ;;  %5086 = vmatpush3.bf16.msra.mxu1 %v6531_v13 }
 0x36a   :  { %v1294_v17 = vadd.f32 %v6534_v14, %v1293_v15  ;;  %5087 = vmatprep.subr.bf16.mxu1 %v8688_v61 }
 0x36b   :  { %v5071_v18 = vpop.f32.mrf.mxu0 }
 0x36c   :  { %v1299_v19 = vmax.f32 %v1294_v17, 0.0 }
 0x36d   :  { %v1296_v20 = vpop.f32.mrf.mxu0  ;;  %5088 = vmatpush3.bf16.msra.mxu1 %v6540_v16 }
 0x36e   :  { %v1300_v21 = vpack.c.bf16 %v1299_v19, %v1299_v19  ;;  %5113 = vmatprep.subr.bf16.mxu1 %v8688_v61 }
 0x36f   :  { %v5072_v22 = vpop.f32.mrf.mxu0 }
 0x370   :  { %5090 = vmatmul.mubr.bf16.vlgmr.msra.gmra.mxu1 %v1300_v21 }
 0x371   :  { %5114 = vmatpush3.bf16.msra.mxu1 %v6342_v41  ;;  %5129 = vmatprep.mubr.msk.bf16.mxu1 %vm5966_vm0, %v8688_v61 }
 0x372   :  { %5115 = vmatprep.subr.bf16.mxu1 %v8688_v61 }
 0x375   :  { %5116 = vmatpush3.bf16.msra.mxu1 %v6348_v42 }
 0x376   :  { %5117 = vmatprep.subr.bf16.mxu1 %v8688_v61 }
 0x379   :  { %5118 = vmatpush3.bf16.msra.mxu1 %v6355_v43 }
 0x37a   :  { %5119 = vmatprep.subr.bf16.mxu1 %v8688_v61 }
 0x37d   :  { %5120 = vmatpush3.bf16.msra.mxu1 %v6362_v44 }
 0x37e   :  { %5121 = vmatprep.subr.bf16.mxu1 %v8688_v61 }
 0x381   :  { %5122 = vmatpush3.bf16.msra.mxu1 %v6369_v45 }
 0x382   :  { %5123 = vmatprep.subr.bf16.mxu1 %v8688_v61 }
 0x385   :  { %5124 = vmatpush3.bf16.msra.mxu1 %v6376_v46 }
 0x386   :  { %5125 = vmatprep.subr.bf16.mxu1 %v8688_v61 }
 0x389   :  { %5126 = vmatpush3.bf16.msra.mxu1 %v6383_v47 }
 0x38a   :  { %5127 = vmatprep.subr.bf16.mxu1 %v8688_v61 }
 0x38d   :  { %5128 = vmatpush3.bf16.msra.mxu1 %v6474_v60 }
 0x38e   :  { %5153 = vmatprep.subr.bf16.mxu1 %v8688_v61 }
 0x410   :  { %v1205_v25 = vpop.f32.mrf.mxu1 }
 0x411   :  { %v1206_v26 = vadd.f32 %v4554_v24, %v1205_v25 }
 0x412   :  { %v5051_v28 = vpop.f32.mrf.mxu1 }
 0x413   :  { %1398 = vst.msk [vmem:[#allocation2] sm:$0x3] %vm1397_vm7, %v1206_v26 }
 0x414   :  { %v1208_v29 = vpop.f32.mrf.mxu1 }
 0x416   :  { %v5052_v30 = vpop.f32.mrf.mxu1 }
 0x41a   :  { %v1399_v31 = vld [vmem:[#allocation2] sm:$0x3] }
 0x41b   :  { %v1400_v32 = vpack.c.bf16 %v1399_v31, %v1399_v31 }
 0x41d   :  { %5110 = vmatmul.mubr.msk.bf16.vlgmr.msra.gmra.mxu0 %vm1073_vm5, %v1400_v32 }
 0x41e   :  { %5134 = vmatpush3.bf16.msra.mxu0 %v6396_v52  ;;  %5149 = vmatprep.mubr.msk.bf16.mxu0 %vm5966_vm0, %v8688_v61 }
 0x41f   :  { %5135 = vmatprep.subr.bf16.mxu0 %v8688_v61 }
 0x422   :  { %5136 = vmatpush3.bf16.msra.mxu0 %v6403_v53 }
 0x423   :  { %5137 = vmatprep.subr.bf16.mxu0 %v8688_v61 }
 0x426   :  { %5138 = vmatpush3.bf16.msra.mxu0 %v6412_v54 }
 0x427   :  { %5139 = vmatprep.subr.bf16.mxu0 %v8688_v61 }
 0x42a   :  { %5140 = vmatpush3.bf16.msra.mxu0 %v6419_v55 }
 0x42b   :  { %5141 = vmatprep.subr.bf16.mxu0 %v8688_v61 }
 0x42e   :  { %5142 = vmatpush3.bf16.msra.mxu0 %v6426_v56 }
 0x42f   :  { %5143 = vmatprep.subr.bf16.mxu0 %v8688_v61 }
 0x430   :  { %v1383_v34 = vpop.f32.mrf.mxu1 }
 0x431   :  { %v1384_v35 = vadd.f32 %v6579_v33, %v1383_v34 }
 0x432   :  { %v5091_v36 = vpop.f32.mrf.mxu1  ;;  %5144 = vmatpush3.bf16.msra.mxu0 %v6433_v57 }
 0x433   :  { %1585 = vst.msk [vmem:[#allocation2] sm:$0x3] %vm1397_vm7, %v1384_v35  ;;  %5145 = vmatprep.subr.bf16.mxu0 %v8688_v61 }
 0x434   :  { %v1386_v37 = vpop.f32.mrf.mxu1 }
 0x435   :  { %v5510_v37 = vld [vmem:[#allocation8 + $0x8] sm:$0xff]  }
 0x436   :  { %v5092_v38 = vpop.f32.mrf.mxu1  ;;  %5146 = vmatpush3.bf16.msra.mxu0 %v6440_v58 }
 0x437   :  { %5147 = vmatprep.subr.bf16.mxu0 %v8688_v61  ;;  %v5511_v38 = vld [vmem:[#allocation8] sm:$0xff]  }
 0x43a   :  { %5148 = vmatpush3.bf16.msra.mxu0 %v6447_v59 }
 0x43b   :  { %5173 = vmatprep.subr.bf16.mxu0 %v8688_v61 }
 0x4dd   :  { %v1438_v39 = vpop.f32.mrf.mxu0 }
 0x4de   :  { %v1439_v40 = vadd.f32 %v6482_v63, %v1438_v39 }
 0x4df   :  { %v5111_v41 = vpop.f32.mrf.mxu0 }
 0x4e0   :  { %v1444_v42 = vmax.f32 %v1439_v40, 0.0  ;;  %v5512_v40 = vld [vmem:[%s8685_s13 + $0x2a0] ss:$48 sps:$4 sm:$0xff]   ;;  %v6656_v41 = vld [vmem:[%s8685_s13 + $0x2a4] ss:$48 sps:$4 sm:$0xff]  }
 0x4e1   :  { %v1441_v43 = vpop.f32.mrf.mxu0 }
 0x4e2   :  { %v1445_v44 = vpack.c.bf16 %v1444_v42, %v1444_v42  ;;  %v5517_v43 = vld [vmem:[%s8685_s13 + $0x2ac] ss:$48 sps:$4 sm:$0xff]  }
 0x4e3   :  { %v5112_v45 = vpop.f32.mrf.mxu0 }
 0x4e4   :  { %5130 = vmatmul.mubr.bf16.vlgmr.msra.gmra.mxu1 %v1445_v44  ;;  %v5520_v44 = vld [vmem:[%s8685_s13 + $0x244] ss:$48 sps:$4 sm:$0xff]  }
 0x4e5   :  { %5154 = vmatpush3.bf16.msra.mxu1 %v6488_v5  ;;  %5169 = vmatprep.mubr.msk.bf16.mxu1 %vm5966_vm0, %v8688_v61 }
 0x4e6   :  { %5155 = vmatprep.subr.bf16.mxu1 %v8688_v61 }
 0x4e9   :  { %5156 = vmatpush3.bf16.msra.mxu1 %v6494_v8 }
 0x4ea   :  { %5157 = vmatprep.subr.bf16.mxu1 %v8688_v61 }
 0x4ed   :  { %5158 = vmatpush3.bf16.msra.mxu1 %v6503_v9 }
 0x4ee   :  { %5159 = vmatprep.subr.bf16.mxu1 %v8688_v61 }
 0x4f1   :  { %5160 = vmatpush3.bf16.msra.mxu1 %v6510_v10 }
 0x4f2   :  { %5161 = vmatprep.subr.bf16.mxu1 %v8688_v61 }
 0x4f5   :  { %5162 = vmatpush3.bf16.msra.mxu1 %v6517_v11 }
 0x4f6   :  { %5163 = vmatprep.subr.bf16.mxu1 %v8688_v61 }
 0x4f9   :  { %5164 = vmatpush3.bf16.msra.mxu1 %v6524_v12 }
 0x4fa   :  { %5165 = vmatprep.subr.bf16.mxu1 %v8688_v61 }
 0x4fd   :  { %5166 = vmatpush3.bf16.msra.mxu1 %v6531_v13 }
 0x4fe   :  { %5167 = vmatprep.subr.bf16.mxu1 %v8688_v61 }
 0x501   :  { %5168 = vmatpush3.bf16.msra.mxu1 %v6540_v16 }
 0x502   :  { %2321 = vmatprep.subr.bf16.mxu1 %v6656_v41 }
 0x5a4   :  { %v1480_v46 = vpop.f32.mrf.mxu1 }
 0x5a5   :  { %v6609_v47 = vadd.f32 %v4554_v24, %v1480_v46  ;;  %v5518_v46 = vld [vmem:[%s8685_s13 + $0x240] ss:$48 sps:$4 sm:$0xff]  }
 0x5a6   :  { %v5131_v49 = vpop.f32.mrf.mxu1 }
 0x5a7   :  { %8831 = vst [vmem:[#allocation17_spill] sm:$0xff] %v6609_v47  ;;  %1586 = vrot.lane.b32.xlu1 %v6609_v47, %s5968_s6  ;;  %v1487_v54 = vand.u32 2147483647, %v6609_v47  ;;  %v1486_v2 = vmax.f32 %v6609_v47, 0.0  ;;  %v5526_v49 = vld [vmem:[%s8685_s13 + $0x1e4] ss:$48 sps:$4 sm:$0xff]  }
 0x5a8   :  { %v1483_v50 = vpop.f32.mrf.mxu1 }
 0x5a9   :  { %v1488_v55 = vsub.f32 0.0, %v1487_v54  ;;  %v5532_v54 = vld [vmem:[%s8685_s13 + $0x184] ss:$48 sps:$4 sm:$0xff]  }
 0x5aa   :  { %v5132_v53 = vpop.f32.mrf.mxu1 }
 0x5ab   :  { %1574 = vrot.lane.b32.xlu1 %v6616_v51, %s5958_s23  ;;  %v1489_v56 = vmul.f32 1.442695, %v1488_v55  ;;  %v5524_v53 = vld [vmem:[%s8685_s13 + $0x1e0] ss:$48 sps:$4 sm:$0xff]  }
 0x5ac   :  { %v5530_v55 = vld [vmem:[%s8685_s13 + $0x180] ss:$48 sps:$4 sm:$0xff]  }
 0x5ad   :  { %5656 = vpow2.f32 %v1489_v56  ;;  %v6694_v56 = vld [vmem:[%s8685_s13 + $0x124] ss:$48 sps:$4 sm:$0xff]  }
 0x5ba   :  { %v5657_v62 = vpop.eup %5656 }
 0x5bb   :  { %v1491_v63 = vadd.f32 1.0, %v5657_v62  ;;  %v6699_v62 = vld [vmem:[%s8685_s13 + $0x120] ss:$48 sps:$4 sm:$0xff]  }
 0x5bd   :  { %5658 = vlog2.f32 %v1491_v63  ;;  %v6705_v63 = vld [vmem:[%s8685_s13 + $0xc4] ss:$48 sps:$4 sm:$0xff]  }
 0x5ca   :  { %v5659_v0 = vpop.eup %5658 }
 0x5cb   :  { %v1493_v1 = vmul.f32 0.6931472, %v5659_v0  ;;  %v6711_v0 = vld [vmem:[%s8685_s13 + $0xc0] ss:$48 sps:$4 sm:$0xff]  }
 0x5cd   :  { %v1494_v3 = vadd.f32 %v1493_v1, %v1486_v2  ;;  %v6717_v1 = vld [vmem:[%s8685_s13 + $0x64] ss:$48 sps:$4 sm:$0xff]   ;;  %v6723_v2 = vld [vmem:[%s8685_s13 + $0x60] ss:$48 sps:$4 sm:$0xff]  }
 0x5cf   :  { %v6623_v5 = vadd.f32 0.1, %v1494_v3 }
 0x5d1   :  { %8832 = vst [vmem:[#allocation18_spill] sm:$0xff] %v6623_v5 }
 0x619   :  { %v1587_v4 = vpop.permute.xlu1 %1586 }
 0x61a   :  { %1590 = vst.msk [vmem:[#allocation2] sm:$0x3] %vm1589_vm8, %v1587_v4 }
 0x61d   :  { %v1575_v6 = vpop.permute.xlu1 %1574 }
 0x61e   :  { %v1577_v7 = vmul.f32 %v1575_v6, %v6623_v5  ;;  %v7066_v5 = vld [vmem:[%s8685_s13 + $0x1a0] ss:$48 sps:$4 sm:$0xff]  }
 0x61f   :  { %8863 = vst [vmem:[#allocation49_spill] sm:$0xff] %v7066_v5 }
 0x620   :  { %1579 = vrot.lane.b32.xlu1 %v1577_v7, %s5969_s4 }
 0x621   :  { %v1591_v8 = vld [vmem:[#allocation2] sm:$0x3] }
 0x622   :  { %2762 = vst.msk [vmem:[#allocation2 - $0x4] sm:$0x30] %vm2761_vm9, %v6388_v48  ;;  %v1592_v9 = vpack.c.bf16 %v1591_v8, %v1591_v8  ;;  %v5515_v8 = vld [vmem:[%s8685_s13 + $0x2a8] ss:$48 sps:$4 sm:$0xff]  }
 0x623   :  { %2764 = vst.msk [vmem:[#allocation2 - $0x2] sm:$0xc] %vm2763_vm10, %v6564_v23 }
 0x624   :  { %5150 = vmatmul.mubr.msk.bf16.vlgmr.msra.gmra.mxu0 %vm1073_vm5, %v1592_v9 }
 0x625   :  { %5177 = vmatprep.mubr.msk.bf16.mxu0 %vm5966_vm0, %v8688_v61  ;;  %5174 = vmatpush3.bf16.msra.mxu0 %v5510_v37 }
 0x626   :  { %5175 = vmatprep.subr.bf16.mxu0 %v8688_v61  ;;  %v7033_v61 = vld [vmem:[%s8685_s13 + $0x20c] ss:$48 sps:$4 sm:$0xff]  }
 0x627   :  { %8858 = vst [vmem:[#allocation44_spill] sm:$0xff] %v7033_v61 }
 0x629   :  { %5176 = vmatpush3.bf16.msra.mxu0 %v5511_v38 }
 0x62a   :  { %2362 = vmatprep.subr.bf16.mxu0 %v5517_v43  ;;  %v5568_v43 = vld [vmem:[%s8685_s13 + $0x254] ss:$48 sps:$4 sm:$0xff]  }
 0x692   :  { %v1580_v10 = vpop.permute.xlu1 %1579 }
 0x693   :  { %v1582_v11 = vadd.f32 %v1580_v10, %v6609_v47  ;;  %v5523_v10 = vld [vmem:[%s8685_s13 + $0x24c] ss:$48 sps:$4 sm:$0xff]  }
 0x695   :  { %1583 = vst.msk [vmem:[#allocation3] sm:$0x3] %vm1397_vm7, %v1582_v11  ;;  %v5521_v11 = vld [vmem:[%s8685_s13 + $0x248] ss:$48 sps:$4 sm:$0xff]  }
 0x6e4   :  { %v1630_v12 = vpop.f32.mrf.mxu0 }
 0x6e5   :  { %v1631_v13 = vadd.f32 %v6534_v14, %v1630_v12  ;;  %v5529_v12 = vld [vmem:[%s8685_s13 + $0x1ec] ss:$48 sps:$4 sm:$0xff]  }
 0x6e6   :  { %v5151_v15 = vpop.f32.mrf.mxu0 }
 0x6e7   :  { %v1636_v16 = vmax.f32 %v1631_v13, 0.0  ;;  %v5527_v13 = vld [vmem:[%s8685_s13 + $0x1e8] ss:$48 sps:$4 sm:$0xff]   ;;  %v5535_v15 = vld [vmem:[%s8685_s13 + $0x18c] ss:$48 sps:$4 sm:$0xff]  }
 0x6e8   :  { %v1633_v17 = vpop.f32.mrf.mxu0 }
 0x6e9   :  { %v1637_v18 = vpack.c.bf16 %v1636_v16, %v1636_v16  ;;  %v5533_v16 = vld [vmem:[%s8685_s13 + $0x188] ss:$48 sps:$4 sm:$0xff]   ;;  %v5541_v17 = vld [vmem:[%s8685_s13 + $0x12c] ss:$48 sps:$4 sm:$0xff]  }
 0x6ea   :  { %v5152_v19 = vpop.f32.mrf.mxu0 }
 0x6eb   :  { %5170 = vmatmul.mubr.bf16.vlgmr.msra.gmra.mxu1 %v1637_v18  ;;  %v5539_v18 = vld [vmem:[%s8685_s13 + $0x128] ss:$48 sps:$4 sm:$0xff]   ;;  %v5547_v19 = vld [vmem:[%s8685_s13 + $0xcc] ss:$48 sps:$4 sm:$0xff]  }
 0x6ec   :  { %2322 = vmatpush1.bf16.msra.mxu1 %v5512_v40  ;;  %v5563_v40 = vld [vmem:[%s8685_s13 + $0x2b8] ss:$48 sps:$4 sm:$0xff]  }
 0x6ed   :  { %2323 = vmatprep.subr.bf16.mxu1 %v5520_v44  ;;  %v5571_v44 = vld [vmem:[%s8685_s13 + $0x25c] ss:$48 sps:$4 sm:$0xff]  }
 0x6f0   :  { %2324 = vmatpush1.bf16.msra.mxu1 %v5518_v46 }
 0x6f1   :  { %2325 = vmatprep.subr.bf16.mxu1 %v5526_v49  ;;  %v6822_v49 = vld [vmem:[%s8685_s13 + $0x250] ss:$48 sps:$4 sm:$0xff]  }
 0x6f4   :  { %2326 = vmatpush1.bf16.msra.mxu1 %v5524_v53  ;;  %v6832_v53 = vld [vmem:[%s8685_s13 + $0x1f4] ss:$48 sps:$4 sm:$0xff]  }
 0x6f5   :  { %2327 = vmatprep.subr.bf16.mxu1 %v5532_v54  ;;  %v6837_v54 = vld [vmem:[%s8685_s13 + $0x1fc] ss:$48 sps:$4 sm:$0xff]  }
 0x6f8   :  { %2328 = vmatpush1.bf16.msra.mxu1 %v5530_v55  ;;  %v6846_v55 = vld [vmem:[%s8685_s13 + $0x1f0] ss:$48 sps:$4 sm:$0xff]  }
 0x6f9   :  { %2329 = vmatprep.subr.bf16.mxu1 %v6694_v56 }
 0x6fc   :  { %2330 = vmatpush1.bf16.msra.mxu1 %v6699_v62 }
 0x6fd   :  { %2331 = vmatprep.subr.bf16.mxu1 %v6705_v63 }
 0x700   :  { %2332 = vmatpush1.bf16.msra.mxu1 %v6711_v0 }
 0x701   :  { %2333 = vmatprep.subr.bf16.mxu1 %v6717_v1 }
 0x704   :  { %2334 = vmatpush1.bf16.msra.mxu1 %v6723_v2 }
 0x7ab   :  { %v1672_v20 = vpop.f32.mrf.mxu1 }
 0x7ac   :  { %v6636_v21 = vadd.f32 %v6579_v33, %v1672_v20  ;;  %v5545_v20 = vld [vmem:[%s8685_s13 + $0xc8] ss:$48 sps:$4 sm:$0xff]  }
 0x7ad   :  { %v5171_v22 = vpop.f32.mrf.mxu1 }
 0x7ae   :  { %8833 = vst [vmem:[#allocation19_spill] sm:$0xff] %v6636_v21  ;;  %v1679_v24 = vand.u32 2147483647, %v6636_v21  ;;  %v1678_v32 = vmax.f32 %v6636_v21, 0.0  ;;  %v5553_v22 = vld [vmem:[%s8685_s13 + $0x6c] ss:$48 sps:$4 sm:$0xff]  }
 0x7af   :  { %v1675_v25 = vpop.f32.mrf.mxu1 }
 0x7b0   :  { %v1680_v26 = vsub.f32 0.0, %v1679_v24  ;;  %v5551_v24 = vld [vmem:[%s8685_s13 + $0x68] ss:$48 sps:$4 sm:$0xff]   ;;  %v6777_v25 = vld [vmem:[%s8685_s13 + $0x4] ss:$48 sps:$4 sm:$0xff]  }
 0x7b1   :  { %v5172_v28 = vpop.f32.mrf.mxu1  ;;  %2335 = vmatprep.subr.bf16.mxu1 %v6777_v25 }
 0x7b2   :  { %v1681_v29 = vmul.f32 1.442695, %v1680_v26  ;;  %v5559_v26 = vld [vmem:[%s8685_s13 + $0xc] ss:$48 sps:$4 sm:$0xff]   ;;  %v6785_v28 = vld [vmem:[%s8685_s13] ss:$48 sps:$4 sm:$0xff]  }
 0x7b3   :  { %2336 = vmatpush1.bf16.msra.mxu1 %v6785_v28 }
 0x7b4   :  { %5660 = vpow2.f32 %v1681_v29  ;;  %v5557_v29 = vld [vmem:[%s8685_s13 + $0x8] ss:$48 sps:$4 sm:$0xff]  }
 0x7c1   :  { %v5661_v30 = vpop.eup %5660 }
 0x7c2   :  { %v1683_v14 = vadd.f32 1.0, %v5661_v30  ;;  %v6795_v30 = vld [vmem:[%s8685_s13 + $0x2b4] ss:$48 sps:$4 sm:$0xff]  }
 0x7c3   :  { %2403 = vmatprep.subr.bf16.mxu1 %v6795_v30 }
 0x7c4   :  { %5662 = vlog2.f32 %v1683_v14  ;;  %v5565_v14 = vld [vmem:[%s8685_s13 + $0x2bc] ss:$48 sps:$4 sm:$0xff]  }
 0x7d1   :  { %v5663_v31 = vpop.eup %5662 }
 0x7d2   :  { %v1685_v34 = vmul.f32 0.6931472, %v5663_v31  ;;  %v8693_v31 = vmov 0  }
 0x7d3   :  { %2353 = vmatprep.mubr.bf16.mxu1 %v8693_v31 }
 0x7d4   :  { %v1686_v35 = vadd.f32 %v1685_v34, %v1678_v32  ;;  %v4520_v32 = vld [vmem:[#allocation9] ss:$0 sm:$0xff] }
 0x7d6   :  { %v6640_v36 = vadd.f32 0.1, %v1686_v35 }
 0x7d8   :  { %8834 = vst [vmem:[#allocation20_spill] sm:$0xff] %v6640_v36  ;;  %v1765_v33 = vmul.f32 %v6640_v36, %v6616_v51  ;;  %v7059_v36 = vld [vmem:[%s8685_s13 + $0x1ac] ss:$48 sps:$4 sm:$0xff]  }
 0x7d9   :  { %8862 = vst [vmem:[#allocation48_spill] sm:$0xff] %v7059_v36 }
 0x7da   :  { %1767 = vrot.lane.b32.xlu0 %v1765_v33, %s5969_s4 }
 0x7de   :  { %1500 = vrot.lane.b32.xlu0 %v6609_v47, %s5970_s26  ;;  %v7071_v47 = vld [vmem:[%s8685_s13 + $0x1a8] ss:$48 sps:$4 sm:$0xff]  }
 0x7df   :  { %8864 = vst [vmem:[#allocation50_spill] sm:$0xff] %v7071_v47 }
 0x7e2   :  { %1777 = vrot.lane.b32.xlu0 %v6636_v21, %s5969_s4 }
 0x84c   :  { %v1768_v39 = vpop.permute.xlu0 %1767 }
 0x84d   :  { %v1770_v42 = vadd.f32 %v1768_v39, %v6636_v21  ;;  %v5560_v39 = vld [vmem:[%s8685_s13 + $0x2b0] ss:$48 sps:$4 sm:$0xff]  }
 0x84f   :  { %1772 = vrot.lane.b32.xlu1 %v1770_v42, %s5958_s23 }
 0x850   :  { %v6667_v45 = vpop.permute.xlu0 %1500 }
 0x851   :  { %8835 = vst [vmem:[#allocation21_spill] sm:$0xff] %v6667_v45  ;;  %1584 = vst.msk [vmem:[#allocation3 + $0x2] sm:$0x3] %vm1397_vm7, %v6667_v45 }
 0x852   :  { %2765 = vst.msk [vmem:[#allocation2] sm:$0x3] %vm1397_vm7, %v6667_v45  ;;  %v7078_v45 = vld [vmem:[%s8685_s13 + $0x144] ss:$48 sps:$4 sm:$0xff]  }
 0x853   :  { %1692 = vrot.lane.b32.xlu1 %v6636_v21, %s5970_s26  ;;  %v7042_v21 = vld [vmem:[%s8685_s13 + $0x200] ss:$48 sps:$4 sm:$0xff]   ;;  %8865 = vst [vmem:[#allocation51_spill] sm:$0xff] %v7078_v45 }
 0x854   :  { %v1778_v50 = vpop.permute.xlu0 %1777  ;;  %8859 = vst [vmem:[#allocation45_spill] sm:$0xff] %v7042_v21 }
 0x855   :  { %1780 = vst.msk [vmem:[#allocation3 + $0x2] sm:$0x3] %vm1775_vm11, %v1778_v50  ;;  %v6827_v50 = vld [vmem:[%s8685_s13 + $0x258] ss:$48 sps:$4 sm:$0xff]  }
 0x859   :  { %v6730_v6 = vld [vmem:[#allocation2] sm:$0x3] }
 0x8c1   :  { %v1773_v3 = vpop.permute.xlu1 %1772 }
 0x8c2   :  { %1776 = vst.msk [vmem:[#allocation3] sm:$0x3] %vm1775_vm11, %v1773_v3  ;;  %v6851_v3 = vld [vmem:[%s8685_s13 + $0x1f8] ss:$48 sps:$4 sm:$0xff]  }
 0x8c5   :  { %v6728_v4 = vpop.permute.xlu1 %1692 }
 0x8c6   :  { %8836 = vst [vmem:[#allocation22_spill] sm:$0xff] %v6728_v4  ;;  %2952 = vst.msk [vmem:[#allocation2] sm:$0x3] %vm1397_vm7, %v6728_v4  ;;  %v7047_v4 = vld [vmem:[%s8685_s13 + $0x208] ss:$48 sps:$4 sm:$0xff]  }
 0x8c7   :  { %8860 = vst [vmem:[#allocation46_spill] sm:$0xff] %v7047_v4 }
 0x8c9   :  { %v1781_v7 = vld [vmem:[#allocation3] sm:$0xf] }
 0x8ca   :  { %v1782_v9 = vpack.c.bf16 %v1781_v7, %v1781_v7  ;;  %v6858_v7 = vld [vmem:[%s8685_s13 + $0x194] ss:$48 sps:$4 sm:$0xff]  }
 0x8cc   :  { %5178 = vmatmul.mubr.msk.bf16.vlgmr.msra.gmra.mxu0 %vm1795_vm12, %v1782_v9  ;;  %v6870_v9 = vld [vmem:[%s8685_s13 + $0x190] ss:$48 sps:$4 sm:$0xff]  }
 0x8cd   :  { %2363 = vmatpush1.bf16.msra.mxu0 %v5515_v8  ;;  %2394 = vmatprep.mubr.bf16.mxu0 %v8693_v31  ;;  %v6863_v8 = vld [vmem:[%s8685_s13 + $0x19c] ss:$48 sps:$4 sm:$0xff]  }
 0x8ce   :  { %2364 = vmatprep.subr.bf16.mxu0 %v5523_v10  ;;  %v6875_v10 = vld [vmem:[%s8685_s13 + $0x198] ss:$48 sps:$4 sm:$0xff]  }
 0x8d1   :  { %2365 = vmatpush1.bf16.msra.mxu0 %v5521_v11  ;;  %v6882_v11 = vld [vmem:[%s8685_s13 + $0x134] ss:$48 sps:$4 sm:$0xff]  }
 0x8d2   :  { %2366 = vmatprep.subr.bf16.mxu0 %v5529_v12  ;;  %v6887_v12 = vld [vmem:[%s8685_s13 + $0x13c] ss:$48 sps:$4 sm:$0xff]  }
 0x8d5   :  { %2367 = vmatpush1.bf16.msra.mxu0 %v5527_v13  ;;  %v6894_v13 = vld [vmem:[%s8685_s13 + $0x130] ss:$48 sps:$4 sm:$0xff]  }
 0x8d6   :  { %2368 = vmatprep.subr.bf16.mxu0 %v5535_v15  ;;  %v6899_v15 = vld [vmem:[%s8685_s13 + $0x138] ss:$48 sps:$4 sm:$0xff]  }
 0x8d9   :  { %2369 = vmatpush1.bf16.msra.mxu0 %v5533_v16  ;;  %v6906_v16 = vld [vmem:[%s8685_s13 + $0xd4] ss:$48 sps:$4 sm:$0xff]  }
 0x8da   :  { %2370 = vmatprep.subr.bf16.mxu0 %v5541_v17  ;;  %8837 = vst [vmem:[#allocation23_spill] sm:$0xff] %v6906_v16  ;;  %v6911_v17 = vld [vmem:[%s8685_s13 + $0xdc] ss:$48 sps:$4 sm:$0xff]  }
 0x8db   :  { %8838 = vst [vmem:[#allocation24_spill] sm:$0xff] %v6911_v17 }
 0x8dd   :  { %2371 = vmatpush1.bf16.msra.mxu0 %v5539_v18  ;;  %v6918_v18 = vld [vmem:[%s8685_s13 + $0xd0] ss:$48 sps:$4 sm:$0xff]  }
 0x8de   :  { %2372 = vmatprep.subr.bf16.mxu0 %v5547_v19  ;;  %8839 = vst [vmem:[#allocation25_spill] sm:$0xff] %v6918_v18  ;;  %v6923_v19 = vld [vmem:[%s8685_s13 + $0xd8] ss:$48 sps:$4 sm:$0xff]  }
 0x8df   :  { %8840 = vst [vmem:[#allocation26_spill] sm:$0xff] %v6923_v19 }
 0x8e1   :  { %2373 = vmatpush1.bf16.msra.mxu0 %v5545_v20  ;;  %v6930_v20 = vld [vmem:[%s8685_s13 + $0x74] ss:$48 sps:$4 sm:$0xff]  }
 0x8e2   :  { %2374 = vmatprep.subr.bf16.mxu0 %v5553_v22  ;;  %8841 = vst [vmem:[#allocation27_spill] sm:$0xff] %v6930_v20  ;;  %v6935_v22 = vld [vmem:[%s8685_s13 + $0x7c] ss:$48 sps:$4 sm:$0xff]  }
 0x8e3   :  { %8842 = vst [vmem:[#allocation28_spill] sm:$0xff] %v6935_v22 }
 0x8e5   :  { %2375 = vmatpush1.bf16.msra.mxu0 %v5551_v24  ;;  %v6942_v24 = vld [vmem:[%s8685_s13 + $0x70] ss:$48 sps:$4 sm:$0xff]  }
 0x8e6   :  { %2376 = vmatprep.subr.bf16.mxu0 %v5559_v26  ;;  %8843 = vst [vmem:[#allocation29_spill] sm:$0xff] %v6942_v24  ;;  %v6947_v26 = vld [vmem:[%s8685_s13 + $0x78] ss:$48 sps:$4 sm:$0xff]  }
 0x8e7   :  { %8844 = vst [vmem:[#allocation30_spill] sm:$0xff] %v6947_v26 }
 0x8e9   :  { %2377 = vmatpush1.bf16.msra.mxu0 %v5557_v29  ;;  %v6954_v29 = vld [vmem:[%s8685_s13 + $0x14] ss:$48 sps:$4 sm:$0xff]  }
 0x8ea   :  { %2444 = vmatprep.subr.bf16.mxu0 %v5565_v14  ;;  %8845 = vst [vmem:[#allocation31_spill] sm:$0xff] %v6954_v29  ;;  %v6959_v14 = vld [vmem:[%s8685_s13 + $0x1c] ss:$48 sps:$4 sm:$0xff]  }
 0x8eb   :  { %8846 = vst [vmem:[#allocation32_spill] sm:$0xff] %v6959_v14 }
 0x98c   :  { %v1833_v34 = vpop.f32.mrf.mxu0 }
 0x98d   :  { %v1834_v35 = vadd.f32 %v4520_v32, %v1833_v34  ;;  %v6966_v32 = vld [vmem:[%s8685_s13 + $0x10] ss:$48 sps:$4 sm:$0xff]   ;;  %v6971_v34 = vld [vmem:[%s8685_s13 + $0x18] ss:$48 sps:$4 sm:$0xff]  }
 0x98e   :  { %v5179_v33 = vpop.f32.mrf.mxu0  ;;  %8847 = vst [vmem:[#allocation33_spill] sm:$0xff] %v6966_v32  ;;  %8848 = vst [vmem:[#allocation34_spill] sm:$0xff] %v6971_v34 }
 0x98f   :  { %v1839_v37 = vmax.f32 %v1834_v35, 0.0  ;;  %v6978_v35 = vld [vmem:[%s8685_s13 + $0x2c4] ss:$48 sps:$4 sm:$0xff]   ;;  %v6983_v33 = vld [vmem:[%s8685_s13 + $0x2cc] ss:$48 sps:$4 sm:$0xff]  }
 0x990   :  { %v1836_v38 = vpop.f32.mrf.mxu0  ;;  %8849 = vst [vmem:[#allocation35_spill] sm:$0xff] %v6978_v35  ;;  %8850 = vst [vmem:[#allocation36_spill] sm:$0xff] %v6983_v33 }
 0x991   :  { %v6809_v42 = vpack.c.bf16 %v1839_v37, %v1839_v37  ;;  %v6990_v37 = vld [vmem:[%s8685_s13 + $0x2c0] ss:$48 sps:$4 sm:$0xff]   ;;  %v6995_v38 = vld [vmem:[%s8685_s13 + $0x2c8] ss:$48 sps:$4 sm:$0xff]  }
 0x992   :  { %v5180_v46 = vpop.f32.mrf.mxu0  ;;  %8851 = vst [vmem:[#allocation37_spill] sm:$0xff] %v6990_v37  ;;  %8852 = vst [vmem:[#allocation38_spill] sm:$0xff] %v6995_v38 }
 0x993   :  { %2354 = vmatmul.mubr.bf16.vlgmr.msra.gmra.mxu1 %v6809_v42  ;;  %2395 = vmatmul.mubr.bf16.vlgmr.msra.gmra.mxu0 %v6809_v42  ;;  %v7028_v46 = vld [vmem:[%s8685_s13 + $0x204] ss:$48 sps:$4 sm:$0xff]  }
 0x994   :  { %2404 = vmatpush1.bf16.msra.mxu1 %v5560_v39  ;;  %2445 = vmatpush1.bf16.msra.mxu0 %v5563_v40  ;;  %v7002_v39 = vld [vmem:[%s8685_s13 + $0x264] ss:$48 sps:$4 sm:$0xff]   ;;  %v7007_v40 = vld [vmem:[%s8685_s13 + $0x26c] ss:$48 sps:$4 sm:$0xff]   ;;  %8857 = vst [vmem:[#allocation43_spill] sm:$0xff] %v7028_v46 }
 0x995   :  { %2405 = vmatprep.subr.bf16.mxu1 %v5568_v43  ;;  %2446 = vmatprep.subr.bf16.mxu0 %v5571_v44  ;;  %8853 = vst [vmem:[#allocation39_spill] sm:$0xff] %v7002_v39  ;;  %8854 = vst [vmem:[#allocation40_spill] sm:$0xff] %v7007_v40  ;;  %v7016_v43 = vld [vmem:[%s8685_s13 + $0x260] ss:$48 sps:$4 sm:$0xff]   ;;  %v7021_v44 = vld [vmem:[%s8685_s13 + $0x268] ss:$48 sps:$4 sm:$0xff]  }
 0x996   :  { %2435 = vmatprep.mubr.bf16.mxu1 %v8693_v31  ;;  %2476 = vmatprep.mubr.bf16.mxu0 %v8693_v31  ;;  %8855 = vst [vmem:[#allocation41_spill] sm:$0xff] %v7016_v43  ;;  %8856 = vst [vmem:[#allocation42_spill] sm:$0xff] %v7021_v44 }
 0x998   :  { %2406 = vmatpush1.bf16.msra.mxu1 %v6822_v49  ;;  %2447 = vmatpush1.bf16.msra.mxu0 %v6827_v50 }
 0x999   :  { %2407 = vmatprep.subr.bf16.mxu1 %v6832_v53  ;;  %2448 = vmatprep.subr.bf16.mxu0 %v6837_v54 }
 0x99c   :  { %2408 = vmatpush1.bf16.msra.mxu1 %v6846_v55  ;;  %2449 = vmatpush1.bf16.msra.mxu0 %v6851_v3 }
 0x99d   :  { %2409 = vmatprep.subr.bf16.mxu1 %v6858_v7  ;;  %2450 = vmatprep.subr.bf16.mxu0 %v6863_v8 }
 0x9a0   :  { %2410 = vmatpush1.bf16.msra.mxu1 %v6870_v9  ;;  %2451 = vmatpush1.bf16.msra.mxu0 %v6875_v10 }
 0x9a1   :  { %2411 = vmatprep.subr.bf16.mxu1 %v6882_v11  ;;  %2452 = vmatprep.subr.bf16.mxu0 %v6887_v12 }
 0x9a4   :  { %2412 = vmatpush1.bf16.msra.mxu1 %v6894_v13  ;;  %2453 = vmatpush1.bf16.msra.mxu0 %v6899_v15 }
 0x9a5   :  { %2413 = vmatprep.subr.bf16.mxu1 %v6906_v16  ;;  %2454 = vmatprep.subr.bf16.mxu0 %v6911_v17 }
 0x9a8   :  { %2414 = vmatpush1.bf16.msra.mxu1 %v6918_v18  ;;  %2455 = vmatpush1.bf16.msra.mxu0 %v6923_v19 }
 0x9a9   :  { %2415 = vmatprep.subr.bf16.mxu1 %v6930_v20  ;;  %2456 = vmatprep.subr.bf16.mxu0 %v6935_v22 }
 0x9ac   :  { %2416 = vmatpush1.bf16.msra.mxu1 %v6942_v24  ;;  %2457 = vmatpush1.bf16.msra.mxu0 %v6947_v26 }
 0x9ad   :  { %2417 = vmatprep.subr.bf16.mxu1 %v6954_v29  ;;  %2458 = vmatprep.subr.bf16.mxu0 %v6959_v14 }
 0x9b0   :  { %2418 = vmatpush1.bf16.msra.mxu1 %v6966_v32  ;;  %2459 = vmatpush1.bf16.msra.mxu0 %v6971_v34 }
 0x9b1   :  { %2485 = vmatprep.subr.bf16.mxu1 %v6978_v35  ;;  %2526 = vmatprep.subr.bf16.mxu0 %v6983_v33 }
 0x9b3   :  { %2436 = vmatmul.mubr.bf16.vlgmr.msra.gmra.mxu1 %v6809_v42  ;;  %2477 = vmatmul.mubr.bf16.vlgmr.msra.gmra.mxu0 %v6809_v42 }
 0x9b4   :  { %2486 = vmatpush1.bf16.msra.mxu1 %v6990_v37  ;;  %2527 = vmatpush1.bf16.msra.mxu0 %v6995_v38 }
 0x9b5   :  { %2487 = vmatprep.subr.bf16.mxu1 %v7002_v39  ;;  %2528 = vmatprep.subr.bf16.mxu0 %v7007_v40  ;;  %v7385_v39 = vld [vmem:[%s8672_s0 + $0x18] sm:$0xff] }
 0x9b6   :  { %2517 = vmatprep.mubr.bf16.mxu1 %v8693_v31  ;;  %2558 = vmatprep.mubr.bf16.mxu0 %v8693_v31  ;;  %v7054_v31 = vld [vmem:[%s8685_s13 + $0x1a4] ss:$48 sps:$4 sm:$0xff]  }
 0x9b7   :  { %8861 = vst [vmem:[#allocation47_spill] sm:$0xff] %v7054_v31 }
 0x9b8   :  { %2488 = vmatpush1.bf16.msra.mxu1 %v7016_v43  ;;  %2529 = vmatpush1.bf16.msra.mxu0 %v7021_v44  ;;  %v7377_v43 = vld [vmem:[%s8672_s0 + $0x8] sm:$0xff] }
 0x9b9   :  { %2489 = vmatprep.subr.bf16.mxu1 %v7028_v46  ;;  %2530 = vmatprep.subr.bf16.mxu0 %v7033_v61  ;;  %v7380_v40 = vrot.slane %v7377_v43, 2 }
 0x9bb   :  { %8908 = vst [vmem:[#allocation91_spill] sm:$0xff] %v7380_v40 }
 0x9bc   :  { %2490 = vmatpush1.bf16.msra.mxu1 %v7042_v21  ;;  %2531 = vmatpush1.bf16.msra.mxu0 %v7047_v4  ;;  %v7083_v4 = vld [vmem:[%s8685_s13 + $0x14c] ss:$48 sps:$4 sm:$0xff]  }
 0x9bd   :  { %2491 = vmatprep.subr.bf16.mxu1 %v7054_v31  ;;  %2532 = vmatprep.subr.bf16.mxu0 %v7059_v36  ;;  %8866 = vst [vmem:[#allocation52_spill] sm:$0xff] %v7083_v4  ;;  %v7090_v31 = vld [vmem:[%s8685_s13 + $0x140] ss:$48 sps:$4 sm:$0xff]   ;;  %v7095_v36 = vld [vmem:[%s8685_s13 + $0x148] ss:$48 sps:$4 sm:$0xff]  }
 0x9be   :  { %8867 = vst [vmem:[#allocation53_spill] sm:$0xff] %v7090_v31  ;;  %8868 = vst [vmem:[#allocation54_spill] sm:$0xff] %v7095_v36 }
 0x9c0   :  { %2492 = vmatpush1.bf16.msra.mxu1 %v7066_v5  ;;  %2533 = vmatpush1.bf16.msra.mxu0 %v7071_v47  ;;  %v7102_v5 = vld [vmem:[%s8685_s13 + $0xe4] ss:$48 sps:$4 sm:$0xff]   ;;  %v7107_v47 = vld [vmem:[%s8685_s13 + $0xec] ss:$48 sps:$4 sm:$0xff]  }
 0x9c1   :  { %2493 = vmatprep.subr.bf16.mxu1 %v7078_v45  ;;  %2534 = vmatprep.subr.bf16.mxu0 %v7083_v4  ;;  %8869 = vst [vmem:[#allocation55_spill] sm:$0xff] %v7102_v5  ;;  %8870 = vst [vmem:[#allocation56_spill] sm:$0xff] %v7107_v47  ;;  %v7114_v45 = vld [vmem:[%s8685_s13 + $0xe0] ss:$48 sps:$4 sm:$0xff]   ;;  %v7119_v4 = vld [vmem:[%s8685_s13 + $0xe8] ss:$48 sps:$4 sm:$0xff]  }
 0x9c2   :  { %8871 = vst [vmem:[#allocation57_spill] sm:$0xff] %v7114_v45  ;;  %8872 = vst [vmem:[#allocation58_spill] sm:$0xff] %v7119_v4 }
 0x9c4   :  { %2494 = vmatpush1.bf16.msra.mxu1 %v7090_v31  ;;  %2535 = vmatpush1.bf16.msra.mxu0 %v7095_v36  ;;  %v7126_v31 = vld [vmem:[%s8685_s13 + $0x84] ss:$48 sps:$4 sm:$0xff]   ;;  %v7131_v36 = vld [vmem:[%s8685_s13 + $0x8c] ss:$48 sps:$4 sm:$0xff]  }
 0x9c5   :  { %2495 = vmatprep.subr.bf16.mxu1 %v7102_v5  ;;  %2536 = vmatprep.subr.bf16.mxu0 %v7107_v47  ;;  %8873 = vst [vmem:[#allocation59_spill] sm:$0xff] %v7126_v31  ;;  %8874 = vst [vmem:[#allocation60_spill] sm:$0xff] %v7131_v36  ;;  %v7138_v5 = vld [vmem:[%s8685_s13 + $0x80] ss:$48 sps:$4 sm:$0xff]   ;;  %v7143_v47 = vld [vmem:[%s8685_s13 + $0x88] ss:$48 sps:$4 sm:$0xff]  }
 0x9c6   :  { %8875 = vst [vmem:[#allocation61_spill] sm:$0xff] %v7138_v5  ;;  %8876 = vst [vmem:[#allocation62_spill] sm:$0xff] %v7143_v47 }
 0x9c8   :  { %2496 = vmatpush1.bf16.msra.mxu1 %v7114_v45  ;;  %2537 = vmatpush1.bf16.msra.mxu0 %v7119_v4  ;;  %v7150_v45 = vld [vmem:[%s8685_s13 + $0x24] ss:$48 sps:$4 sm:$0xff]   ;;  %v7155_v4 = vld [vmem:[%s8685_s13 + $0x2c] ss:$48 sps:$4 sm:$0xff]  }
 0x9c9   :  { %2497 = vmatprep.subr.bf16.mxu1 %v7126_v31  ;;  %2538 = vmatprep.subr.bf16.mxu0 %v7131_v36  ;;  %8877 = vst [vmem:[#allocation63_spill] sm:$0xff] %v7150_v45  ;;  %8878 = vst [vmem:[#allocation64_spill] sm:$0xff] %v7155_v4  ;;  %v7162_v31 = vld [vmem:[%s8685_s13 + $0x20] ss:$48 sps:$4 sm:$0xff]   ;;  %v7167_v36 = vld [vmem:[%s8685_s13 + $0x28] ss:$48 sps:$4 sm:$0xff]  }
 0x9ca   :  { %8879 = vst [vmem:[#allocation65_spill] sm:$0xff] %v7162_v31  ;;  %8880 = vst [vmem:[#allocation66_spill] sm:$0xff] %v7167_v36 }
 0x9cc   :  { %2498 = vmatpush1.bf16.msra.mxu1 %v7138_v5  ;;  %2539 = vmatpush1.bf16.msra.mxu0 %v7143_v47  ;;  %v8881_v5 = vmov 0.0  }
 0x9cd   :  { %2499 = vmatprep.subr.bf16.mxu1 %v7150_v45  ;;  %2540 = vmatprep.subr.bf16.mxu0 %v7155_v4 }
 0x9d0   :  { %2500 = vmatpush1.bf16.msra.mxu1 %v7162_v31  ;;  %2541 = vmatpush1.bf16.msra.mxu0 %v7167_v36  ;;  %v7184_v31 = vld [vmem:[%s8681_s9 + $0x38] sm:$0xff]  }
 0x9d1   :  { %5181 = vmatprep.subr.bf16.mxu1 %v8881_v5  ;;  %5201 = vmatprep.subr.bf16.mxu0 %v8881_v5  ;;  %8882 = vst [vmem:[#allocation67_spill] sm:$0xff] %v7184_v31 }
 0x9d3   :  { %2518 = vmatmul.mubr.bf16.vlgmr.msra.gmra.mxu1 %v6809_v42  ;;  %2559 = vmatmul.mubr.bf16.vlgmr.msra.gmra.mxu0 %v6809_v42  ;;  %v7193_v42 = vld [vmem:[%s8679_s7 + $0x30] sm:$0xff]  }
 0x9d4   :  { %5182 = vmatpush3.bf16.msra.mxu1 %v6281_v27  ;;  %5197 = vmatprep.mubr.msk.bf16.mxu1 %vm5966_vm0, %v8881_v5  ;;  %8883 = vst [vmem:[#allocation68_spill] sm:$0xff] %v7193_v42  ;;  %v7200_v27 = vld [vmem:[%s8681_s9 + $0x30] sm:$0xff]  }
 0x9d5   :  { %5183 = vmatprep.subr.bf16.mxu1 %v8881_v5  ;;  %5202 = vmatpush3.bf16.msra.mxu0 %v7184_v31  ;;  %8884 = vst [vmem:[#allocation69_spill] sm:$0xff] %v7200_v27  ;;  %v7207_v31 = vld [vmem:[%s8679_s7 + $0x28] sm:$0xff]  }
 0x9d6   :  { %5203 = vmatprep.subr.bf16.mxu0 %v8881_v5  ;;  %5217 = vmatprep.mubr.msk.bf16.mxu0 %vm5966_vm0, %v8881_v5  ;;  %8885 = vst [vmem:[#allocation70_spill] sm:$0xff] %v7207_v31 }
 0x9d8   :  { %5184 = vmatpush3.bf16.msra.mxu1 %v7193_v42  ;;  %v7214_v42 = vld [vmem:[%s8681_s9 + $0x28] sm:$0xff]  }
 0x9d9   :  { %5185 = vmatprep.subr.bf16.mxu1 %v8881_v5  ;;  %5204 = vmatpush3.bf16.msra.mxu0 %v7200_v27  ;;  %8886 = vst [vmem:[#allocation71_spill] sm:$0xff] %v7214_v42  ;;  %v7221_v27 = vld [vmem:[%s8679_s7 + $0x20] sm:$0xff]  }
 0x9da   :  { %5205 = vmatprep.subr.bf16.mxu0 %v8881_v5  ;;  %8887 = vst [vmem:[#allocation72_spill] sm:$0xff] %v7221_v27 }
 0x9dc   :  { %5186 = vmatpush3.bf16.msra.mxu1 %v7207_v31  ;;  %v7228_v31 = vld [vmem:[%s8681_s9 + $0x20] sm:$0xff]  }
 0x9dd   :  { %5187 = vmatprep.subr.bf16.mxu1 %v8881_v5  ;;  %5206 = vmatpush3.bf16.msra.mxu0 %v7214_v42  ;;  %8888 = vst [vmem:[#allocation73_spill] sm:$0xff] %v7228_v31  ;;  %v7235_v42 = vld [vmem:[%s8679_s7 + $0x18] sm:$0xff]  }
 0x9de   :  { %5207 = vmatprep.subr.bf16.mxu0 %v8881_v5  ;;  %8889 = vst [vmem:[#allocation74_spill] sm:$0xff] %v7235_v42 }
 0x9e0   :  { %5188 = vmatpush3.bf16.msra.mxu1 %v7221_v27  ;;  %v7242_v27 = vld [vmem:[%s8681_s9 + $0x18] sm:$0xff]  }
 0x9e1   :  { %5189 = vmatprep.subr.bf16.mxu1 %v8881_v5  ;;  %5208 = vmatpush3.bf16.msra.mxu0 %v7228_v31  ;;  %8890 = vst [vmem:[#allocation75_spill] sm:$0xff] %v7242_v27  ;;  %v7249_v31 = vld [vmem:[%s8679_s7 + $0x10] sm:$0xff]  }
 0x9e2   :  { %5209 = vmatprep.subr.bf16.mxu0 %v8881_v5  ;;  %8891 = vst [vmem:[#allocation76_spill] sm:$0xff] %v7249_v31 }
 0x9e4   :  { %5190 = vmatpush3.bf16.msra.mxu1 %v7235_v42  ;;  %v7256_v42 = vld [vmem:[%s8681_s9 + $0x10] sm:$0xff]  }
 0x9e5   :  { %5191 = vmatprep.subr.bf16.mxu1 %v8881_v5  ;;  %5210 = vmatpush3.bf16.msra.mxu0 %v7242_v27  ;;  %8892 = vst [vmem:[#allocation77_spill] sm:$0xff] %v7256_v42  ;;  %v7263_v27 = vld [vmem:[%s8679_s7 + $0x8] sm:$0xff]  }
 0x9e6   :  { %5211 = vmatprep.subr.bf16.mxu0 %v8881_v5  ;;  %8893 = vst [vmem:[#allocation78_spill] sm:$0xff] %v7263_v27 }
 0x9e8   :  { %5192 = vmatpush3.bf16.msra.mxu1 %v7249_v31  ;;  %v7270_v31 = vld [vmem:[%s8681_s9 + $0x8] sm:$0xff]  }
 0x9e9   :  { %5193 = vmatprep.subr.bf16.mxu1 %v8881_v5  ;;  %5212 = vmatpush3.bf16.msra.mxu0 %v7256_v42  ;;  %8894 = vst [vmem:[#allocation79_spill] sm:$0xff] %v7270_v31  ;;  %v7277_v42 = vld [vmem:[%s8679_s7] sm:$0xff]  }
 0x9ea   :  { %5213 = vmatprep.subr.bf16.mxu0 %v8881_v5  ;;  %8895 = vst [vmem:[#allocation80_spill] sm:$0xff] %v7277_v42 }
 0x9ec   :  { %5194 = vmatpush3.bf16.msra.mxu1 %v7263_v27  ;;  %v2767_v27 = vpack.c.bf16 %v6730_v6, %v6730_v6  ;;  %v7314_v6 = vld [vmem:[%s8679_s7 + $0x54] sm:$0xff]  }
 0x9ed   :  { %5195 = vmatprep.subr.bf16.mxu1 %v8881_v5  ;;  %5214 = vmatpush3.bf16.msra.mxu0 %v7270_v31  ;;  %8899 = vst [vmem:[#allocation84_spill] sm:$0xff] %v7314_v6 }
 0x9ee   :  { %5215 = vmatprep.subr.bf16.mxu0 %v8881_v5 }
 0x9f0   :  { %5196 = vmatpush3.bf16.msra.mxu1 %v7277_v42  ;;  %v7293_v42 = vld [vmem:[%s8679_s7 + $0x6c] sm:$0xff]  }
 0x9f1   :  { %5216 = vmatpush3.bf16.msra.mxu0 %v6474_v60  ;;  %5221 = vmatprep.subr.bf16.mxu1 %v8881_v5  ;;  %8896 = vst [vmem:[#allocation81_spill] sm:$0xff] %v7293_v42  ;;  %v7307_v60 = vld [vmem:[%s8679_s7 + $0x5c] sm:$0xff]  }
 0x9f2   :  { %5241 = vmatprep.subr.bf16.mxu0 %v8881_v5  ;;  %8898 = vst [vmem:[#allocation83_spill] sm:$0xff] %v7307_v60 }
 0x9f3   :  { %5198 = vmatmul.mubr.msk.bf16.vlgmr.msra.gmra.mxu1 %vm1073_vm5, %v2767_v27  ;;  %v7300_v27 = vld [vmem:[%s8679_s7 + $0x64] sm:$0xff]  }
 0x9f4   :  { %5222 = vmatpush3.bf16.msra.mxu1 %v6396_v52  ;;  %5237 = vmatprep.mubr.msk.bf16.mxu1 %vm5966_vm0, %v8881_v5  ;;  %8897 = vst [vmem:[#allocation82_spill] sm:$0xff] %v7300_v27 }
 0x9f5   :  { %5223 = vmatprep.subr.bf16.mxu1 %v8881_v5 }
 0x9f8   :  { %5224 = vmatpush3.bf16.msra.mxu1 %v7293_v42 }
 0x9f9   :  { %5225 = vmatprep.subr.bf16.mxu1 %v8881_v5 }
 0x9fc   :  { %5226 = vmatpush3.bf16.msra.mxu1 %v7300_v27 }
 0x9fd   :  { %5227 = vmatprep.subr.bf16.mxu1 %v8881_v5 }
 0xa00   :  { %5228 = vmatpush3.bf16.msra.mxu1 %v7307_v60  ;;  %v8739_v60 = vrot.slane %v6616_v51, 2 }
 0xa01   :  { %5229 = vmatprep.subr.bf16.mxu1 %v8881_v5 }
 0xa02   :  { %2941 = vrot.lane.b32.xlu1 %v8739_v60, %s5958_s23  ;;  %v7349_v60 = vld [vmem:[%s8672_s0] sm:$0xff] }
 0xa03   :  { %8902 = vst [vmem:[#allocation87_spill] sm:$0xff] %v7349_v60  ;;  %v7352_v36 = vrot.slane %v7349_v60, 2 }
 0xa04   :  { %5230 = vmatpush3.bf16.msra.mxu1 %v7314_v6  ;;  %v352_v6 = vlaneseq }
 0xa05   :  { %5231 = vmatprep.subr.bf16.mxu1 %v8881_v5  ;;  %8903 = vst [vmem:[#allocation88_spill] sm:$0xff] %v7352_v36 }
 0xa06   :  { %v7328_v27 = vshrl.u32 %v352_v6, 7 }
 0xa08   :  { %5232 = vmatpush3.bf16.msra.mxu1 %v6433_v57  ;;  %v8741_v57 = vsub.s32 0, %v7328_v27  ;;  %v8743_v42 = vsub.s32 2, %v7328_v27  ;;  %v8906_v47 = vsub.s32 3, %v7328_v27 }
 0xa09   :  { %5233 = vmatprep.subr.bf16.mxu1 %v8881_v5 }
 0xa0c   :  { %5234 = vmatpush3.bf16.msra.mxu1 %v6440_v58  ;;  %v7332_v58 = vld [vmem:[#allocation11] sm:$0xff] }
 0xa0d   :  { %5235 = vmatprep.subr.bf16.mxu1 %v8881_v5  ;;  %v7339_v31 = vrot.slane %v7332_v58, %v8741_v57  ;;  %v7344_v6 = vrot.slane %v7332_v58, %v8743_v42  ;;  %v8904_v42 = vsub.s32 1, %v7328_v27  ;;  %v7370_v21 = vrot.slane %v7332_v58, %v8906_v47 }
 0xa0e   :  { %v7388_v47 = vrot.slane %v7385_v39, 2 }
 0xa0f   :  { %8900 = vst [vmem:[#allocation85_spill] sm:$0xff] %v7339_v31  ;;  %8901 = vst [vmem:[#allocation86_spill] sm:$0xff] %v7344_v6  ;;  %v7365_v45 = vrot.slane %v7332_v58, %v8904_v42 }
 0xa10   :  { %5236 = vmatpush3.bf16.msra.mxu1 %v6447_v59  ;;  %v7357_v59 = vld [vmem:[%s8672_s0 + $0x10] sm:$0xff]  ;;  %8907 = vst [vmem:[#allocation90_spill] sm:$0xff] %v7370_v21 }
 0xa11   :  { %5261 = vmatprep.subr.bf16.mxu1 %v8881_v5  ;;  %v7360_v57 = vrot.slane %v7357_v59, 2  ;;  %8905 = vst [vmem:[#allocation89_spill] sm:$0xff] %v7365_v45 }
 0xa53   :  { %v2355_v52 = vpop.f32.mrf.mxu1  ;;  %v2396_v4 = vpop.f32.mrf.mxu0 }
 0xa54   :  { %v2356_v61 = vadd.f32 %v2355_v52, %v7339_v31  ;;  %v2397_v46 = vadd.f32 %v2396_v4, %v7344_v6 }
 0xa55   :  { %v2357_v44 = vpop.f32.mrf.mxu1  ;;  %v2398_v42 = vpop.f32.mrf.mxu0 }
 0xa56   :  { %v2585_v52 = vsub.f32 %v2356_v61, %v7352_v36  ;;  %v2591_v4 = vsub.f32 %v2356_v61, %v7349_v60  ;;  %v2587_v6 = vsub.f32 %v2397_v46, %v7360_v57  ;;  %v2593_v31 = vsub.f32 %v2397_v46, %v7357_v59 }
 0xa57   :  { %v2358_v38 = vadd.f32 %v2357_v44, %v7365_v45  ;;  %v2399_v37 = vadd.f32 %v2398_v42, %v7370_v21  ;;  %v2359_v33 = vpop.f32.mrf.mxu1  ;;  %v2400_v35 = vpop.f32.mrf.mxu0 }
 0xa58   :  { %v2597_v34 = vmul.f32 %v2585_v52, %v2585_v52  ;;  %v2626_v32 = vmul.f32 %v2591_v4, %v2591_v4  ;;  %v2628_v14 = vmul.f32 %v2593_v31, %v2593_v31  ;;  %v2599_v46 = vmul.f32 %v2587_v6, %v2587_v6 }
 0xa59   :  { %v2586_v29 = vsub.f32 %v2358_v38, %v7380_v40  ;;  %v2592_v26 = vsub.f32 %v2358_v38, %v7377_v43  ;;  %v2588_v24 = vsub.f32 %v2399_v37, %v7388_v47  ;;  %v2594_v61 = vsub.f32 %v2399_v37, %v7385_v39  ;;  %v2360_v22 = vpop.f32.mrf.mxu1  ;;  %v2401_v20 = vpop.f32.mrf.mxu0 }
 0xa5a   :  { %v2638_v19 = vrot.slane %v2626_v32, 2  ;;  %v2603_v35 = vsel %vm1077_vm1, %v2597_v34, 0.0  ;;  %v2640_v33 = vrot.slane %v2628_v14, 2  ;;  %v2606_v18 = vsel %vm1077_vm1, %v2599_v46, 0.0 }
 0xa5b   :  { %v2598_v44 = vmul.f32 %v2586_v29, %v2586_v29  ;;  %v2627_v45 = vmul.f32 %v2592_v26, %v2592_v26  ;;  %v2629_v42 = vmul.f32 %v2594_v61, %v2594_v61  ;;  %v2600_v4 = vmul.f32 %v2588_v24, %v2588_v24 }
 0xa5c   :  { %v2650_v38 = vsel %vm1077_vm1, %v2638_v19, 0.0  ;;  %v2653_v26 = vsel %vm1077_vm1, %v2640_v33, 0.0  ;;  %v370_v24 = vsub.s32 4, %v7328_v27  ;;  %v378_v19 = vsub.s32 6, %v7328_v27 }
 0xa5d   :  { %v2604_v31 = vsel %vm1077_vm1, %v2598_v44, 0.0  ;;  %v2639_v52 = vrot.slane %v2627_v45, 2  ;;  %v2641_v20 = vrot.slane %v2629_v42, 2  ;;  %v2608_v29 = vsel %vm1077_vm1, %v2600_v4, 0.0 }
 0xa5e   :  { %v2605_v21 = vadd.f32 %v2604_v31, %v2603_v35  ;;  %v374_v61 = vsub.s32 5, %v7328_v27  ;;  %v382_v46 = vsub.s32 7, %v7328_v27  ;;  %v7413_v44 = vrot.slane %v7332_v58, %v370_v24 }
 0xa5f   :  { %v2651_v22 = vsel %vm1077_vm1, %v2639_v52, 0.0  ;;  %v2655_v6 = vsel %vm1077_vm1, %v2641_v20, 0.0  ;;  %v7437_v20 = vld [vmem:[%s8672_s0 + $0x28] sm:$0xff] }
 0xa60   :  { %v2652_v37 = vadd.f32 %v2651_v22, %v2650_v38  ;;  %v2607_v32 = vadd.f32 %v2606_v18, %v2605_v21  ;;  %8909 = vst [vmem:[#allocation92_spill] sm:$0xff] %v7413_v44  ;;  %v7416_v21 = vrot.slane %v7332_v58, %v378_v19  ;;  %v7421_v18 = vld [vmem:[%s8672_s0 + $0x20] sm:$0xff]  ;;  %v7427_v31 = vrot.slane %v7332_v58, %v374_v61 }
 0xa61   :  { %v7424_v42 = vrot.slane %v7421_v18, 2  ;;  %v7430_v52 = vrot.slane %v7332_v58, %v382_v46 }
 0xa62   :  { %v2609_v34 = vadd.f32 %v2608_v29, %v2607_v32  ;;  %v2654_v14 = vadd.f32 %v2653_v26, %v2652_v37  ;;  %8910 = vst [vmem:[#allocation93_spill] sm:$0xff] %v7416_v21  ;;  %8911 = vst [vmem:[#allocation94_spill] sm:$0xff] %v7427_v31  ;;  %v7440_v37 = vrot.slane %v7437_v20, 2 }
 0xa63   :  { %8912 = vst [vmem:[#allocation95_spill] sm:$0xff] %v7430_v52 }
 0xa64   :  { %v2656_v45 = vadd.f32 %v2655_v6, %v2654_v14 }
 0xa73   :  { %v2437_v35 = vpop.f32.mrf.mxu1  ;;  %v2478_v33 = vpop.f32.mrf.mxu0 }
 0xa74   :  { %v2438_v4 = vadd.f32 %v2437_v35, %v7413_v44  ;;  %v2479_v38 = vadd.f32 %v2478_v33, %v7416_v21 }
 0xa75   :  { %v2439_v22 = vpop.f32.mrf.mxu1  ;;  %v2480_v32 = vpop.f32.mrf.mxu0 }
 0xa76   :  { %v2589_v26 = vsub.f32 %v2438_v4, %v7424_v42  ;;  %v2595_v29 = vsub.f32 %v2438_v4, %v7421_v18  ;;  %v2673_v58 = vsub.f32 %v2479_v38, %v7352_v36  ;;  %v2679_v14 = vsub.f32 %v2479_v38, %v7349_v60 }
 0xa77   :  { %v2440_v6 = vadd.f32 %v2439_v22, %v7427_v31  ;;  %v2481_v24 = vadd.f32 %v2480_v32, %v7430_v52  ;;  %v2441_v19 = vpop.f32.mrf.mxu1  ;;  %v2482_v61 = vpop.f32.mrf.mxu0 }
 0xa78   :  { %v2601_v46 = vmul.f32 %v2589_v26, %v2589_v26  ;;  %v2630_v35 = vmul.f32 %v2595_v29, %v2595_v29  ;;  %v2685_v33 = vmul.f32 %v2673_v58, %v2673_v58  ;;  %v2714_v21 = vmul.f32 %v2679_v14, %v2679_v14 }
 0xa79   :  { %v2590_v44 = vsub.f32 %v2440_v6, %v7440_v37  ;;  %v2596_v17 = vsub.f32 %v2440_v6, %v7437_v20  ;;  %v2674_v4 = vsub.f32 %v2481_v24, %v7380_v40  ;;  %v2680_v36 = vsub.f32 %v2481_v24, %v7377_v43  ;;  %v2442_v16 = vpop.f32.mrf.mxu1  ;;  %v2483_v38 = vpop.f32.mrf.mxu0 }
 0xa7a   :  { %v2642_v60 = vrot.slane %v2630_v35, 2  ;;  %v2726_v22 = vrot.slane %v2714_v21, 2  ;;  %v2610_v32 = vsel %vm1077_vm1, %v2601_v46, 0.0  ;;  %v2691_v58 = vsel %vm1077_vm1, %v2685_v33, 0.0 }
 0xa7b   :  { %v2602_v19 = vmul.f32 %v2590_v44, %v2590_v44  ;;  %v2631_v61 = vmul.f32 %v2596_v17, %v2596_v17  ;;  %v2686_v26 = vmul.f32 %v2674_v4, %v2674_v4  ;;  %v2715_v29 = vmul.f32 %v2680_v36, %v2680_v36 }
 0xa7c   :  { %v2611_v14 = vadd.f32 %v2610_v32, %v2609_v34  ;;  %v2657_v52 = vsel %vm1077_vm1, %v2642_v60, 0.0  ;;  %v2738_v44 = vsel %vm1077_vm1, %v2726_v22, 0.0  ;;  %v349_v60 = vld [vmem:[#allocation11 + $0x8] sm:$0xf]  ;;  %v8915_v33 = vsub.s32 0, %v7328_v27 }
 0xa7d   :  { %v2643_v6 = vrot.slane %v2631_v61, 2  ;;  %v2692_v31 = vsel %vm1077_vm1, %v2686_v26, 0.0  ;;  %v2727_v40 = vrot.slane %v2715_v29, 2  ;;  %v2612_v16 = vsel %vm1077_vm1, %v2602_v19, 0.0 }
 0xa7e   :  { %v2693_v24 = vadd.f32 %v2692_v31, %v2691_v58  ;;  %v7457_v35 = vadd.f32 %v2612_v16, %v2611_v14  ;;  %v2658_v21 = vadd.f32 %v2657_v52, %v2656_v45  ;;  %v7466_v4 = vrot.slane %v349_v60, %v8915_v33 }
 0xa7f   :  { %v2739_v17 = vsel %vm1077_vm1, %v2727_v40, 0.0  ;;  %v2659_v36 = vsel %vm1077_vm1, %v2643_v6, 0.0  ;;  %v8917_v38 = vsub.s32 2, %v7328_v27  ;;  %v8919_v52 = vsub.s32 1, %v7328_v27 }
 0xa80   :  { %8913 = vst [vmem:[#allocation96_spill] sm:$0xff] %v7457_v35  ;;  %v2740_v46 = vadd.f32 %v2739_v17, %v2738_v44  ;;  %v7462_v34 = vadd.f32 %v2659_v36, %v2658_v21  ;;  %8916 = vst [vmem:[#allocation98_spill] sm:$0xff] %v7466_v4  ;;  %v8921_v40 = vsub.s32 3, %v7328_v27 }
 0xa81   :  { %v7470_v31 = vrot.slane %v349_v60, %v8917_v38  ;;  %v7474_v22 = vrot.slane %v349_v60, %v8919_v52 }
 0xa82   :  { %8914 = vst [vmem:[#allocation97_spill] sm:$0xff] %v7462_v34  ;;  %v7478_v19 = vrot.slane %v349_v60, %v8921_v40 }
 0xa83   :  { %8918 = vst [vmem:[#allocation99_spill] sm:$0xff] %v7470_v31  ;;  %8920 = vst [vmem:[#allocation100_spill] sm:$0xff] %v7474_v22 }
 0xa84   :  { %8922 = vst [vmem:[#allocation101_spill] sm:$0xff] %v7478_v19 }
 0xa93   :  { %v2519_v32 = vpop.f32.mrf.mxu1  ;;  %v2560_v45 = vpop.f32.mrf.mxu0 }
 0xa94   :  { %v2520_v61 = vadd.f32 %v2519_v32, %v7466_v4  ;;  %v2561_v26 = vadd.f32 %v2560_v45, %v7470_v31 }
 0xa95   :  { %v2521_v29 = vpop.f32.mrf.mxu1  ;;  %v2562_v58 = vpop.f32.mrf.mxu0 }
 0xa96   :  { %v2675_v14 = vsub.f32 %v2520_v61, %v7360_v57  ;;  %v2681_v6 = vsub.f32 %v2520_v61, %v7357_v59  ;;  %v2683_v16 = vsub.f32 %v2561_v26, %v7421_v18  ;;  %v2677_v21 = vsub.f32 %v2561_v26, %v7424_v42 }
 0xa97   :  { %v2522_v44 = vadd.f32 %v2521_v29, %v7474_v22  ;;  %v2563_v27 = vadd.f32 %v2562_v58, %v7478_v19  ;;  %v2523_v17 = vpop.f32.mrf.mxu1  ;;  %v2564_v36 = vpop.f32.mrf.mxu0 }
 0xa98   :  { %v2687_v60 = vmul.f32 %v2675_v14, %v2675_v14  ;;  %v2716_v33 = vmul.f32 %v2681_v6, %v2681_v6  ;;  %v2718_v38 = vmul.f32 %v2683_v16, %v2683_v16  ;;  %v2689_v58 = vmul.f32 %v2677_v21, %v2677_v21 }
 0xa99   :  { %v2676_v32 = vsub.f32 %v2522_v44, %v7388_v47  ;;  %v2682_v45 = vsub.f32 %v2522_v44, %v7385_v39  ;;  %v2678_v52 = vsub.f32 %v2563_v27, %v7440_v37  ;;  %v2684_v40 = vsub.f32 %v2563_v27, %v7437_v20  ;;  %v2524_v61 = vpop.f32.mrf.mxu1  ;;  %v2565_v34 = vpop.f32.mrf.mxu0 }
 0xa9a   :  { %v2694_v26 = vsel %vm1077_vm1, %v2687_v60, 0.0  ;;  %v2728_v29 = vrot.slane %v2716_v33, 2  ;;  %v2730_v6 = vrot.slane %v2718_v38, 2  ;;  %v2698_v60 = vsel %vm1077_vm1, %v2689_v58, 0.0  ;;  %v7519_v58 = vld [vmem:[%s8681_s9 + $0x70] sm:$0xff]  }
 0xa9b   :  { %v2695_v35 = vadd.f32 %v2694_v26, %v2693_v24  ;;  %v2688_v17 = vmul.f32 %v2676_v32, %v2676_v32  ;;  %v2717_v36 = vmul.f32 %v2682_v45, %v2682_v45  ;;  %v2719_v16 = vmul.f32 %v2684_v40, %v2684_v40 }
 0xa9c   :  { %v2741_v14 = vsel %vm1077_vm1, %v2728_v29, 0.0  ;;  %v2690_v31 = vmul.f32 %v2678_v52, %v2678_v52  ;;  %v2745_v32 = vsel %vm1077_vm1, %v2730_v6, 0.0  ;;  %v7547_v6 = vld [vmem:[%s8681_s9 + $0x50] sm:$0xff]  }
 0xa9d   :  { %v2742_v19 = vadd.f32 %v2741_v14, %v2740_v46  ;;  %v2696_v44 = vsel %vm1077_vm1, %v2688_v17, 0.0  ;;  %v2729_v22 = vrot.slane %v2717_v36, 2  ;;  %v2731_v34 = vrot.slane %v2719_v16, 2  ;;  %v7526_v17 = vld [vmem:[%s8681_s9 + $0x68] sm:$0xff]   ;;  %v7533_v36 = vld [vmem:[%s8681_s9 + $0x60] sm:$0xff]   ;;  %v7540_v14 = vld [vmem:[%s8681_s9 + $0x58] sm:$0xff]  }
 0xa9e   :  { %v2697_v4 = vadd.f32 %v2696_v44, %v2695_v35  ;;  %v2700_v21 = vsel %vm1077_vm1, %v2690_v31, 0.0  ;;  %v7504_v35 = vld [vmem:[#allocation4] ss:$0 sm:$0xff]  ;;  %v7510_v31 = vld [vmem:[%s8681_s9 + $0x78] sm:$0xff]   ;;  %v7554_v16 = vld [vmem:[%s8681_s9 + $0x48] sm:$0xff]  }
 0xa9f   :  { %v2743_v27 = vsel %vm1077_vm1, %v2729_v22, 0.0  ;;  %v2747_v46 = vsel %vm1077_vm1, %v2731_v34, 0.0  ;;  %v7561_v44 = vld [vmem:[%s8681_s9 + $0x40] sm:$0xff]   ;;  %v7565_v34 = vld [vmem:[#allocation6] ss:$0 sm:$0xff] }
 0xaa0   :  { %v2699_v33 = vadd.f32 %v2698_v60, %v2697_v4  ;;  %v2744_v24 = vadd.f32 %v2743_v27, %v2742_v19 }
 0xaa2   :  { %v7499_v45 = vadd.f32 %v2700_v21, %v2699_v33  ;;  %v2746_v38 = vadd.f32 %v2745_v32, %v2744_v24 }
 0xaa4   :  { %8923 = vst [vmem:[#allocation102_spill] sm:$0xff] %v7499_v45  ;;  %v7502_v40 = vadd.f32 %v2747_v46, %v2746_v38 }
 0xaa6   :  { %8924 = vst [vmem:[#allocation103_spill] sm:$0xff] %v7502_v40 }
 0xab3   :  { %v2805_v52 = vpop.f32.mrf.mxu1 }
 0xab4   :  { %v2806_v22 = vadd.f32 %v7504_v35, %v2805_v52 }
 0xab5   :  { %v5199_v61 = vpop.f32.mrf.mxu1 }
 0xab6   :  { %v2811_v26 = vmax.f32 %v2806_v22, 0.0 }
 0xab7   :  { %v2808_v4 = vpop.f32.mrf.mxu1 }
 0xab8   :  { %v2812_v19 = vpack.c.bf16 %v2811_v26, %v2811_v26 }
 0xab9   :  { %v5200_v29 = vpop.f32.mrf.mxu1 }
 0xaba   :  { %5218 = vmatmul.mubr.bf16.vlgmr.msra.gmra.mxu0 %v2812_v19  ;;  %v2942_v19 = vpop.permute.xlu1 %2941 }
 0xabb   :  { %5242 = vmatpush3.bf16.msra.mxu0 %v7510_v31  ;;  %5257 = vmatprep.mubr.msk.bf16.mxu0 %vm5966_vm0, %v8881_v5 }
 0xabc   :  { %5243 = vmatprep.subr.bf16.mxu0 %v8881_v5 }
 0xabf   :  { %5244 = vmatpush3.bf16.msra.mxu0 %v7519_v58 }
 0xac0   :  { %5245 = vmatprep.subr.bf16.mxu0 %v8881_v5 }
 0xac3   :  { %5246 = vmatpush3.bf16.msra.mxu0 %v7526_v17 }
 0xac4   :  { %5247 = vmatprep.subr.bf16.mxu0 %v8881_v5 }
 0xac7   :  { %5248 = vmatpush3.bf16.msra.mxu0 %v7533_v36 }
 0xac8   :  { %5249 = vmatprep.subr.bf16.mxu0 %v8881_v5 }
 0xacb   :  { %5250 = vmatpush3.bf16.msra.mxu0 %v7540_v14 }
 0xacc   :  { %5251 = vmatprep.subr.bf16.mxu0 %v8881_v5 }
 0xacf   :  { %5252 = vmatpush3.bf16.msra.mxu0 %v7547_v6 }
 0xad0   :  { %5253 = vmatprep.subr.bf16.mxu0 %v8881_v5 }
 0xad3   :  { %5254 = vmatpush3.bf16.msra.mxu0 %v7554_v16 }
 0xad4   :  { %5255 = vmatprep.subr.bf16.mxu0 %v8881_v5 }
 0xad7   :  { %5256 = vmatpush3.bf16.msra.mxu0 %v7561_v44 }
 0xad8   :  { %3194 = vmatprep.subr.bf16.mxu0 %v6656_v41 }
 0xb7a   :  { %v2847_v27 = vpop.f32.mrf.mxu0 }
 0xb7b   :  { %v7568_v60 = vadd.f32 %v7565_v34, %v2847_v27 }
 0xb7c   :  { %v5219_v33 = vpop.f32.mrf.mxu0 }
 0xb7d   :  { %8925 = vst [vmem:[#allocation104_spill] sm:$0xff] %v7568_v60  ;;  %2953 = vrot.lane.b32.xlu0 %v7568_v60, %s5968_s6  ;;  %v2854_v24 = vand.u32 2147483647, %v7568_v60  ;;  %v2853_v61 = vmax.f32 %v7568_v60, 0.0 }
 0xb7e   :  { %v2850_v21 = vpop.f32.mrf.mxu0 }
 0xb7f   :  { %v2855_v32 = vsub.f32 0.0, %v2854_v24 }
 0xb80   :  { %v5220_v38 = vpop.f32.mrf.mxu0 }
 0xb81   :  { %v2856_v46 = vmul.f32 1.442695, %v2855_v32  ;;  %v7582_v32 = vld [vmem:[#allocation8 + $0x8] sm:$0xff]   ;;  %v7588_v38 = vld [vmem:[#allocation8] sm:$0xff]  }
 0xb83   :  { %5664 = vpow2.f32 %v2856_v46 }
 0xb90   :  { %v5665_v52 = vpop.eup %5664 }
 0xb91   :  { %v2858_v22 = vadd.f32 1.0, %v5665_v52 }
 0xb93   :  { %5666 = vlog2.f32 %v2858_v22  ;;  %v7599_v22 = vld [vmem:[#allocation4 + $0x1] ss:$0 sm:$0xff] }
 0xba0   :  { %v5667_v41 = vpop.eup %5666 }
 0xba1   :  { %v2860_v26 = vmul.f32 0.6931472, %v5667_v41 }
 0xba3   :  { %v2861_v4 = vadd.f32 %v2860_v26, %v2853_v61 }
 0xba5   :  { %v7574_v29 = vadd.f32 0.1, %v2861_v4 }
 0xba7   :  { %8926 = vst [vmem:[#allocation105_spill] sm:$0xff] %v7574_v29  ;;  %v2944_v27 = vmul.f32 %v2942_v19, %v7574_v29 }
 0xba9   :  { %2946 = vrot.lane.b32.xlu1 %v2944_v27, %s5969_s4 }
 0xbef   :  { %v2954_v33 = vpop.permute.xlu0 %2953 }
 0xbf0   :  { %2956 = vst.msk [vmem:[#allocation2] sm:$0x3] %vm1589_vm8, %v2954_v33  ;;  %v7605_v33 = vld [vmem:[%s8685_s13 + $0x2a0] ss:$48 sps:$4 sm:$0xff]  }
 0xbf7   :  { %v2957_v24 = vld [vmem:[#allocation2] sm:$0x3] }
 0xbf8   :  { %v2958_v21 = vpack.c.bf16 %v2957_v24, %v2957_v24  ;;  %3629 = vst.msk [vmem:[#allocation2 - $0x6] sm:$0xc0] %vm3628_vm13, %v6388_v48  ;;  %v7594_v48 = vld [vmem:[%s8685_s13 + $0x2ac] ss:$48 sps:$4 sm:$0xff]   ;;  %v8927_v24 = vmov 0  }
 0xbf9   :  { %3631 = vst.msk [vmem:[#allocation2 - $0x4] sm:$0x30] %vm3630_vm14, %v6564_v23 }
 0xbfa   :  { %5238 = vmatmul.mubr.msk.bf16.vlgmr.msra.gmra.mxu1 %vm1073_vm5, %v2958_v21  ;;  %v7612_v21 = vld [vmem:[%s8685_s13 + $0x244] ss:$48 sps:$4 sm:$0xff]  }
 0xbfb   :  { %5262 = vmatpush3.bf16.msra.mxu1 %v7582_v32  ;;  %5265 = vmatprep.mubr.msk.bf16.mxu1 %vm5966_vm0, %v8881_v5 }
 0xbfc   :  { %5263 = vmatprep.subr.bf16.mxu1 %v8881_v5 }
 0xbff   :  { %5264 = vmatpush3.bf16.msra.mxu1 %v7588_v38 }
 0xc00   :  { %3235 = vmatprep.subr.bf16.mxu1 %v7594_v48 }
 0xc1b   :  { %v2947_v23 = vpop.permute.xlu1 %2946 }
 0xc1c   :  { %v2949_v46 = vadd.f32 %v2947_v23, %v7568_v60  ;;  %v7618_v23 = vld [vmem:[%s8685_s13 + $0x240] ss:$48 sps:$4 sm:$0xff]  }
 0xc1e   :  { %2950 = vst.msk [vmem:[#allocation3] sm:$0x3] %vm1397_vm7, %v2949_v46  ;;  %v7624_v46 = vld [vmem:[%s8685_s13 + $0x1e4] ss:$48 sps:$4 sm:$0xff]  }
 0xcba   :  { %v2996_v52 = vpop.f32.mrf.mxu1 }
 0xcbb   :  { %v2997_v41 = vadd.f32 %v7599_v22, %v2996_v52  ;;  %v7630_v52 = vld [vmem:[%s8685_s13 + $0x1e0] ss:$48 sps:$4 sm:$0xff]  }
 0xcbc   :  { %v5239_v61 = vpop.f32.mrf.mxu1 }
 0xcbd   :  { %v3002_v26 = vmax.f32 %v2997_v41, 0.0  ;;  %v7636_v41 = vld [vmem:[%s8685_s13 + $0x184] ss:$48 sps:$4 sm:$0xff]   ;;  %v7642_v61 = vld [vmem:[%s8685_s13 + $0x180] ss:$48 sps:$4 sm:$0xff]  }
 0xcbe   :  { %v2999_v4 = vpop.f32.mrf.mxu1 }
 0xcbf   :  { %v3003_v19 = vpack.c.bf16 %v3002_v26, %v3002_v26  ;;  %v7654_v4 = vld [vmem:[#allocation6 + $0x1] ss:$0 sm:$0xff] }
 0xcc0   :  { %v5240_v27 = vpop.f32.mrf.mxu1 }
 0xcc1   :  { %5258 = vmatmul.mubr.bf16.vlgmr.msra.gmra.mxu0 %v3003_v19 }
 0xcc2   :  { %3195 = vmatpush1.bf16.msra.mxu0 %v7605_v33  ;;  %3226 = vmatprep.mubr.bf16.mxu0 %v8927_v24 }
 0xcc3   :  { %3196 = vmatprep.subr.bf16.mxu0 %v7612_v21 }
 0xcc6   :  { %3197 = vmatpush1.bf16.msra.mxu0 %v7618_v23 }
 0xcc7   :  { %3198 = vmatprep.subr.bf16.mxu0 %v7624_v46 }
 0xcca   :  { %3199 = vmatpush1.bf16.msra.mxu0 %v7630_v52 }
 0xccb   :  { %3200 = vmatprep.subr.bf16.mxu0 %v7636_v41 }
 0xcce   :  { %3201 = vmatpush1.bf16.msra.mxu0 %v7642_v61 }
 0xccf   :  { %3202 = vmatprep.subr.bf16.mxu0 %v6694_v56 }
 0xcd2   :  { %3203 = vmatpush1.bf16.msra.mxu0 %v6699_v62 }
 0xcd3   :  { %3204 = vmatprep.subr.bf16.mxu0 %v6705_v63 }
 0xcd6   :  { %3205 = vmatpush1.bf16.msra.mxu0 %v6711_v0 }
 0xcd7   :  { %3206 = vmatprep.subr.bf16.mxu0 %v6717_v1 }
 0xcda   :  { %3207 = vmatpush1.bf16.msra.mxu0 %v6723_v2 }
 0xcdb   :  { %3208 = vmatprep.subr.bf16.mxu0 %v6777_v25 }
 0xcde   :  { %3209 = vmatpush1.bf16.msra.mxu0 %v6785_v28 }
 0xcdf   :  { %3276 = vmatprep.subr.bf16.mxu0 %v6795_v30 }
 0xd81   :  { %v3038_v26 = vpop.f32.mrf.mxu0 }
 0xd82   :  { %v7657_v56 = vadd.f32 %v7654_v4, %v3038_v26  ;;  %v8930_v26 = vrot.slane %v6616_v51, 2 }
 0xd83   :  { %v5259_v62 = vpop.f32.mrf.mxu0 }
 0xd84   :  { %8928 = vst [vmem:[#allocation106_spill] sm:$0xff] %v7657_v56  ;;  %v3045_v63 = vand.u32 2147483647, %v7657_v56  ;;  %v3044_v30 = vmax.f32 %v7657_v56, 0.0 }
 0xd85   :  { %v3041_v0 = vpop.f32.mrf.mxu0 }
 0xd86   :  { %v3046_v19 = vsub.f32 0.0, %v3045_v63 }
 0xd87   :  { %v5260_v1 = vpop.f32.mrf.mxu0 }
 0xd88   :  { %v3047_v27 = vmul.f32 1.442695, %v3046_v19 }
 0xd8a   :  { %5668 = vpow2.f32 %v3047_v27 }
 0xd97   :  { %v5669_v2 = vpop.eup %5668 }
 0xd98   :  { %v3049_v25 = vadd.f32 1.0, %v5669_v2 }
 0xd9a   :  { %5670 = vlog2.f32 %v3049_v25  ;;  %v7693_v25 = vld [vmem:[%s8685_s13 + $0x2a8] ss:$48 sps:$4 sm:$0xff]  }
 0xda7   :  { %v5671_v28 = vpop.eup %5670 }
 0xda8   :  { %v3051_v40 = vmul.f32 0.6931472, %v5671_v28  ;;  %v7700_v28 = vld [vmem:[%s8685_s13 + $0x24c] ss:$48 sps:$4 sm:$0xff]  }
 0xdaa   :  { %v3052_v45 = vadd.f32 %v3051_v40, %v3044_v30  ;;  %v7706_v30 = vld [vmem:[%s8685_s13 + $0x248] ss:$48 sps:$4 sm:$0xff]  }
 0xdac   :  { %v7661_v29 = vadd.f32 0.1, %v3052_v45 }
 0xdae   :  { %8929 = vst [vmem:[#allocation107_spill] sm:$0xff] %v7661_v29  ;;  %v3132_v62 = vmul.f32 %v7661_v29, %v8930_v26  ;;  %v7712_v26 = vld [vmem:[%s8685_s13 + $0x1ec] ss:$48 sps:$4 sm:$0xff]  }
 0xdaf   :  { %8933 = vst [vmem:[#allocation110_spill] sm:$0xff] %v7712_v26  ;;  %v7784_v29 = vld [vmem:[%s8685_s13 + $0x2bc] ss:$48 sps:$4 sm:$0xff]  }
 0xdb0   :  { %3134 = vrot.lane.b32.xlu0 %v3132_v62, %s5969_s4  ;;  %v7718_v62 = vld [vmem:[%s8685_s13 + $0x1e8] ss:$48 sps:$4 sm:$0xff]   ;;  %8945 = vst [vmem:[#allocation122_spill] sm:$0xff] %v7784_v29 }
 0xdb1   :  { %8934 = vst [vmem:[#allocation111_spill] sm:$0xff] %v7718_v62 }
 0xdb4   :  { %2867 = vrot.lane.b32.xlu0 %v7568_v60, %s5970_s26  ;;  %v7772_v60 = vld [vmem:[%s8685_s13 + $0xc] ss:$48 sps:$4 sm:$0xff]  }
 0xdb5   :  { %8943 = vst [vmem:[#allocation120_spill] sm:$0xff] %v7772_v60 }
 0xdb8   :  { %3143 = vrot.lane.b32.xlu0 %v7657_v56, %s5969_s4 }
 0xe22   :  { %v3135_v63 = vpop.permute.xlu0 %3134 }
 0xe23   :  { %v3137_v0 = vadd.f32 %v3135_v63, %v7657_v56  ;;  %v7724_v63 = vld [vmem:[%s8685_s13 + $0x18c] ss:$48 sps:$4 sm:$0xff]  }
 0xe24   :  { %8935 = vst [vmem:[#allocation112_spill] sm:$0xff] %v7724_v63 }
 0xe25   :  { %3139 = vrot.lane.b32.xlu1 %v3137_v0, %s5958_s23  ;;  %v7730_v0 = vld [vmem:[%s8685_s13 + $0x188] ss:$48 sps:$4 sm:$0xff]  }
 0xe26   :  { %v7673_v40 = vpop.permute.xlu0 %2867  ;;  %8936 = vst [vmem:[#allocation113_spill] sm:$0xff] %v7730_v0 }
 0xe27   :  { %8931 = vst [vmem:[#allocation108_spill] sm:$0xff] %v7673_v40  ;;  %2951 = vst.msk [vmem:[#allocation3 + $0x2] sm:$0x3] %vm1397_vm7, %v7673_v40 }
 0xe28   :  { %3632 = vst.msk [vmem:[#allocation2] sm:$0x3] %vm1397_vm7, %v7673_v40  ;;  %v7778_v40 = vld [vmem:[%s8685_s13 + $0x8] ss:$48 sps:$4 sm:$0xff]  }
 0xe29   :  { %3058 = vrot.lane.b32.xlu1 %v7657_v56, %s5970_s26  ;;  %v7760_v56 = vld [vmem:[%s8685_s13 + $0x6c] ss:$48 sps:$4 sm:$0xff]   ;;  %8944 = vst [vmem:[#allocation121_spill] sm:$0xff] %v7778_v40 }
 0xe2a   :  { %v3144_v51 = vpop.permute.xlu0 %3143  ;;  %8941 = vst [vmem:[#allocation118_spill] sm:$0xff] %v7760_v56 }
 0xe2b   :  { %3146 = vst.msk [vmem:[#allocation3 + $0x2] sm:$0x3] %vm1775_vm11, %v3144_v51  ;;  %v7736_v51 = vld [vmem:[%s8685_s13 + $0x12c] ss:$48 sps:$4 sm:$0xff]  }
 0xe2c   :  { %8937 = vst [vmem:[#allocation114_spill] sm:$0xff] %v7736_v51 }
 0xe2f   :  { %v7685_v1 = vld [vmem:[#allocation2] sm:$0x3] }
 0xe97   :  { %v3140_v45 = vpop.permute.xlu1 %3139 }
 0xe98   :  { %3142 = vst.msk [vmem:[#allocation3] sm:$0x3] %vm1775_vm11, %v3140_v45  ;;  %v7742_v45 = vld [vmem:[%s8685_s13 + $0x128] ss:$48 sps:$4 sm:$0xff]  }
 0xe99   :  { %8938 = vst [vmem:[#allocation115_spill] sm:$0xff] %v7742_v45 }
 0xe9b   :  { %v7683_v19 = vpop.permute.xlu1 %3058 }
 0xe9c   :  { %8932 = vst [vmem:[#allocation109_spill] sm:$0xff] %v7683_v19  ;;  %3819 = vst.msk [vmem:[#allocation2] sm:$0x3] %vm1397_vm7, %v7683_v19  ;;  %v7766_v19 = vld [vmem:[%s8685_s13 + $0x68] ss:$48 sps:$4 sm:$0xff]  }
 0xe9d   :  { %8942 = vst [vmem:[#allocation119_spill] sm:$0xff] %v7766_v19 }
 0xe9f   :  { %v3147_v27 = vld [vmem:[#allocation3] sm:$0xf] }
 0xea0   :  { %v3148_v2 = vpack.c.bf16 %v3147_v27, %v3147_v27  ;;  %v7748_v27 = vld [vmem:[%s8685_s13 + $0xcc] ss:$48 sps:$4 sm:$0xff]  }
 0xea1   :  { %8939 = vst [vmem:[#allocation116_spill] sm:$0xff] %v7748_v27 }
 0xea2   :  { %5266 = vmatmul.mubr.msk.bf16.vlgmr.msra.gmra.mxu1 %vm1795_vm12, %v3148_v2  ;;  %v7754_v2 = vld [vmem:[%s8685_s13 + $0xc8] ss:$48 sps:$4 sm:$0xff]  }
 0xea3   :  { %3236 = vmatpush1.bf16.msra.mxu1 %v7693_v25  ;;  %3267 = vmatprep.mubr.bf16.mxu1 %v8927_v24  ;;  %8940 = vst [vmem:[#allocation117_spill] sm:$0xff] %v7754_v2 }
 0xea4   :  { %3237 = vmatprep.subr.bf16.mxu1 %v7700_v28 }
 0xea7   :  { %3238 = vmatpush1.bf16.msra.mxu1 %v7706_v30 }
 0xea8   :  { %3239 = vmatprep.subr.bf16.mxu1 %v7712_v26 }
 0xeab   :  { %3240 = vmatpush1.bf16.msra.mxu1 %v7718_v62 }
 0xeac   :  { %3241 = vmatprep.subr.bf16.mxu1 %v7724_v63 }
 0xeaf   :  { %3242 = vmatpush1.bf16.msra.mxu1 %v7730_v0 }
 0xeb0   :  { %3243 = vmatprep.subr.bf16.mxu1 %v7736_v51 }
 0xeb3   :  { %3244 = vmatpush1.bf16.msra.mxu1 %v7742_v45 }
 0xeb4   :  { %3245 = vmatprep.subr.bf16.mxu1 %v7748_v27 }
 0xeb7   :  { %3246 = vmatpush1.bf16.msra.mxu1 %v7754_v2 }
 0xeb8   :  { %3247 = vmatprep.subr.bf16.mxu1 %v7760_v56  ;;  %v7787_v56 = vld [vmem:[#allocation9] ss:$0 sm:$0xff] }
 0xeb9   :  { %8946 = vst [vmem:[#allocation123_spill] sm:$0xff] %v7787_v56 }
 0xebb   :  { %3248 = vmatpush1.bf16.msra.mxu1 %v7766_v19 }
 0xebc   :  { %3249 = vmatprep.subr.bf16.mxu1 %v7772_v60 }
 0xebf   :  { %3250 = vmatpush1.bf16.msra.mxu1 %v7778_v40  ;;  %v7797_v40 = vld [vmem:[%s8685_s13 + $0x2b0] ss:$48 sps:$4 sm:$0xff]  }
 0xec0   :  { %3317 = vmatprep.subr.bf16.mxu1 %v7784_v29  ;;  %8947 = vst [vmem:[#allocation124_spill] sm:$0xff] %v7797_v40 }
 0xf62   :  { %v3186_v19 = vpop.f32.mrf.mxu1 }
 0xf63   :  { %v3187_v2 = vadd.f32 %v7787_v56, %v3186_v19  ;;  %v7809_v19 = vld [vmem:[%s8685_s13 + $0x254] ss:$48 sps:$4 sm:$0xff]  }
 0xf64   :  { %v5267_v60 = vpop.f32.mrf.mxu1  ;;  %8949 = vst [vmem:[#allocation126_spill] sm:$0xff] %v7809_v19 }
 0xf65   :  { %v3192_v27 = vmax.f32 %v3187_v2, 0.0  ;;  %v7803_v60 = vld [vmem:[%s8685_s13 + $0x2b8] ss:$48 sps:$4 sm:$0xff]  }
 0xf66   :  { %v3189_v45 = vpop.f32.mrf.mxu1  ;;  %8948 = vst [vmem:[#allocation125_spill] sm:$0xff] %v7803_v60  ;;  %v8967_v2 = vld [vmem:[#allocation39_spill] sm:$0xff] }
 0xf67   :  { %v7790_v51 = vpack.c.bf16 %v3192_v27, %v3192_v27  ;;  %v8965_v45 = vld [vmem:[#allocation37_spill] sm:$0xff]  ;;  %v8966_v27 = vld [vmem:[#allocation38_spill] sm:$0xff] }
 0xf68   :  { %v5268_v0 = vpop.f32.mrf.mxu1 }
 0xf69   :  { %3227 = vmatmul.mubr.bf16.vlgmr.msra.gmra.mxu0 %v7790_v51  ;;  %3268 = vmatmul.mubr.bf16.vlgmr.msra.gmra.mxu1 %v7790_v51  ;;  %v7815_v0 = vld [vmem:[%s8685_s13 + $0x25c] ss:$48 sps:$4 sm:$0xff]  }
 0xf6a   :  { %3277 = vmatpush1.bf16.msra.mxu0 %v7797_v40  ;;  %3318 = vmatpush1.bf16.msra.mxu1 %v7803_v60  ;;  %8950 = vst [vmem:[#allocation127_spill] sm:$0xff] %v7815_v0  ;;  %v9022_v60 = vld [vmem:[#allocation91_spill] sm:$0xff] }
 0xf6b   :  { %3278 = vmatprep.subr.bf16.mxu0 %v7809_v19  ;;  %3319 = vmatprep.subr.bf16.mxu1 %v7815_v0 }
 0xf6c   :  { %3308 = vmatprep.mubr.bf16.mxu0 %v8927_v24  ;;  %3349 = vmatprep.mubr.bf16.mxu1 %v8927_v24 }
 0xf6e   :  { %3279 = vmatpush1.bf16.msra.mxu0 %v6822_v49  ;;  %3320 = vmatpush1.bf16.msra.mxu1 %v6827_v50  ;;  %v8951_v49 = vld [vmem:[#allocation23_spill] sm:$0xff]  ;;  %v8952_v50 = vld [vmem:[#allocation24_spill] sm:$0xff] }
 0xf6f   :  { %3280 = vmatprep.subr.bf16.mxu0 %v6832_v53  ;;  %3321 = vmatprep.subr.bf16.mxu1 %v6837_v54  ;;  %v8953_v53 = vld [vmem:[#allocation25_spill] sm:$0xff]  ;;  %v8954_v54 = vld [vmem:[#allocation26_spill] sm:$0xff] }
 0xf72   :  { %3281 = vmatpush1.bf16.msra.mxu0 %v6846_v55  ;;  %3322 = vmatpush1.bf16.msra.mxu1 %v6851_v3  ;;  %v8955_v55 = vld [vmem:[#allocation27_spill] sm:$0xff]  ;;  %v8956_v3 = vld [vmem:[#allocation28_spill] sm:$0xff] }
 0xf73   :  { %3282 = vmatprep.subr.bf16.mxu0 %v6858_v7  ;;  %3323 = vmatprep.subr.bf16.mxu1 %v6863_v8  ;;  %v8957_v7 = vld [vmem:[#allocation29_spill] sm:$0xff]  ;;  %v8958_v8 = vld [vmem:[#allocation30_spill] sm:$0xff] }
 0xf76   :  { %3283 = vmatpush1.bf16.msra.mxu0 %v6870_v9  ;;  %3324 = vmatpush1.bf16.msra.mxu1 %v6875_v10  ;;  %v8959_v9 = vld [vmem:[#allocation31_spill] sm:$0xff]  ;;  %v8960_v10 = vld [vmem:[#allocation32_spill] sm:$0xff] }
 0xf77   :  { %3284 = vmatprep.subr.bf16.mxu0 %v6882_v11  ;;  %3325 = vmatprep.subr.bf16.mxu1 %v6887_v12  ;;  %v8961_v11 = vld [vmem:[#allocation33_spill] sm:$0xff]  ;;  %v8962_v12 = vld [vmem:[#allocation34_spill] sm:$0xff] }
 0xf7a   :  { %3285 = vmatpush1.bf16.msra.mxu0 %v6894_v13  ;;  %3326 = vmatpush1.bf16.msra.mxu1 %v6899_v15  ;;  %v8963_v13 = vld [vmem:[#allocation35_spill] sm:$0xff]  ;;  %v8964_v15 = vld [vmem:[#allocation36_spill] sm:$0xff] }
 0xf7b   :  { %3286 = vmatprep.subr.bf16.mxu0 %v8951_v49  ;;  %3327 = vmatprep.subr.bf16.mxu1 %v8952_v50  ;;  %v8968_v49 = vld [vmem:[#allocation40_spill] sm:$0xff]  ;;  %v8969_v50 = vld [vmem:[#allocation41_spill] sm:$0xff] }
 0xf7e   :  { %3287 = vmatpush1.bf16.msra.mxu0 %v8953_v53  ;;  %3328 = vmatpush1.bf16.msra.mxu1 %v8954_v54  ;;  %v8970_v53 = vld [vmem:[#allocation42_spill] sm:$0xff]  ;;  %v8971_v54 = vld [vmem:[#allocation43_spill] sm:$0xff] }
 0xf7f   :  { %3288 = vmatprep.subr.bf16.mxu0 %v8955_v55  ;;  %3329 = vmatprep.subr.bf16.mxu1 %v8956_v3  ;;  %v8972_v55 = vld [vmem:[#allocation44_spill] sm:$0xff]  ;;  %v8973_v3 = vld [vmem:[#allocation45_spill] sm:$0xff] }
 0xf82   :  { %3289 = vmatpush1.bf16.msra.mxu0 %v8957_v7  ;;  %3330 = vmatpush1.bf16.msra.mxu1 %v8958_v8  ;;  %v8974_v7 = vld [vmem:[#allocation46_spill] sm:$0xff]  ;;  %v8975_v8 = vld [vmem:[#allocation47_spill] sm:$0xff] }
 0xf83   :  { %3290 = vmatprep.subr.bf16.mxu0 %v8959_v9  ;;  %3331 = vmatprep.subr.bf16.mxu1 %v8960_v10  ;;  %v8976_v9 = vld [vmem:[#allocation48_spill] sm:$0xff]  ;;  %v8977_v10 = vld [vmem:[#allocation49_spill] sm:$0xff] }
 0xf86   :  { %3291 = vmatpush1.bf16.msra.mxu0 %v8961_v11  ;;  %3332 = vmatpush1.bf16.msra.mxu1 %v8962_v12  ;;  %v8978_v11 = vld [vmem:[#allocation50_spill] sm:$0xff]  ;;  %v8979_v12 = vld [vmem:[#allocation51_spill] sm:$0xff] }
 0xf87   :  { %3358 = vmatprep.subr.bf16.mxu0 %v8963_v13  ;;  %3399 = vmatprep.subr.bf16.mxu1 %v8964_v15  ;;  %v8980_v13 = vld [vmem:[#allocation52_spill] sm:$0xff]  ;;  %v8981_v15 = vld [vmem:[#allocation53_spill] sm:$0xff] }
 0xf89   :  { %3309 = vmatmul.mubr.bf16.vlgmr.msra.gmra.mxu0 %v7790_v51  ;;  %3350 = vmatmul.mubr.bf16.vlgmr.msra.gmra.mxu1 %v7790_v51 }
 0xf8a   :  { %3359 = vmatpush1.bf16.msra.mxu0 %v8965_v45  ;;  %3400 = vmatpush1.bf16.msra.mxu1 %v8966_v27  ;;  %v8982_v45 = vld [vmem:[#allocation54_spill] sm:$0xff]  ;;  %v8983_v27 = vld [vmem:[#allocation55_spill] sm:$0xff] }
 0xf8b   :  { %3360 = vmatprep.subr.bf16.mxu0 %v8967_v2  ;;  %3401 = vmatprep.subr.bf16.mxu1 %v8968_v49  ;;  %v8984_v2 = vld [vmem:[#allocation56_spill] sm:$0xff]  ;;  %v8985_v49 = vld [vmem:[#allocation57_spill] sm:$0xff] }
 0xf8c   :  { %3390 = vmatprep.mubr.bf16.mxu0 %v8927_v24  ;;  %3431 = vmatprep.mubr.bf16.mxu1 %v8927_v24 }
 0xf8e   :  { %3361 = vmatpush1.bf16.msra.mxu0 %v8969_v50  ;;  %3402 = vmatpush1.bf16.msra.mxu1 %v8970_v53  ;;  %v8986_v50 = vld [vmem:[#allocation58_spill] sm:$0xff]  ;;  %v8987_v53 = vld [vmem:[#allocation59_spill] sm:$0xff] }
 0xf8f   :  { %3362 = vmatprep.subr.bf16.mxu0 %v8971_v54  ;;  %3403 = vmatprep.subr.bf16.mxu1 %v8972_v55  ;;  %v8988_v54 = vld [vmem:[#allocation60_spill] sm:$0xff]  ;;  %v8989_v55 = vld [vmem:[#allocation61_spill] sm:$0xff] }
 0xf92   :  { %3363 = vmatpush1.bf16.msra.mxu0 %v8973_v3  ;;  %3404 = vmatpush1.bf16.msra.mxu1 %v8974_v7  ;;  %v8990_v3 = vld [vmem:[#allocation62_spill] sm:$0xff]  ;;  %v8991_v7 = vld [vmem:[#allocation63_spill] sm:$0xff] }
 0xf93   :  { %3364 = vmatprep.subr.bf16.mxu0 %v8975_v8  ;;  %3405 = vmatprep.subr.bf16.mxu1 %v8976_v9  ;;  %v8992_v8 = vld [vmem:[#allocation64_spill] sm:$0xff]  ;;  %v8993_v9 = vld [vmem:[#allocation65_spill] sm:$0xff] }
 0xf96   :  { %3365 = vmatpush1.bf16.msra.mxu0 %v8977_v10  ;;  %3406 = vmatpush1.bf16.msra.mxu1 %v8978_v11  ;;  %v8994_v10 = vld [vmem:[#allocation66_spill] sm:$0xff]  ;;  %v8995_v11 = vld [vmem:[#allocation15_spill] sm:$0xff] }
 0xf97   :  { %3366 = vmatprep.subr.bf16.mxu0 %v8979_v12  ;;  %3407 = vmatprep.subr.bf16.mxu1 %v8980_v13  ;;  %v8996_v12 = vld [vmem:[#allocation67_spill] sm:$0xff]  ;;  %v8997_v13 = vld [vmem:[#allocation68_spill] sm:$0xff] }
 0xf9a   :  { %3367 = vmatpush1.bf16.msra.mxu0 %v8981_v15  ;;  %3408 = vmatpush1.bf16.msra.mxu1 %v8982_v45  ;;  %v8998_v15 = vld [vmem:[#allocation69_spill] sm:$0xff]  ;;  %v9000_v45 = vld [vmem:[#allocation71_spill] sm:$0xff] }
 0xf9b   :  { %3368 = vmatprep.subr.bf16.mxu0 %v8983_v27  ;;  %3409 = vmatprep.subr.bf16.mxu1 %v8984_v2  ;;  %v9001_v27 = vld [vmem:[#allocation72_spill] sm:$0xff]  ;;  %v9002_v2 = vld [vmem:[#allocation73_spill] sm:$0xff] }
 0xf9e   :  { %3369 = vmatpush1.bf16.msra.mxu0 %v8985_v49  ;;  %3410 = vmatpush1.bf16.msra.mxu1 %v8986_v50  ;;  %v9003_v49 = vld [vmem:[#allocation74_spill] sm:$0xff]  ;;  %v9004_v50 = vld [vmem:[#allocation75_spill] sm:$0xff] }
 0xf9f   :  { %3370 = vmatprep.subr.bf16.mxu0 %v8987_v53  ;;  %3411 = vmatprep.subr.bf16.mxu1 %v8988_v54  ;;  %v9005_v53 = vld [vmem:[#allocation76_spill] sm:$0xff]  ;;  %v9006_v54 = vld [vmem:[#allocation77_spill] sm:$0xff] }
 0xfa2   :  { %3371 = vmatpush1.bf16.msra.mxu0 %v8989_v55  ;;  %3412 = vmatpush1.bf16.msra.mxu1 %v8990_v3  ;;  %v9007_v55 = vld [vmem:[#allocation78_spill] sm:$0xff]  ;;  %v9008_v3 = vld [vmem:[#allocation79_spill] sm:$0xff] }
 0xfa3   :  { %3372 = vmatprep.subr.bf16.mxu0 %v8991_v7  ;;  %3413 = vmatprep.subr.bf16.mxu1 %v8992_v8  ;;  %v9009_v7 = vld [vmem:[#allocation80_spill] sm:$0xff]  ;;  %v3634_v8 = vpack.c.bf16 %v7685_v1, %v7685_v1  ;;  %v9012_v1 = vld [vmem:[#allocation82_spill] sm:$0xff] }
 0xfa6   :  { %3373 = vmatpush1.bf16.msra.mxu0 %v8993_v9  ;;  %3414 = vmatpush1.bf16.msra.mxu1 %v8994_v10  ;;  %v5771_v9 = vld [vmem:[%s8681_s9] sm:$0xff]   ;;  %v9010_v10 = vld [vmem:[#allocation16_spill] sm:$0xff] }
 0xfa7   :  { %5269 = vmatprep.subr.bf16.mxu0 %v8881_v5  ;;  %5289 = vmatprep.subr.bf16.mxu1 %v8881_v5 }
 0xfa9   :  { %3391 = vmatmul.mubr.bf16.vlgmr.msra.gmra.mxu0 %v7790_v51  ;;  %3432 = vmatmul.mubr.bf16.vlgmr.msra.gmra.mxu1 %v7790_v51  ;;  %v8999_v51 = vld [vmem:[#allocation70_spill] sm:$0xff] }
 0xfaa   :  { %5270 = vmatpush3.bf16.msra.mxu0 %v8995_v11  ;;  %5285 = vmatprep.mubr.msk.bf16.mxu0 %vm5966_vm0, %v8881_v5  ;;  %v9011_v11 = vld [vmem:[#allocation81_spill] sm:$0xff] }
 0xfab   :  { %5271 = vmatprep.subr.bf16.mxu0 %v8881_v5  ;;  %5290 = vmatpush3.bf16.msra.mxu1 %v8996_v12  ;;  %v9013_v12 = vld [vmem:[#allocation83_spill] sm:$0xff] }
 0xfac   :  { %5291 = vmatprep.subr.bf16.mxu1 %v8881_v5  ;;  %5305 = vmatprep.mubr.msk.bf16.mxu1 %vm5966_vm0, %v8881_v5 }
 0xfae   :  { %5272 = vmatpush3.bf16.msra.mxu0 %v8997_v13  ;;  %v9014_v13 = vld [vmem:[#allocation84_spill] sm:$0xff] }
 0xfaf   :  { %5273 = vmatprep.subr.bf16.mxu0 %v8881_v5  ;;  %5292 = vmatpush3.bf16.msra.mxu1 %v8998_v15  ;;  %v5772_v15 = vld [vmem:[%s8679_s7 + $0x4c] sm:$0xff]  }
 0xfb0   :  { %5293 = vmatprep.subr.bf16.mxu1 %v8881_v5 }
 0xfb2   :  { %5274 = vmatpush3.bf16.msra.mxu0 %v8999_v51  ;;  %v5773_v51 = vld [vmem:[%s8679_s7 + $0x44] sm:$0xff]  }
 0xfb3   :  { %5275 = vmatprep.subr.bf16.mxu0 %v8881_v5  ;;  %5294 = vmatpush3.bf16.msra.mxu1 %v9000_v45  ;;  %v5774_v45 = vld [vmem:[%s8679_s7 + $0x3c] sm:$0xff]  }
 0xfb4   :  { %5295 = vmatprep.subr.bf16.mxu1 %v8881_v5 }
 0xfb6   :  { %5276 = vmatpush3.bf16.msra.mxu0 %v9001_v27  ;;  %v7954_v27 = vld [vmem:[%s8674_s2] sm:$0x3f] }
 0xfb7   :  { %5277 = vmatprep.subr.bf16.mxu0 %v8881_v5  ;;  %5296 = vmatpush3.bf16.msra.mxu1 %v9002_v2  ;;  %v8817_v2 = vrot.slane %v7954_v27, 4 }
 0xfb8   :  { %5297 = vmatprep.subr.bf16.mxu1 %v8881_v5 }
 0xfb9   :  { %3808 = vrot.lane.b32.xlu1 %v8817_v2, %s5958_s23  ;;  %v9021_v2 = vld [vmem:[#allocation90_spill] sm:$0xff] }
 0xfba   :  { %5278 = vmatpush3.bf16.msra.mxu0 %v9003_v49  ;;  %v9015_v49 = vld [vmem:[#allocation87_spill] sm:$0xff] }
 0xfbb   :  { %5279 = vmatprep.subr.bf16.mxu0 %v8881_v5  ;;  %5298 = vmatpush3.bf16.msra.mxu1 %v9004_v50  ;;  %v7961_v50 = vrot.slane %v9015_v49, 4  ;;  %v9020_v49 = vld [vmem:[#allocation89_spill] sm:$0xff] }
 0xfbc   :  { %5299 = vmatprep.subr.bf16.mxu1 %v8881_v5 }
 0xfbe   :  { %5280 = vmatpush3.bf16.msra.mxu0 %v9005_v53  ;;  %v7964_v53 = vrot.slane %v7357_v59, 4 }
 0xfbf   :  { %5281 = vmatprep.subr.bf16.mxu0 %v8881_v5  ;;  %5300 = vmatpush3.bf16.msra.mxu1 %v9006_v54 }
 0xfc0   :  { %5301 = vmatprep.subr.bf16.mxu1 %v8881_v5 }
 0xfc2   :  { %5282 = vmatpush3.bf16.msra.mxu0 %v9007_v55 }
 0xfc3   :  { %5283 = vmatprep.subr.bf16.mxu0 %v8881_v5  ;;  %5302 = vmatpush3.bf16.msra.mxu1 %v9008_v3  ;;  %v9016_v3 = vld [vmem:[#allocation85_spill] sm:$0xff] }
 0xfc4   :  { %5303 = vmatprep.subr.bf16.mxu1 %v8881_v5 }
 0xfc6   :  { %5284 = vmatpush3.bf16.msra.mxu0 %v9009_v7 }
 0xfc7   :  { %5304 = vmatpush3.bf16.msra.mxu1 %v5771_v9  ;;  %5309 = vmatprep.subr.bf16.mxu0 %v8881_v5 }
 0xfc8   :  { %5329 = vmatprep.subr.bf16.mxu1 %v8881_v5 }
 0xfc9   :  { %5286 = vmatmul.mubr.msk.bf16.vlgmr.msra.gmra.mxu0 %vm1073_vm5, %v3634_v8  ;;  %v9017_v8 = vld [vmem:[#allocation86_spill] sm:$0xff] }
 0xfca   :  { %5310 = vmatpush3.bf16.msra.mxu0 %v9010_v10  ;;  %5325 = vmatprep.mubr.msk.bf16.mxu0 %vm5966_vm0, %v8881_v5 }
 0xfcb   :  { %5311 = vmatprep.subr.bf16.mxu0 %v8881_v5 }
 0xfce   :  { %5312 = vmatpush3.bf16.msra.mxu0 %v9011_v11  ;;  %v7969_v11 = vrot.slane %v7377_v43, 4 }
 0xfcf   :  { %5313 = vmatprep.subr.bf16.mxu0 %v8881_v5 }
 0xfd0   :  { %9018 = vst [vmem:[#allocation23_spill] sm:$0xff] %v7969_v11 }
 0xfd2   :  { %5314 = vmatpush3.bf16.msra.mxu0 %v9012_v1 }
 0xfd3   :  { %5315 = vmatprep.subr.bf16.mxu0 %v8881_v5 }
 0xfd6   :  { %5316 = vmatpush3.bf16.msra.mxu0 %v9013_v12  ;;  %v7972_v12 = vrot.slane %v7385_v39, 4 }
 0xfd7   :  { %5317 = vmatprep.subr.bf16.mxu0 %v8881_v5 }
 0xfda   :  { %5318 = vmatpush3.bf16.msra.mxu0 %v9014_v13 }
 0xfdb   :  { %5319 = vmatprep.subr.bf16.mxu0 %v8881_v5 }
 0xfde   :  { %5320 = vmatpush3.bf16.msra.mxu0 %v5772_v15  ;;  %v9019_v15 = vld [vmem:[#allocation88_spill] sm:$0xff] }
 0xfdf   :  { %5321 = vmatprep.subr.bf16.mxu0 %v8881_v5 }
 0xfe2   :  { %5322 = vmatpush3.bf16.msra.mxu0 %v5773_v51 }
 0xfe3   :  { %5323 = vmatprep.subr.bf16.mxu0 %v8881_v5 }
 0xfe6   :  { %5324 = vmatpush3.bf16.msra.mxu0 %v5774_v45 }
 0xfe7   :  { %5349 = vmatprep.subr.bf16.mxu0 %v8881_v5 }
0x1029   :  { %v3228_v54 = vpop.f32.mrf.mxu0  ;;  %v3269_v55 = vpop.f32.mrf.mxu1 }
0x102a   :  { %v3229_v7 = vadd.f32 %v3228_v54, %v9016_v3  ;;  %v3270_v9 = vadd.f32 %v3269_v55, %v9017_v8 }
0x102b   :  { %v3230_v10 = vpop.f32.mrf.mxu0  ;;  %v3271_v1 = vpop.f32.mrf.mxu1 }
0x102c   :  { %v3452_v13 = vsub.f32 %v3229_v7, %v7961_v50  ;;  %v3458_v51 = vsub.f32 %v3229_v7, %v9019_v15  ;;  %v3454_v59 = vsub.f32 %v3270_v9, %v7964_v53  ;;  %v3460_v45 = vsub.f32 %v3270_v9, %v7360_v57 }
0x102d   :  { %v3231_v54 = vadd.f32 %v3230_v10, %v9020_v49  ;;  %v3272_v55 = vadd.f32 %v3271_v1, %v9021_v2  ;;  %v3232_v3 = vpop.f32.mrf.mxu0  ;;  %v3273_v8 = vpop.f32.mrf.mxu1 }
0x102e   :  { %v3464_v43 = vmul.f32 %v3452_v13, %v3452_v13  ;;  %v3493_v0 = vmul.f32 %v3458_v51, %v3458_v51  ;;  %v3495_v19 = vmul.f32 %v3460_v45, %v3460_v45  ;;  %v3466_v9 = vmul.f32 %v3454_v59, %v3454_v59 }
0x102f   :  { %v3453_v39 = vsub.f32 %v3231_v54, %v7969_v11  ;;  %v3459_v40 = vsub.f32 %v3231_v54, %v9022_v60  ;;  %v3455_v56 = vsub.f32 %v3272_v55, %v7972_v12  ;;  %v3461_v7 = vsub.f32 %v3272_v55, %v7388_v47  ;;  %v3233_v29 = vpop.f32.mrf.mxu0  ;;  %v3274_v63 = vpop.f32.mrf.mxu1 }
0x1030   :  { %v3505_v62 = vrot.slane %v3493_v0, 2  ;;  %v3470_v3 = vsel %vm1077_vm1, %v3464_v43, 0.0  ;;  %v3507_v8 = vrot.slane %v3495_v19, 2  ;;  %v3473_v26 = vsel %vm1077_vm1, %v3466_v9, 0.0  ;;  %v9023_v9 = vld [vmem:[#allocation92_spill] sm:$0xff] }
0x1031   :  { %v3465_v10 = vmul.f32 %v3453_v39, %v3453_v39  ;;  %v3494_v49 = vmul.f32 %v3459_v40, %v3459_v40  ;;  %v3496_v1 = vmul.f32 %v3461_v7, %v3461_v7  ;;  %v3467_v45 = vmul.f32 %v3455_v56, %v3455_v56 }
0x1032   :  { %v3517_v54 = vsel %vm1077_vm1, %v3505_v62, 0.0  ;;  %v3520_v40 = vsel %vm1077_vm1, %v3507_v8, 0.0  ;;  %v7993_v56 = vrot.slane %v7421_v18, 4 }
0x1033   :  { %v3471_v13 = vsel %vm1077_vm1, %v3465_v10, 0.0  ;;  %v3506_v51 = vrot.slane %v3494_v49, 2  ;;  %v3508_v63 = vrot.slane %v3496_v1, 2  ;;  %v3475_v55 = vsel %vm1077_vm1, %v3467_v45, 0.0 }
0x1034   :  { %v3472_v2 = vadd.f32 %v3471_v13, %v3470_v3  ;;  %v9024_v3 = vld [vmem:[#allocation93_spill] sm:$0xff] }
0x1035   :  { %v3518_v29 = vsel %vm1077_vm1, %v3506_v51, 0.0  ;;  %v3522_v39 = vsel %vm1077_vm1, %v3508_v63, 0.0  ;;  %v9026_v63 = vld [vmem:[#allocation95_spill] sm:$0xff] }
0x1036   :  { %v3519_v59 = vadd.f32 %v3518_v29, %v3517_v54  ;;  %v3474_v0 = vadd.f32 %v3473_v26, %v3472_v2  ;;  %v7998_v26 = vrot.slane %v7437_v20, 4  ;;  %v9025_v54 = vld [vmem:[#allocation94_spill] sm:$0xff] }
0x1038   :  { %v3476_v43 = vadd.f32 %v3475_v55, %v3474_v0  ;;  %v3521_v19 = vadd.f32 %v3520_v40, %v3519_v59 }
0x103a   :  { %v3523_v49 = vadd.f32 %v3522_v39, %v3521_v19 }
0x1049   :  { %v3310_v62 = vpop.f32.mrf.mxu0  ;;  %v3351_v7 = vpop.f32.mrf.mxu1 }
0x104a   :  { %v3311_v10 = vadd.f32 %v3310_v62, %v9023_v9  ;;  %v3352_v1 = vadd.f32 %v3351_v7, %v9024_v3 }
0x104b   :  { %v3312_v13 = vpop.f32.mrf.mxu0  ;;  %v3353_v2 = vpop.f32.mrf.mxu1 }
0x104c   :  { %v3456_v8 = vsub.f32 %v3311_v10, %v7993_v56  ;;  %v3462_v51 = vsub.f32 %v3311_v10, %v7424_v42  ;;  %v3540_v45 = vsub.f32 %v3352_v1, %v7961_v50  ;;  %v3546_v18 = vsub.f32 %v3352_v1, %v9019_v15 }
0x104d   :  { %v3313_v29 = vadd.f32 %v3312_v13, %v9025_v54  ;;  %v3354_v59 = vadd.f32 %v3353_v2, %v9026_v63  ;;  %v3314_v0 = vpop.f32.mrf.mxu0  ;;  %v3355_v40 = vpop.f32.mrf.mxu1 }
0x104e   :  { %v3468_v55 = vmul.f32 %v3456_v8, %v3456_v8  ;;  %v3497_v19 = vmul.f32 %v3462_v51, %v3462_v51  ;;  %v3552_v39 = vmul.f32 %v3540_v45, %v3540_v45  ;;  %v3581_v20 = vmul.f32 %v3546_v18, %v3546_v18 }
0x104f   :  { %v3457_v62 = vsub.f32 %v3313_v29, %v7998_v26  ;;  %v3463_v7 = vsub.f32 %v3313_v29, %v7440_v37  ;;  %v3541_v10 = vsub.f32 %v3354_v59, %v7969_v11  ;;  %v3547_v3 = vsub.f32 %v3354_v59, %v9022_v60  ;;  %v3315_v9 = vpop.f32.mrf.mxu0  ;;  %v3356_v15 = vpop.f32.mrf.mxu1 }
0x1050   :  { %v3509_v1 = vrot.slane %v3497_v19, 2  ;;  %v3593_v13 = vrot.slane %v3581_v20, 2  ;;  %v3477_v2 = vsel %vm1077_vm1, %v3468_v55, 0.0  ;;  %v3558_v45 = vsel %vm1077_vm1, %v3552_v39, 0.0 }
0x1051   :  { %v3469_v0 = vmul.f32 %v3457_v62, %v3457_v62  ;;  %v3498_v40 = vmul.f32 %v3463_v7, %v3463_v7  ;;  %v3553_v8 = vmul.f32 %v3541_v10, %v3541_v10  ;;  %v3582_v51 = vmul.f32 %v3547_v3, %v3547_v3  ;;  %v9029_v10 = vld [vmem:[#allocation98_spill] sm:$0xff] }
0x1052   :  { %v3478_v18 = vadd.f32 %v3477_v2, %v3476_v43  ;;  %v3524_v63 = vsel %vm1077_vm1, %v3509_v1, 0.0  ;;  %v3605_v55 = vsel %vm1077_vm1, %v3593_v13, 0.0  ;;  %v9030_v1 = vld [vmem:[#allocation99_spill] sm:$0xff]  ;;  %v9031_v13 = vld [vmem:[#allocation100_spill] sm:$0xff] }
0x1053   :  { %v3510_v29 = vrot.slane %v3498_v40, 2  ;;  %v3559_v54 = vsel %vm1077_vm1, %v3553_v8, 0.0  ;;  %v3594_v11 = vrot.slane %v3582_v51, 2  ;;  %v3479_v60 = vsel %vm1077_vm1, %v3469_v0, 0.0  ;;  %v9032_v51 = vld [vmem:[#allocation101_spill] sm:$0xff] }
0x1054   :  { %v3560_v9 = vadd.f32 %v3559_v54, %v3558_v45  ;;  %v8015_v59 = vadd.f32 %v3479_v60, %v3478_v18  ;;  %v3525_v19 = vadd.f32 %v3524_v63, %v3523_v49 }
0x1055   :  { %v3606_v20 = vsel %vm1077_vm1, %v3594_v11, 0.0  ;;  %v3526_v3 = vsel %vm1077_vm1, %v3510_v29, 0.0 }
0x1056   :  { %9027 = vst [vmem:[#allocation24_spill] sm:$0xff] %v8015_v59  ;;  %v3607_v39 = vadd.f32 %v3606_v20, %v3605_v55  ;;  %v8020_v43 = vadd.f32 %v3526_v3, %v3525_v19 }
0x1058   :  { %9028 = vst [vmem:[#allocation25_spill] sm:$0xff] %v8020_v43 }
0x1069   :  { %v3392_v62 = vpop.f32.mrf.mxu0  ;;  %v3433_v7 = vpop.f32.mrf.mxu1 }
0x106a   :  { %v3393_v15 = vadd.f32 %v3392_v62, %v9029_v10  ;;  %v3434_v2 = vadd.f32 %v3433_v7, %v9030_v1 }
0x106b   :  { %v3394_v0 = vpop.f32.mrf.mxu0  ;;  %v3435_v54 = vpop.f32.mrf.mxu1 }
0x106c   :  { %v3542_v40 = vsub.f32 %v3393_v15, %v7964_v53  ;;  %v3548_v49 = vsub.f32 %v3393_v15, %v7360_v57  ;;  %v3550_v63 = vsub.f32 %v3434_v2, %v7424_v42  ;;  %v3544_v11 = vsub.f32 %v3434_v2, %v7993_v56 }
0x106d   :  { %v3395_v8 = vadd.f32 %v3394_v0, %v9031_v13  ;;  %v3436_v45 = vadd.f32 %v3435_v54, %v9032_v51  ;;  %v3396_v18 = vpop.f32.mrf.mxu0  ;;  %v3437_v29 = vpop.f32.mrf.mxu1 }
0x106e   :  { %v3554_v60 = vmul.f32 %v3542_v40, %v3542_v40  ;;  %v3583_v19 = vmul.f32 %v3548_v49, %v3548_v49  ;;  %v3585_v55 = vmul.f32 %v3550_v63, %v3550_v63  ;;  %v3556_v54 = vmul.f32 %v3544_v11, %v3544_v11 }
0x106f   :  { %v3543_v20 = vsub.f32 %v3395_v8, %v7972_v12  ;;  %v3549_v3 = vsub.f32 %v3395_v8, %v7388_v47  ;;  %v3545_v62 = vsub.f32 %v3436_v45, %v7998_v26  ;;  %v3551_v57 = vsub.f32 %v3436_v45, %v7440_v37  ;;  %v3397_v42 = vpop.f32.mrf.mxu0  ;;  %v3438_v7 = vpop.f32.mrf.mxu1 }
0x1070   :  { %v3561_v15 = vsel %vm1077_vm1, %v3554_v60, 0.0  ;;  %v3595_v2 = vrot.slane %v3583_v19, 2  ;;  %v3597_v49 = vrot.slane %v3585_v55, 2  ;;  %v3565_v60 = vsel %vm1077_vm1, %v3556_v54, 0.0 }
0x1071   :  { %v3562_v0 = vadd.f32 %v3561_v15, %v3560_v9  ;;  %v3555_v18 = vmul.f32 %v3543_v20, %v3543_v20  ;;  %v3584_v29 = vmul.f32 %v3549_v3, %v3549_v3  ;;  %v3586_v63 = vmul.f32 %v3551_v57, %v3551_v57 }
0x1072   :  { %v3608_v40 = vsel %vm1077_vm1, %v3595_v2, 0.0  ;;  %v3557_v59 = vmul.f32 %v3545_v62, %v3545_v62  ;;  %v3612_v20 = vsel %vm1077_vm1, %v3597_v49, 0.0 }
0x1073   :  { %v3609_v43 = vadd.f32 %v3608_v40, %v3607_v39  ;;  %v3563_v47 = vsel %vm1077_vm1, %v3555_v18, 0.0  ;;  %v3596_v8 = vrot.slane %v3584_v29, 2  ;;  %v3598_v45 = vrot.slane %v3586_v63, 2  ;;  %v3809_v40 = vpop.permute.xlu1 %3808 }
0x1074   :  { %v3564_v51 = vadd.f32 %v3563_v47, %v3562_v0  ;;  %v3567_v11 = vsel %vm1077_vm1, %v3557_v59, 0.0 }
0x1075   :  { %v3610_v37 = vsel %vm1077_vm1, %v3596_v8, 0.0  ;;  %v3614_v39 = vsel %vm1077_vm1, %v3598_v45, 0.0 }
0x1076   :  { %v3566_v19 = vadd.f32 %v3565_v60, %v3564_v51  ;;  %v3611_v9 = vadd.f32 %v3610_v37, %v3609_v43 }
0x1078   :  { %v8041_v3 = vadd.f32 %v3567_v11, %v3566_v19  ;;  %v3613_v55 = vadd.f32 %v3612_v20, %v3611_v9 }
0x107a   :  { %v8044_v57 = vadd.f32 %v3614_v39, %v3613_v55 }
0x1089   :  { %v3672_v62 = vpop.f32.mrf.mxu0 }
0x108a   :  { %v3673_v42 = vadd.f32 %v7504_v35, %v3672_v62  ;;  %v5776_v35 = vld [vmem:[%s8685_s13 + $0x2a4] ss:$48 sps:$4 sm:$0xff]  }
0x108b   :  { %v5287_v7 = vpop.f32.mrf.mxu0 }
0x108c   :  { %v3678_v15 = vmax.f32 %v3673_v42, 0.0 }
0x108d   :  { %v3675_v2 = vpop.f32.mrf.mxu0 }
0x108e   :  { %v3679_v0 = vpack.c.bf16 %v3678_v15, %v3678_v15 }
0x108f   :  { %v5288_v51 = vpop.f32.mrf.mxu0 }
0x1090   :  { %5306 = vmatmul.mubr.bf16.vlgmr.msra.gmra.mxu1 %v3679_v0 }
0x1091   :  { %5330 = vmatpush3.bf16.msra.mxu1 %v7510_v31  ;;  %5345 = vmatprep.mubr.msk.bf16.mxu1 %vm5966_vm0, %v8881_v5 }
0x1092   :  { %5331 = vmatprep.subr.bf16.mxu1 %v8881_v5 }
0x1095   :  { %5332 = vmatpush3.bf16.msra.mxu1 %v7519_v58 }
0x1096   :  { %5333 = vmatprep.subr.bf16.mxu1 %v8881_v5 }
0x1099   :  { %5334 = vmatpush3.bf16.msra.mxu1 %v7526_v17 }
0x109a   :  { %5335 = vmatprep.subr.bf16.mxu1 %v8881_v5 }
0x109d   :  { %5336 = vmatpush3.bf16.msra.mxu1 %v7533_v36 }
0x109e   :  { %5337 = vmatprep.subr.bf16.mxu1 %v8881_v5 }
0x10a1   :  { %5338 = vmatpush3.bf16.msra.mxu1 %v7540_v14 }
0x10a2   :  { %5339 = vmatprep.subr.bf16.mxu1 %v8881_v5 }
0x10a5   :  { %5340 = vmatpush3.bf16.msra.mxu1 %v7547_v6 }
0x10a6   :  { %5341 = vmatprep.subr.bf16.mxu1 %v8881_v5 }
0x10a9   :  { %5342 = vmatpush3.bf16.msra.mxu1 %v7554_v16 }
0x10aa   :  { %5343 = vmatprep.subr.bf16.mxu1 %v8881_v5 }
0x10ad   :  { %5344 = vmatpush3.bf16.msra.mxu1 %v7561_v44 }
0x10ae   :  { %4061 = vmatprep.subr.bf16.mxu1 %v5776_v35 }
0x1150   :  { %v3714_v31 = vpop.f32.mrf.mxu1 }
0x1151   :  { %v8068_v58 = vadd.f32 %v7565_v34, %v3714_v31 }
0x1152   :  { %v5307_v17 = vpop.f32.mrf.mxu1 }
0x1153   :  { %3820 = vrot.lane.b32.xlu0 %v8068_v58, %s5968_s6  ;;  %v3721_v36 = vand.u32 2147483647, %v8068_v58  ;;  %v3720_v18 = vmax.f32 %v8068_v58, 0.0 }
0x1154   :  { %v3717_v14 = vpop.f32.mrf.mxu1 }
0x1155   :  { %v3722_v6 = vsub.f32 0.0, %v3721_v36 }
0x1156   :  { %v5308_v16 = vpop.f32.mrf.mxu1 }
0x1157   :  { %v3723_v59 = vmul.f32 1.442695, %v3722_v6 }
0x1159   :  { %5672 = vpow2.f32 %v3723_v59  ;;  %v9034_v59 = vld [vmem:[#allocation21_spill] sm:$0xff] }
0x1166   :  { %v5673_v44 = vpop.eup %5672 }
0x1167   :  { %v3725_v43 = vadd.f32 1.0, %v5673_v44  ;;  %v9035_v44 = vld [vmem:[#allocation17_spill] sm:$0xff] }
0x1169   :  { %5674 = vlog2.f32 %v3725_v43  ;;  %v1503_v43 = vsub.f32 %v9035_v44, %v9034_v59  ;;  %v9051_v59 = vld [vmem:[#allocation124_spill] sm:$0xff] }
0x1176   :  { %v5675_v54 = vpop.eup %5674 }
0x1177   :  { %v3727_v29 = vmul.f32 0.6931472, %v5675_v54  ;;  %v1510_v54 = vmul.f32 %v1503_v43, %v1503_v43  ;;  %v9052_v43 = vld [vmem:[#allocation125_spill] sm:$0xff] }
0x1179   :  { %v3728_v34 = vadd.f32 %v3727_v29, %v3720_v18  ;;  %v9036_v18 = vld [vmem:[#allocation18_spill] sm:$0xff] }
0x117b   :  { %v8074_v49 = vadd.f32 0.1, %v3728_v34 }
0x117d   :  { %v3811_v63 = vmul.f32 %v3809_v40, %v8074_v49 }
0x117f   :  { %3813 = vrot.lane.b32.xlu1 %v3811_v63, %s5969_s4 }
0x11c5   :  { %v3821_v47 = vpop.permute.xlu0 %3820 }
0x11c6   :  { %3823 = vst.msk [vmem:[#allocation2] sm:$0x3] %vm1589_vm8, %v3821_v47  ;;  %v1516_v47 = vmul.f32 2.0, %v9036_v18 }
0x11cd   :  { %v3824_v8 = vld [vmem:[#allocation2] sm:$0x3] }
0x11ce   :  { %v3825_v37 = vpack.c.bf16 %v3824_v8, %v3824_v8 }
0x11d0   :  { %5326 = vmatmul.mubr.msk.bf16.vlgmr.msra.gmra.mxu0 %vm1073_vm5, %v3825_v37  ;;  %v1517_v37 = vmul.f32 %v1516_v47, %v9036_v18  ;;  %v5790_v47 = vld [vmem:[%s8685_s13 + $0x1f0] ss:$48 sps:$4 sm:$0xff]   ;;  %vm4507_vm5 = vcmask 49200  }
0x11d1   :  { %5350 = vmatpush3.bf16.msra.mxu0 %v7582_v32  ;;  %5353 = vmatprep.mubr.msk.bf16.mxu0 %vm5966_vm0, %v8881_v5  ;;  %vm4497_vm0 = vcmask 8200  }
0x11d2   :  { %5351 = vmatprep.subr.bf16.mxu0 %v8881_v5  ;;  %v5777_v5 = vld [vmem:[%s8685_s13 + $0x124] ss:$48 sps:$4 sm:$0xff]  }
0x11d5   :  { %5352 = vmatpush3.bf16.msra.mxu0 %v7588_v38  ;;  %v5778_v38 = vld [vmem:[%s8685_s13 + $0x120] ss:$48 sps:$4 sm:$0xff]  }
0x11d6   :  { %4102 = vmatprep.subr.bf16.mxu0 %v7594_v48  ;;  %v5779_v48 = vld [vmem:[%s8685_s13 + $0xc4] ss:$48 sps:$4 sm:$0xff]  }
0x11f1   :  { %v3814_v45 = vpop.permute.xlu1 %3813 }
0x11f2   :  { %v3816_v60 = vadd.f32 %v3814_v45, %v8068_v58 }
0x11f4   :  { %3817 = vst.msk [vmem:[#allocation3] sm:$0x3] %vm1397_vm7, %v3816_v60 }
0x1290   :  { %v3863_v19 = vpop.f32.mrf.mxu0 }
0x1291   :  { %v3864_v9 = vadd.f32 %v7599_v22, %v3863_v19  ;;  %v5780_v22 = vld [vmem:[%s8685_s13 + $0xc0] ss:$48 sps:$4 sm:$0xff]  }
0x1292   :  { %v5327_v11 = vpop.f32.mrf.mxu0 }
0x1293   :  { %v3869_v20 = vmax.f32 %v3864_v9, 0.0 }
0x1294   :  { %v3866_v32 = vpop.f32.mrf.mxu0 }
0x1295   :  { %v3870_v55 = vpack.c.bf16 %v3869_v20, %v3869_v20  ;;  %v9037_v20 = vld [vmem:[#allocation110_spill] sm:$0xff] }
0x1296   :  { %v5328_v39 = vpop.f32.mrf.mxu0 }
0x1297   :  { %5346 = vmatmul.mubr.bf16.vlgmr.msra.gmra.mxu1 %v3870_v55  ;;  %v8166_v55 = vmul.f32 %v9036_v18, %v9036_v18  ;;  %v9038_v39 = vld [vmem:[#allocation111_spill] sm:$0xff] }
0x1298   :  { %4062 = vmatpush1.bf16.msra.mxu1 %v7605_v33  ;;  %4093 = vmatprep.mubr.bf16.mxu1 %v8927_v24  ;;  %v5781_v33 = vld [vmem:[%s8685_s13 + $0x64] ss:$48 sps:$4 sm:$0xff]  }
0x1299   :  { %4063 = vmatprep.subr.bf16.mxu1 %v7612_v21  ;;  %v5782_v21 = vld [vmem:[%s8685_s13 + $0x60] ss:$48 sps:$4 sm:$0xff]  }
0x129c   :  { %4064 = vmatpush1.bf16.msra.mxu1 %v7618_v23  ;;  %v5783_v23 = vld [vmem:[%s8685_s13 + $0x4] ss:$48 sps:$4 sm:$0xff]  }
0x129d   :  { %4065 = vmatprep.subr.bf16.mxu1 %v7624_v46  ;;  %v5784_v46 = vld [vmem:[%s8685_s13] ss:$48 sps:$4 sm:$0xff]  }
0x12a0   :  { %4066 = vmatpush1.bf16.msra.mxu1 %v7630_v52  ;;  %v5785_v52 = vld [vmem:[%s8685_s13 + $0x2b4] ss:$48 sps:$4 sm:$0xff]  }
0x12a1   :  { %4067 = vmatprep.subr.bf16.mxu1 %v7636_v41 }
0x12a4   :  { %4068 = vmatpush1.bf16.msra.mxu1 %v7642_v61 }
0x12a5   :  { %4069 = vmatprep.subr.bf16.mxu1 %v5777_v5 }
0x12a8   :  { %4070 = vmatpush1.bf16.msra.mxu1 %v5778_v38  ;;  %v9039_v38 = vld [vmem:[#allocation112_spill] sm:$0xff] }
0x12a9   :  { %4071 = vmatprep.subr.bf16.mxu1 %v5779_v48 }
0x12ac   :  { %4072 = vmatpush1.bf16.msra.mxu1 %v5780_v22  ;;  %v9040_v22 = vld [vmem:[#allocation113_spill] sm:$0xff] }
0x12ad   :  { %4073 = vmatprep.subr.bf16.mxu1 %v5781_v33  ;;  %v9043_v33 = vld [vmem:[#allocation116_spill] sm:$0xff] }
0x12b0   :  { %4074 = vmatpush1.bf16.msra.mxu1 %v5782_v21  ;;  %v9044_v21 = vld [vmem:[#allocation117_spill] sm:$0xff] }
0x12b1   :  { %4075 = vmatprep.subr.bf16.mxu1 %v5783_v23  ;;  %v9045_v23 = vld [vmem:[#allocation118_spill] sm:$0xff] }
0x12b4   :  { %4076 = vmatpush1.bf16.msra.mxu1 %v5784_v46  ;;  %v9046_v46 = vld [vmem:[#allocation119_spill] sm:$0xff] }
0x12b5   :  { %4143 = vmatprep.subr.bf16.mxu1 %v5785_v52  ;;  %v9047_v52 = vld [vmem:[#allocation120_spill] sm:$0xff] }
0x1357   :  { %v3905_v41 = vpop.f32.mrf.mxu1 }
0x1358   :  { %v8125_v61 = vadd.f32 %v7654_v4, %v3905_v41  ;;  %v9033_v4 = vrot.slane %v7954_v27, 4  ;;  %v9048_v41 = vld [vmem:[#allocation121_spill] sm:$0xff] }
0x1359   :  { %v5347_v62 = vpop.f32.mrf.mxu1 }
0x135a   :  { %v3912_v42 = vand.u32 2147483647, %v8125_v61  ;;  %v3911_v17 = vmax.f32 %v8125_v61, 0.0  ;;  %v9049_v62 = vld [vmem:[#allocation122_spill] sm:$0xff] }
0x135b   :  { %v3908_v7 = vpop.f32.mrf.mxu1 }
0x135c   :  { %v3913_v15 = vsub.f32 0.0, %v3912_v42 }
0x135d   :  { %v5348_v2 = vpop.f32.mrf.mxu1 }
0x135e   :  { %v3914_v0 = vmul.f32 1.442695, %v3913_v15 }
0x1360   :  { %5676 = vpow2.f32 %v3914_v0  ;;  %v1547_v0 = vmul.f32 %v9035_v44, %v9035_v44  ;;  %v9053_v44 = vld [vmem:[#allocation126_spill] sm:$0xff] }
0x136d   :  { %v5677_v51 = vpop.eup %5676 }
0x136e   :  { %v3916_v35 = vadd.f32 1.0, %v5677_v51 }
0x1370   :  { %5678 = vlog2.f32 %v3916_v35  ;;  %v9050_v35 = vld [vmem:[#allocation123_spill] sm:$0xff] }
0x1371   :  { %5680 = vlog2.f32 %v9036_v18  ;;  %v5786_v18 = vld [vmem:[%s8685_s13 + $0x250] ss:$48 sps:$4 sm:$0xff]  }
0x137d   :  { %v5679_v31 = vpop.eup %5678 }
0x137e   :  { %v3918_v36 = vmul.f32 0.6931472, %v5679_v31  ;;  %v5681_v34 = vpop.eup %5680 }
0x137f   :  { %v8149_v63 = vmul.f32 0.6931472, %v5681_v34  ;;  %v5789_v34 = vld [vmem:[%s8685_s13 + $0x1fc] ss:$48 sps:$4 sm:$0xff]  }
0x1380   :  { %v3919_v14 = vadd.f32 %v3918_v36, %v3911_v17 }
0x1382   :  { %v8129_v6 = vadd.f32 0.1, %v3919_v14 }
0x1384   :  { %v3999_v16 = vmul.f32 %v8129_v6, %v9033_v4 }
0x1386   :  { %4001 = vrot.lane.b32.xlu0 %v3999_v16, %s5969_s4 }
0x138a   :  { %3734 = vrot.lane.b32.xlu0 %v8068_v58, %s5970_s26 }
0x138e   :  { %4010 = vrot.lane.b32.xlu0 %v8125_v61, %s5969_s4 }
0x1392   :  { %1512 = vrot.lane.b32.xlu0 %v1510_v54, %s5958_s23  ;;  %v9054_v54 = vld [vmem:[#allocation127_spill] sm:$0xff] }
0x13f8   :  { %v4002_v29 = vpop.permute.xlu0 %4001 }
0x13f9   :  { %v4004_v27 = vadd.f32 %v4002_v29, %v8125_v61  ;;  %v5787_v29 = vld [vmem:[%s8685_s13 + $0x258] ss:$48 sps:$4 sm:$0xff]  }
0x13fb   :  { %4006 = vrot.lane.b32.xlu1 %v4004_v27, %s5958_s23  ;;  %v5788_v27 = vld [vmem:[%s8685_s13 + $0x1f4] ss:$48 sps:$4 sm:$0xff]  }
0x13fc   :  { %v8145_v40 = vpop.permute.xlu0 %3734 }
0x13fd   :  { %3818 = vst.msk [vmem:[#allocation3 + $0x2] sm:$0x3] %vm1397_vm7, %v8145_v40 }
0x13ff   :  { %1505 = vrot.lane.b32.xlu1 %v8149_v63, %s5972_s12 }
0x1400   :  { %v4011_v8 = vpop.permute.xlu0 %4010 }
0x1401   :  { %4013 = vst.msk [vmem:[#allocation3 + $0x2] sm:$0x3] %vm1775_vm11, %v4011_v8  ;;  %v5791_v8 = vld [vmem:[%s8685_s13 + $0x1f8] ss:$48 sps:$4 sm:$0xff]  }
0x1403   :  { %1519 = vrot.lane.b32.xlu1 %v1517_v37, %s5970_s26  ;;  %v5792_v37 = vld [vmem:[%s8685_s13 + $0x194] ss:$48 sps:$4 sm:$0xff]  }
0x1404   :  { %v1513_v32 = vpop.permute.xlu0 %1512 }
0x1405   :  { %v1515_v5 = vadd.f32 %v1513_v32, %v8166_v55  ;;  %v5799_v32 = vld [vmem:[%s8685_s13 + $0x138] ss:$48 sps:$4 sm:$0xff]  }
0x146d   :  { %v4007_v45 = vpop.permute.xlu1 %4006 }
0x146e   :  { %4009 = vst.msk [vmem:[#allocation3] sm:$0x3] %vm1775_vm11, %v4007_v45  ;;  %v5793_v45 = vld [vmem:[%s8685_s13 + $0x19c] ss:$48 sps:$4 sm:$0xff]  }
0x1471   :  { %v1506_v60 = vpop.permute.xlu1 %1505 }
0x1472   :  { %v1508_v42 = vsub.f32 %v8149_v63, %v1506_v60  ;;  %v5794_v60 = vld [vmem:[%s8685_s13 + $0x190] ss:$48 sps:$4 sm:$0xff]  }
0x1474   :  { %v4647_v7 = vadd.f32 -0.5, %v1508_v42  ;;  %v5815_v42 = vld [vmem:[%s8685_s13 + $0x2c8] ss:$48 sps:$4 sm:$0xff]  }
0x1475   :  { %v1520_v19 = vpop.permute.xlu1 %1519  ;;  %v4014_v9 = vld [vmem:[#allocation3] sm:$0xf] }
0x1476   :  { %5682 = vrcp.f32 %v1520_v19  ;;  %v4015_v11 = vpack.c.bf16 %v4014_v9, %v4014_v9  ;;  %v5795_v19 = vld [vmem:[%s8685_s13 + $0x198] ss:$48 sps:$4 sm:$0xff]   ;;  %v5796_v9 = vld [vmem:[%s8685_s13 + $0x134] ss:$48 sps:$4 sm:$0xff]  }
0x1478   :  { %5354 = vmatmul.mubr.msk.bf16.vlgmr.msra.gmra.mxu0 %vm1795_vm12, %v4015_v11  ;;  %v5797_v11 = vld [vmem:[%s8685_s13 + $0x13c] ss:$48 sps:$4 sm:$0xff]  }
0x1479   :  { %4103 = vmatpush1.bf16.msra.mxu0 %v7693_v25  ;;  %4134 = vmatprep.mubr.bf16.mxu0 %v8927_v24 }
0x147a   :  { %4104 = vmatprep.subr.bf16.mxu0 %v7700_v28  ;;  %v9041_v28 = vld [vmem:[#allocation114_spill] sm:$0xff] }
0x147d   :  { %4105 = vmatpush1.bf16.msra.mxu0 %v7706_v30  ;;  %v9042_v30 = vld [vmem:[#allocation115_spill] sm:$0xff] }
0x147e   :  { %4106 = vmatprep.subr.bf16.mxu0 %v9037_v20  ;;  %v5798_v20 = vld [vmem:[%s8685_s13 + $0x130] ss:$48 sps:$4 sm:$0xff]  }
0x1481   :  { %4107 = vmatpush1.bf16.msra.mxu0 %v9038_v39  ;;  %v5800_v39 = vld [vmem:[%s8685_s13 + $0xd4] ss:$48 sps:$4 sm:$0xff]  }
0x1482   :  { %4108 = vmatprep.subr.bf16.mxu0 %v9039_v38  ;;  %v5802_v38 = vld [vmem:[%s8685_s13 + $0xd0] ss:$48 sps:$4 sm:$0xff]  }
0x1483   :  { %v5683_v25 = vpop.eup %5682 }
0x1484   :  { %v1523_v48 = vmul.f32 %v5683_v25, %v1515_v5  ;;  %v5801_v5 = vld [vmem:[%s8685_s13 + $0xdc] ss:$48 sps:$4 sm:$0xff]   ;;  %v5803_v25 = vld [vmem:[%s8685_s13 + $0xd8] ss:$48 sps:$4 sm:$0xff]  }
0x1485   :  { %4109 = vmatpush1.bf16.msra.mxu0 %v9040_v22  ;;  %v5805_v22 = vld [vmem:[%s8685_s13 + $0x7c] ss:$48 sps:$4 sm:$0xff]  }
0x1486   :  { %1525 = vrot.lane.b32.xlu0 %v1523_v48, %s5972_s12  ;;  %4110 = vmatprep.subr.bf16.mxu0 %v9041_v28  ;;  %v5804_v48 = vld [vmem:[%s8685_s13 + $0x74] ss:$48 sps:$4 sm:$0xff]   ;;  %v5806_v28 = vld [vmem:[%s8685_s13 + $0x70] ss:$48 sps:$4 sm:$0xff]  }
0x1489   :  { %4111 = vmatpush1.bf16.msra.mxu0 %v9042_v30  ;;  %v5807_v30 = vld [vmem:[%s8685_s13 + $0x78] ss:$48 sps:$4 sm:$0xff]  }
0x148a   :  { %4112 = vmatprep.subr.bf16.mxu0 %v9043_v33  ;;  %v5808_v33 = vld [vmem:[%s8685_s13 + $0x14] ss:$48 sps:$4 sm:$0xff]  }
0x148d   :  { %4113 = vmatpush1.bf16.msra.mxu0 %v9044_v21  ;;  %v5809_v21 = vld [vmem:[%s8685_s13 + $0x1c] ss:$48 sps:$4 sm:$0xff]  }
0x148e   :  { %4114 = vmatprep.subr.bf16.mxu0 %v9045_v23  ;;  %v5810_v23 = vld [vmem:[%s8685_s13 + $0x10] ss:$48 sps:$4 sm:$0xff]  }
0x1491   :  { %4115 = vmatpush1.bf16.msra.mxu0 %v9046_v46  ;;  %v5811_v46 = vld [vmem:[%s8685_s13 + $0x18] ss:$48 sps:$4 sm:$0xff]  }
0x1492   :  { %4116 = vmatprep.subr.bf16.mxu0 %v9047_v52  ;;  %v5812_v52 = vld [vmem:[%s8685_s13 + $0x2c4] ss:$48 sps:$4 sm:$0xff]  }
0x1495   :  { %4117 = vmatpush1.bf16.msra.mxu0 %v9048_v41  ;;  %v5813_v41 = vld [vmem:[%s8685_s13 + $0x2cc] ss:$48 sps:$4 sm:$0xff]  }
0x1496   :  { %4184 = vmatprep.subr.bf16.mxu0 %v9049_v62  ;;  %v5814_v62 = vld [vmem:[%s8685_s13 + $0x2c0] ss:$48 sps:$4 sm:$0xff]  }
0x14f8   :  { %v1526_v15 = vpop.permute.xlu0 %1525 }
0x14f9   :  { %v1528_v2 = vadd.f32 %v4647_v7, %v1526_v15  ;;  %v5816_v7 = vld [vmem:[%s8685_s13 + $0x264] ss:$48 sps:$4 sm:$0xff]   ;;  %v5817_v15 = vld [vmem:[%s8685_s13 + $0x26c] ss:$48 sps:$4 sm:$0xff]  }
0x14fb   :  { %1530 = vrot.lane.b32.xlu1 %v1528_v2, %s5967_s29  ;;  %v5818_v2 = vld [vmem:[%s8685_s13 + $0x260] ss:$48 sps:$4 sm:$0xff]  }
0x14ff   :  { %1549 = vrot.lane.b32.xlu1 %v1547_v0, %s5958_s23  ;;  %v5819_v0 = vld [vmem:[%s8685_s13 + $0x268] ss:$48 sps:$4 sm:$0xff]  }
0x1538   :  { %v4053_v51 = vpop.f32.mrf.mxu0 }
0x1539   :  { %v4054_v31 = vadd.f32 %v9050_v35, %v4053_v51  ;;  %v5820_v51 = vld [vmem:[%s8685_s13 + $0x204] ss:$48 sps:$4 sm:$0xff]   ;;  %v5821_v35 = vld [vmem:[%s8685_s13 + $0x20c] ss:$48 sps:$4 sm:$0xff]  }
0x153a   :  { %v5355_v17 = vpop.f32.mrf.mxu0 }
0x153b   :  { %v4059_v36 = vmax.f32 %v4054_v31, 0.0  ;;  %v5823_v31 = vld [vmem:[%s8685_s13 + $0x208] ss:$48 sps:$4 sm:$0xff]   ;;  %v5824_v17 = vld [vmem:[%s8685_s13 + $0x1a4] ss:$48 sps:$4 sm:$0xff]  }
0x153c   :  { %v4056_v14 = vpop.f32.mrf.mxu0 }
0x153d   :  { %v8188_v4 = vpack.c.bf16 %v4059_v36, %v4059_v36  ;;  %v5825_v36 = vld [vmem:[%s8685_s13 + $0x1ac] ss:$48 sps:$4 sm:$0xff]   ;;  %v5826_v14 = vld [vmem:[%s8685_s13 + $0x1a0] ss:$48 sps:$4 sm:$0xff]  }
0x153e   :  { %v5356_v16 = vpop.f32.mrf.mxu0 }
0x153f   :  { %4094 = vmatmul.mubr.bf16.vlgmr.msra.gmra.mxu1 %v8188_v4  ;;  %4135 = vmatmul.mubr.bf16.vlgmr.msra.gmra.mxu0 %v8188_v4  ;;  %v5827_v16 = vld [vmem:[%s8685_s13 + $0x1a8] ss:$48 sps:$4 sm:$0xff]  }
0x1540   :  { %4144 = vmatpush1.bf16.msra.mxu1 %v9051_v59  ;;  %4185 = vmatpush1.bf16.msra.mxu0 %v9052_v43  ;;  %v5828_v43 = vld [vmem:[%s8685_s13 + $0x144] ss:$48 sps:$4 sm:$0xff]  }
0x1541   :  { %4145 = vmatprep.subr.bf16.mxu1 %v9053_v44  ;;  %4186 = vmatprep.subr.bf16.mxu0 %v9054_v54  ;;  %v5829_v44 = vld [vmem:[%s8685_s13 + $0x14c] ss:$48 sps:$4 sm:$0xff]  }
0x1542   :  { %4175 = vmatprep.mubr.bf16.mxu1 %v8927_v24  ;;  %4216 = vmatprep.mubr.bf16.mxu0 %v8927_v24 }
0x1544   :  { %4146 = vmatpush1.bf16.msra.mxu1 %v5786_v18  ;;  %4187 = vmatpush1.bf16.msra.mxu0 %v5787_v29  ;;  %v5830_v18 = vld [vmem:[%s8685_s13 + $0x140] ss:$48 sps:$4 sm:$0xff]   ;;  %v5831_v29 = vld [vmem:[%s8685_s13 + $0x148] ss:$48 sps:$4 sm:$0xff]  }
0x1545   :  { %4147 = vmatprep.subr.bf16.mxu1 %v5788_v27  ;;  %4188 = vmatprep.subr.bf16.mxu0 %v5789_v34  ;;  %v5832_v34 = vld [vmem:[%s8685_s13 + $0xe4] ss:$48 sps:$4 sm:$0xff]  }
0x1548   :  { %4148 = vmatpush1.bf16.msra.mxu1 %v5790_v47  ;;  %4189 = vmatpush1.bf16.msra.mxu0 %v5791_v8  ;;  %v5833_v47 = vld [vmem:[%s8685_s13 + $0xec] ss:$48 sps:$4 sm:$0xff]  }
0x1549   :  { %4149 = vmatprep.subr.bf16.mxu1 %v5792_v37  ;;  %4190 = vmatprep.subr.bf16.mxu0 %v5793_v45  ;;  %v9055_v37 = vld [vmem:[#allocation20_spill] sm:$0xff]  ;;  %v1546_v45 = vsub.f32 0.0, %v8149_v63  ;;  %v5837_v63 = vld [vmem:[%s8685_s13 + $0x8c] ss:$48 sps:$4 sm:$0xff]  }
0x154a   :  { %5684 = vlog2.f32 %v9055_v37 }
0x154c   :  { %4150 = vmatpush1.bf16.msra.mxu1 %v5794_v60  ;;  %4191 = vmatpush1.bf16.msra.mxu0 %v5795_v19  ;;  %v5834_v19 = vld [vmem:[%s8685_s13 + $0xe0] ss:$48 sps:$4 sm:$0xff]  }
0x154d   :  { %4151 = vmatprep.subr.bf16.mxu1 %v5796_v9  ;;  %4192 = vmatprep.subr.bf16.mxu0 %v5797_v11  ;;  %v5835_v9 = vld [vmem:[%s8685_s13 + $0xe8] ss:$48 sps:$4 sm:$0xff]   ;;  %v5836_v11 = vld [vmem:[%s8685_s13 + $0x84] ss:$48 sps:$4 sm:$0xff]  }
0x1550   :  { %4152 = vmatpush1.bf16.msra.mxu1 %v5798_v20  ;;  %4193 = vmatpush1.bf16.msra.mxu0 %v5799_v32  ;;  %v5838_v32 = vld [vmem:[%s8685_s13 + $0x80] ss:$48 sps:$4 sm:$0xff]  }
0x1551   :  { %4153 = vmatprep.subr.bf16.mxu1 %v5800_v39  ;;  %4194 = vmatprep.subr.bf16.mxu0 %v5801_v5  ;;  %v5839_v39 = vld [vmem:[%s8685_s13 + $0x88] ss:$48 sps:$4 sm:$0xff]   ;;  %v5840_v5 = vld [vmem:[%s8685_s13 + $0x24] ss:$48 sps:$4 sm:$0xff]  }
0x1554   :  { %4154 = vmatpush1.bf16.msra.mxu1 %v5802_v38  ;;  %4195 = vmatpush1.bf16.msra.mxu0 %v5803_v25  ;;  %v5841_v38 = vld [vmem:[%s8685_s13 + $0x2c] ss:$48 sps:$4 sm:$0xff]   ;;  %v5842_v25 = vld [vmem:[%s8685_s13 + $0x20] ss:$48 sps:$4 sm:$0xff]  }
0x1555   :  { %4155 = vmatprep.subr.bf16.mxu1 %v5804_v48  ;;  %4196 = vmatprep.subr.bf16.mxu0 %v5805_v22  ;;  %v5843_v48 = vld [vmem:[%s8685_s13 + $0x28] ss:$48 sps:$4 sm:$0xff]  }
0x1557   :  { %v5685_v22 = vpop.eup %5684 }
0x1558   :  { %4156 = vmatpush1.bf16.msra.mxu1 %v5806_v28  ;;  %4197 = vmatpush1.bf16.msra.mxu0 %v5807_v30  ;;  %v8383_v28 = vmul.f32 0.6931472, %v5685_v22  ;;  %v1708_v30 = vmul.f32 2.0, %v9055_v37 }
0x1559   :  { %4157 = vmatprep.subr.bf16.mxu1 %v5808_v33  ;;  %4198 = vmatprep.subr.bf16.mxu0 %v5809_v21 }
0x155a   :  { %v1709_v33 = vmul.f32 %v1708_v30, %v9055_v37 }
0x155c   :  { %4158 = vmatpush1.bf16.msra.mxu1 %v5810_v23  ;;  %4199 = vmatpush1.bf16.msra.mxu0 %v5811_v46 }
0x155d   :  { %4225 = vmatprep.subr.bf16.mxu1 %v5812_v52  ;;  %4266 = vmatprep.subr.bf16.mxu0 %v5813_v41  ;;  %v9056_v52 = vld [vmem:[#allocation22_spill] sm:$0xff]  ;;  %v9057_v41 = vld [vmem:[#allocation19_spill] sm:$0xff] }
0x155f   :  { %4176 = vmatmul.mubr.bf16.vlgmr.msra.gmra.mxu1 %v8188_v4  ;;  %4217 = vmatmul.mubr.bf16.vlgmr.msra.gmra.mxu0 %v8188_v4 }
0x1560   :  { %4226 = vmatpush1.bf16.msra.mxu1 %v5814_v62  ;;  %4267 = vmatpush1.bf16.msra.mxu0 %v5815_v42 }
0x1561   :  { %4227 = vmatprep.subr.bf16.mxu1 %v5816_v7  ;;  %4268 = vmatprep.subr.bf16.mxu0 %v5817_v15 }
0x1562   :  { %4257 = vmatprep.mubr.bf16.mxu1 %v8927_v24  ;;  %4298 = vmatprep.mubr.bf16.mxu0 %v8927_v24  ;;  %v5822_v24 = vld [vmem:[%s8685_s13 + $0x200] ss:$48 sps:$4 sm:$0xff]  }
0x1564   :  { %4228 = vmatpush1.bf16.msra.mxu1 %v5818_v2  ;;  %4269 = vmatpush1.bf16.msra.mxu0 %v5819_v0  ;;  %v8396_v2 = vld [vmem:[%s8672_s0 + $0x10] sm:$0xff] }
0x1565   :  { %4229 = vmatprep.subr.bf16.mxu1 %v5820_v51  ;;  %4270 = vmatprep.subr.bf16.mxu0 %v5821_v35  ;;  %v4309_v0 = vrot.slane %v8396_v2, 6  ;;  %v8402_v51 = vld [vmem:[%s8672_s0] sm:$0xff] }
0x1566   :  { %v4307_v35 = vrot.slane %v8402_v51, 6 }
0x1568   :  { %4230 = vmatpush1.bf16.msra.mxu1 %v5822_v24  ;;  %4271 = vmatpush1.bf16.msra.mxu0 %v5823_v31 }
0x1569   :  { %4231 = vmatprep.subr.bf16.mxu1 %v5824_v17  ;;  %4272 = vmatprep.subr.bf16.mxu0 %v5825_v36  ;;  %v9058_v36 = vld [vmem:[#allocation86_spill] sm:$0xff] }
0x156c   :  { %4232 = vmatpush1.bf16.msra.mxu1 %v5826_v14  ;;  %4273 = vmatpush1.bf16.msra.mxu0 %v5827_v16  ;;  %v9059_v16 = vld [vmem:[#allocation85_spill] sm:$0xff] }
0x156d   :  { %v1531_v59 = vpop.permute.xlu1 %1530  ;;  %4233 = vmatprep.subr.bf16.mxu1 %v5828_v43  ;;  %4274 = vmatprep.subr.bf16.mxu0 %v5829_v44  ;;  %v8411_v44 = vld [vmem:[%s8672_s0 + $0x8] sm:$0xff] }
0x156e   :  { %v1533_v54 = vsel %vm1397_vm7, %v1531_v59, 0.0 }
0x156f   :  { %1534 = vadd.xlane.f32.xlu0 %v1533_v54  ;;  %v4308_v54 = vrot.slane %v8411_v44, 6 }
0x1570   :  { %4234 = vmatpush1.bf16.msra.mxu1 %v5830_v18  ;;  %4275 = vmatpush1.bf16.msra.mxu0 %v5831_v29  ;;  %v8417_v29 = vld [vmem:[%s8672_s0 + $0x18] sm:$0xff] }
0x1571   :  { %v1550_v27 = vpop.permute.xlu1 %1549  ;;  %4235 = vmatprep.subr.bf16.mxu1 %v5832_v34  ;;  %4276 = vmatprep.subr.bf16.mxu0 %v5833_v47 }
0x1572   :  { %v1552_v8 = vadd.f32 %v1550_v27, %v8166_v55  ;;  %v4310_v27 = vrot.slane %v8417_v29, 6 }
0x1574   :  { %v1553_v60 = vmul.f32 0.5, %v1552_v8  ;;  %4236 = vmatpush1.bf16.msra.mxu1 %v5834_v19  ;;  %4277 = vmatpush1.bf16.msra.mxu0 %v5835_v9  ;;  %v9060_v19 = vld [vmem:[#allocation89_spill] sm:$0xff] }
0x1575   :  { %4237 = vmatprep.subr.bf16.mxu1 %v5836_v11  ;;  %4278 = vmatprep.subr.bf16.mxu0 %v5837_v63  ;;  %v9061_v11 = vld [vmem:[#allocation90_spill] sm:$0xff] }
0x1576   :  { %v1554_v55 = vadd.f32 %v1553_v60, %v1546_v45 }
0x1578   :  { %v4648_v20 = vadd.f32 -0.5, %v1554_v55  ;;  %4238 = vmatpush1.bf16.msra.mxu1 %v5838_v32  ;;  %4279 = vmatpush1.bf16.msra.mxu0 %v5839_v39 }
0x1579   :  { %4239 = vmatprep.subr.bf16.mxu1 %v5840_v5  ;;  %4280 = vmatprep.subr.bf16.mxu0 %v5841_v38 }
0x157a   :  { %1557 = vrot.lane.b32.xlu1 %v4648_v20, %s5969_s4 }
0x157c   :  { %4240 = vmatpush1.bf16.msra.mxu1 %v5842_v25  ;;  %4281 = vmatpush1.bf16.msra.mxu0 %v5843_v48  ;;  %v9062_v48 = vld [vmem:[#allocation23_spill] sm:$0xff] }
0x157f   :  { %4258 = vmatmul.mubr.bf16.vlgmr.msra.gmra.mxu1 %v8188_v4  ;;  %4299 = vmatmul.mubr.bf16.vlgmr.msra.gmra.mxu0 %v8188_v4  ;;  %v1695_v4 = vsub.f32 %v9057_v41, %v9056_v52 }
0x1581   :  { %v1702_v15 = vmul.f32 %v1695_v4, %v1695_v4 }
0x1585   :  { %1697 = vrot.lane.b32.xlu0 %v8383_v28, %s5972_s12 }
0x1589   :  { %1711 = vrot.lane.b32.xlu0 %v1709_v33, %s5970_s26 }
0x15ec   :  { %v1558_v21 = vpop.permute.xlu1 %1557 }
0x15ed   :  { %v1560_v23 = vsel %vm1397_vm7, %v1558_v21, 0.0 }
0x15ee   :  { %1561 = vadd.xlane.f32.xlu1 %v1560_v23 }
0x15f8   :  { %v1535_v46 = vpop.xlane.xlu0 %1534 }
0x15f9   :  { %v1536_v62 = vrot.slane %v1535_v46, 4 }
0x15fb   :  { %v1537_v42 = vadd.f32 %v1536_v62, %v1535_v46 }
0x15fd   :  { %v1538_v7 = vrot.slane %v1537_v42, 2 }
0x15ff   :  { %v4136_v24 = vpop.f32.mrf.mxu0  ;;  %1704 = vrot.lane.b32.xlu1 %v1702_v15, %s5958_s23  ;;  %v4095_v31 = vpop.f32.mrf.mxu1  ;;  %v1539_v17 = vadd.f32 %v1538_v7, %v1537_v42 }
0x1600   :  { %v4137_v14 = vadd.f32 %v4136_v24, %v9058_v36  ;;  %v4096_v59 = vadd.f32 %v4095_v31, %v9059_v16 }
0x1601   :  { %v4097_v43 = vpop.f32.mrf.mxu1  ;;  %v4138_v18 = vpop.f32.mrf.mxu0  ;;  %v1540_v34 = vrot.slane %v1539_v17, 1 }
0x1602   :  { %v4321_v47 = vsub.f32 %v4137_v14, %v4309_v0  ;;  %v4327_v8 = vsub.f32 %v4137_v14, %v7964_v53  ;;  %v4319_v45 = vsub.f32 %v4096_v59, %v4307_v35  ;;  %v4325_v60 = vsub.f32 %v4096_v59, %v7961_v50 }
0x1603   :  { %v4098_v9 = vadd.f32 %v4097_v43, %v9060_v19  ;;  %v4139_v63 = vadd.f32 %v4138_v18, %v9061_v11  ;;  %v4099_v55 = vpop.f32.mrf.mxu1  ;;  %v4140_v20 = vpop.f32.mrf.mxu0  ;;  %v1541_v32 = vadd.f32 %v1540_v34, %v1539_v17  ;;  %v5848_v11 = vld [vmem:[%s8672_s0 + $0x20] sm:$0xff] }
0x1604   :  { %v4362_v39 = vmul.f32 %v4327_v8, %v4327_v8  ;;  %v4331_v5 = vmul.f32 %v4319_v45, %v4319_v45  ;;  %v4360_v38 = vmul.f32 %v4325_v60, %v4325_v60  ;;  %v4333_v46 = vmul.f32 %v4321_v47, %v4321_v47 }
0x1605   :  { %v4320_v25 = vsub.f32 %v4098_v9, %v4308_v54  ;;  %v4326_v22 = vsub.f32 %v4098_v9, %v9062_v48  ;;  %v4322_v30 = vsub.f32 %v4139_v63, %v4310_v27  ;;  %v4328_v33 = vsub.f32 %v4139_v63, %v7972_v12  ;;  %5357 = vpush %v1541_v32  ;;  %v4100_v21 = vpop.f32.mrf.mxu1  ;;  %v4141_v23 = vpop.f32.mrf.mxu0  ;;  %v9063_v32 = vld [vmem:[#allocation92_spill] sm:$0xff] }
0x1606   :  { %v4372_v52 = vrot.slane %v4360_v38, 2  ;;  %v4374_v7 = vrot.slane %v4362_v39, 2  ;;  %v4337_v15 = vsel %vm1077_vm1, %v4331_v5, 0.0  ;;  %v4340_v14 = vsel %vm1077_vm1, %v4333_v46, 0.0  ;;  %v9064_v5 = vld [vmem:[#allocation93_spill] sm:$0xff] }
0x1607   :  { %v4332_v4 = vmul.f32 %v4320_v25, %v4320_v25  ;;  %v4361_v62 = vmul.f32 %v4326_v22, %v4326_v22  ;;  %v4363_v42 = vmul.f32 %v4328_v33, %v4328_v33  ;;  %v4334_v17 = vmul.f32 %v4322_v30, %v4322_v30  ;;  %v8450_v22 = vld [vmem:[%s8672_s0 + $0x28] sm:$0xff] }
0x1608   :  { %v4384_v16 = vsel %vm1077_vm1, %v4372_v52, 0.0  ;;  %v4387_v47 = vsel %vm1077_vm1, %v4374_v7, 0.0  ;;  %v4311_v63 = vrot.slane %v5848_v11, 6  ;;  %v4312_v30 = vrot.slane %v8450_v22, 6 }
0x1609   :  { %v4338_v24 = vsel %vm1077_vm1, %v4332_v4, 0.0  ;;  %v4373_v31 = vrot.slane %v4361_v62, 2  ;;  %v4375_v43 = vrot.slane %v4363_v42, 2  ;;  %v4342_v8 = vsel %vm1077_vm1, %v4334_v17, 0.0  ;;  %v9065_v4 = vld [vmem:[#allocation94_spill] sm:$0xff]  ;;  %v9066_v42 = vld [vmem:[#allocation95_spill] sm:$0xff] }
0x160a   :  { %v4339_v36 = vadd.f32 %v4338_v24, %v4337_v15 }
0x160b   :  { %v4385_v59 = vsel %vm1077_vm1, %v4373_v31, 0.0  ;;  %v4389_v19 = vsel %vm1077_vm1, %v4375_v43, 0.0 }
0x160c   :  { %v4386_v18 = vadd.f32 %v4385_v59, %v4384_v16  ;;  %v4341_v34 = vadd.f32 %v4340_v14, %v4339_v36 }
0x160e   :  { %v4343_v45 = vadd.f32 %v4342_v8, %v4341_v34  ;;  %v4388_v60 = vadd.f32 %v4387_v47, %v4386_v18 }
0x1610   :  { %v4390_v9 = vadd.f32 %v4389_v19, %v4388_v60 }
0x161f   :  { %v4177_v55 = vpop.f32.mrf.mxu1  ;;  %v4218_v20 = vpop.f32.mrf.mxu0 }
0x1620   :  { %v4178_v39 = vadd.f32 %v4177_v55, %v9063_v32  ;;  %v4219_v38 = vadd.f32 %v4218_v20, %v9064_v5 }
0x1621   :  { %v4179_v25 = vpop.f32.mrf.mxu1  ;;  %v4220_v33 = vpop.f32.mrf.mxu0 }
0x1622   :  { %v4323_v21 = vsub.f32 %v4178_v39, %v4311_v63  ;;  %v4329_v23 = vsub.f32 %v4178_v39, %v7993_v56  ;;  %v4407_v46 = vsub.f32 %v4219_v38, %v4307_v35  ;;  %v4413_v52 = vsub.f32 %v4219_v38, %v7961_v50 }
0x1623   :  { %v4180_v62 = vadd.f32 %v4179_v25, %v9065_v4  ;;  %v4221_v7 = vadd.f32 %v4220_v33, %v9066_v42  ;;  %v4181_v15 = vpop.f32.mrf.mxu1  ;;  %v4222_v24 = vpop.f32.mrf.mxu0 }
0x1624   :  { %v4335_v31 = vmul.f32 %v4323_v21, %v4323_v21  ;;  %v4364_v17 = vmul.f32 %v4329_v23, %v4329_v23  ;;  %v4419_v36 = vmul.f32 %v4407_v46, %v4407_v46  ;;  %v4448_v14 = vmul.f32 %v4413_v52, %v4413_v52 }
0x1625   :  { %v4324_v16 = vsub.f32 %v4180_v62, %v4312_v30  ;;  %v4330_v59 = vsub.f32 %v4180_v62, %v7998_v26  ;;  %v4408_v43 = vsub.f32 %v4221_v7, %v4308_v54  ;;  %v4414_v51 = vsub.f32 %v4221_v7, %v9062_v48  ;;  %v4182_v35 = vpop.f32.mrf.mxu1  ;;  %v4223_v50 = vpop.f32.mrf.mxu0 }
0x1626   :  { %v4376_v18 = vrot.slane %v4364_v17, 2  ;;  %v4460_v34 = vrot.slane %v4448_v14, 2  ;;  %v4344_v47 = vsel %vm1077_vm1, %v4335_v31, 0.0  ;;  %v4425_v55 = vsel %vm1077_vm1, %v4419_v36, 0.0  ;;  %v9067_v36 = vld [vmem:[#allocation101_spill] sm:$0xff] }
0x1627   :  { %v4336_v8 = vmul.f32 %v4324_v16, %v4324_v16  ;;  %v4365_v60 = vmul.f32 %v4330_v59, %v4330_v59  ;;  %v4420_v19 = vmul.f32 %v4408_v43, %v4408_v43  ;;  %v4449_v11 = vmul.f32 %v4414_v51, %v4414_v51 }
0x1628   :  { %v4345_v20 = vadd.f32 %v4344_v47, %v4343_v45  ;;  %v4391_v32 = vsel %vm1077_vm1, %v4376_v18, 0.0  ;;  %v4472_v22 = vsel %vm1077_vm1, %v4460_v34, 0.0 }
0x1629   :  { %v4377_v39 = vrot.slane %v4365_v60, 2  ;;  %v4426_v44 = vsel %vm1077_vm1, %v4420_v19, 0.0  ;;  %v4461_v54 = vrot.slane %v4449_v11, 2  ;;  %v4346_v48 = vsel %vm1077_vm1, %v4336_v8, 0.0 }
0x162a   :  { %v4427_v5 = vadd.f32 %v4426_v44, %v4425_v55  ;;  %v8468_v38 = vadd.f32 %v4346_v48, %v4345_v20  ;;  %v4392_v25 = vadd.f32 %v4391_v32, %v4390_v9 }
0x162b   :  { %v4473_v33 = vsel %vm1077_vm1, %v4461_v54, 0.0  ;;  %v4393_v21 = vsel %vm1077_vm1, %v4377_v39, 0.0 }
0x162c   :  { %v4474_v23 = vadd.f32 %v4473_v33, %v4472_v22  ;;  %v8473_v45 = vadd.f32 %v4393_v21, %v4392_v25  ;;  %v1698_v33 = vpop.permute.xlu0 %1697 }
0x1630   :  { %v1712_v21 = vpop.permute.xlu0 %1711 }
0x1631   :  { %5686 = vrcp.f32 %v1712_v21 }
0x1636   :  { %s5358_s0 = spop %5357 }
0x163f   :  { %v4259_v46 = vpop.f32.mrf.mxu1  ;;  %v4300_v52 = vpop.f32.mrf.mxu0 }
0x1640   :  { %v4260_v4 = vadd.f32 %v4259_v46, %v9029_v10  ;;  %v4301_v62 = vadd.f32 %v4300_v52, %v9030_v1 }
0x1641   :  { %v4261_v42 = vpop.f32.mrf.mxu1  ;;  %v4302_v7 = vpop.f32.mrf.mxu0 }
0x1642   :  { %v4409_v9 = vsub.f32 %v4260_v4, %v4309_v0  ;;  %v4415_v15 = vsub.f32 %v4260_v4, %v7964_v53  ;;  %v4417_v24 = vsub.f32 %v4301_v62, %v7993_v56  ;;  %v4411_v31 = vsub.f32 %v4301_v62, %v4311_v63 }
0x1643   :  { %v4262_v17 = vadd.f32 %v4261_v42, %v9031_v13  ;;  %v4303_v14 = vadd.f32 %v4302_v7, %v9067_v36  ;;  %v4263_v16 = vpop.f32.mrf.mxu1  ;;  %v4304_v59 = vpop.f32.mrf.mxu0  ;;  %v1690_v4 = vmul.f32 %v9055_v37, %v9055_v37  ;;  %v1700_v36 = vsub.f32 %v8383_v28, %v1698_v33 }
0x1644   :  { %v4421_v43 = vmul.f32 %v4409_v9, %v4409_v9  ;;  %v4450_v10 = vmul.f32 %v4415_v15, %v4415_v15  ;;  %v4452_v51 = vmul.f32 %v4417_v24, %v4417_v24  ;;  %v4423_v18 = vmul.f32 %v4411_v31, %v4411_v31  ;;  %v5687_v9 = vpop.eup %5686 }
0x1645   :  { %v4410_v1 = vsub.f32 %v4262_v17, %v4310_v27  ;;  %v4416_v2 = vsub.f32 %v4262_v17, %v7972_v12  ;;  %v4412_v0 = vsub.f32 %v4303_v14, %v4312_v30  ;;  %v4418_v53 = vsub.f32 %v4303_v14, %v7998_v26  ;;  %v4264_v35 = vpop.f32.mrf.mxu1  ;;  %v4305_v56 = vpop.f32.mrf.mxu0 }
0x1646   :  { %v4428_v63 = vsel %vm1077_vm1, %v4421_v43, 0.0  ;;  %v4462_v13 = vrot.slane %v4450_v10, 2  ;;  %v4464_v60 = vrot.slane %v4452_v51, 2  ;;  %v4432_v20 = vsel %vm1077_vm1, %v4423_v18, 0.0 }
0x1647   :  { %v4429_v50 = vadd.f32 %v4428_v63, %v4427_v5  ;;  %v4422_v34 = vmul.f32 %v4410_v1, %v4410_v1  ;;  %v4451_v47 = vmul.f32 %v4416_v2, %v4416_v2  ;;  %v4453_v19 = vmul.f32 %v4418_v53, %v4418_v53  ;;  %v9068_v1 = vld [vmem:[#allocation96_spill] sm:$0xff]  ;;  %v9069_v53 = vld [vmem:[#allocation97_spill] sm:$0xff] }
0x1648   :  { %v4475_v8 = vsel %vm1077_vm1, %v4462_v13, 0.0  ;;  %v4424_v30 = vmul.f32 %v4412_v0, %v4412_v0  ;;  %v4479_v54 = vsel %vm1077_vm1, %v4464_v60, 0.0  ;;  %v4650_v14 = vadd.f32 -0.5, %v1700_v36  ;;  %v9070_v13 = vld [vmem:[#allocation105_spill] sm:$0xff] }
0x1649   :  { %v4476_v29 = vadd.f32 %v4475_v8, %v4474_v23  ;;  %v4430_v27 = vsel %vm1077_vm1, %v4422_v34, 0.0  ;;  %v4463_v12 = vrot.slane %v4451_v47, 2  ;;  %v4465_v55 = vrot.slane %v4453_v19, 2  ;;  %v9072_v47 = vld [vmem:[#allocation107_spill] sm:$0xff] }
0x164a   :  { %v4431_v11 = vadd.f32 %v4430_v27, %v4429_v50  ;;  %v4434_v44 = vsel %vm1077_vm1, %v4424_v30, 0.0  ;;  %v1739_v37 = vmul.f32 %v9057_v41, %v9057_v41  ;;  %v1738_v35 = vsub.f32 0.0, %v8383_v28  ;;  %v9071_v41 = vld [vmem:[#allocation102_spill] sm:$0xff]  ;;  %v9074_v27 = vld [vmem:[#allocation104_spill] sm:$0xff] }
0x164b   :  { %v4477_v26 = vsel %vm1077_vm1, %v4463_v12, 0.0  ;;  %v4481_v25 = vsel %vm1077_vm1, %v4465_v55, 0.0  ;;  %5688 = vlog2.f32 %v9070_v13  ;;  %v3074_v8 = vmul.f32 2.0, %v9072_v47 }
0x164c   :  { %v4433_v32 = vadd.f32 %v4432_v20, %v4431_v11  ;;  %v4478_v39 = vadd.f32 %v4477_v26, %v4476_v29  ;;  %v3750_v28 = vmul.f32 2.0, %v8074_v49  ;;  %v9073_v29 = vld [vmem:[#allocation108_spill] sm:$0xff]  ;;  %v3737_v30 = vsub.f32 %v8068_v58, %v8145_v40 }
0x164d   :  { %v3075_v60 = vmul.f32 %v3074_v8, %v9072_v47  ;;  %v2870_v12 = vsub.f32 %v9074_v27, %v9073_v29  ;;  %v2883_v40 = vmul.f32 2.0, %v9070_v13  ;;  %vm4499_vm1 = vcmask 16400  }
0x164e   :  { %v8494_v48 = vadd.f32 %v4434_v44, %v4433_v32  ;;  %v4480_v5 = vadd.f32 %v4479_v54, %v4478_v39  ;;  %v3751_v19 = vmul.f32 %v3750_v28, %v8074_v49  ;;  %v3744_v26 = vmul.f32 %v3737_v30, %v3737_v30  ;;  %v9075_v32 = vld [vmem:[#allocation103_spill] sm:$0xff] }
0x164f   :  { %v2877_v11 = vmul.f32 %v2870_v12, %v2870_v12 }
0x1650   :  { %v8497_v22 = vadd.f32 %v4481_v25, %v4480_v5 }
0x1658   :  { %v5689_v18 = vpop.eup %5688 }
0x1659   :  { %v8516_v34 = vmul.f32 0.6931472, %v5689_v18 }
0x1677   :  { %v1562_v23 = vpop.xlane.xlu1 %1561 }
0x1678   :  { %v1563_v46 = vrot.slane %v1562_v23, 4 }
0x167a   :  { %v1564_v52 = vadd.f32 %v1563_v46, %v1562_v23  ;;  %v2884_v23 = vmul.f32 %v2883_v40, %v9070_v13  ;;  %v3941_v46 = vmul.f32 2.0, %v8129_v6  ;;  %v2865_v40 = vmul.f32 %v9070_v13, %v9070_v13 }
0x167b   :  { %v1705_v62 = vpop.permute.xlu1 %1704 }
0x167c   :  { %v1565_v42 = vrot.slane %v1564_v52, 2  ;;  %v1707_v7 = vadd.f32 %v1705_v62, %v1690_v4 }
0x167e   :  { %v1715_v15 = vmul.f32 %v5687_v9, %v1707_v7  ;;  %v1566_v24 = vadd.f32 %v1565_v42, %v1564_v52  ;;  %v9076_v52 = vld [vmem:[#allocation109_spill] sm:$0xff]  ;;  %v3942_v42 = vmul.f32 %v3941_v46, %v8129_v6 }
0x1680   :  { %1717 = vrot.lane.b32.xlu0 %v1715_v15, %s5972_s12  ;;  %v1567_v31 = vrot.slane %v1566_v24, 1 }
0x1682   :  { %v1568_v17 = vadd.f32 %v1567_v31, %v1566_v24 }
0x1684   :  { %5359 = vpush %v1568_v17 }
0x16f2   :  { %v1718_v16 = vpop.permute.xlu0 %1717 }
0x16f3   :  { %v1720_v59 = vadd.f32 %v4650_v14, %v1718_v16 }
0x16f5   :  { %1722 = vrot.lane.b32.xlu0 %v1720_v59, %s5967_s29 }
0x16f9   :  { %3925 = vrot.lane.b32.xlu0 %v8125_v61, %s5970_s26 }
0x16fd   :  { %1741 = vrot.lane.b32.xlu0 %v1739_v37, %s5958_s23 }
0x1767   :  { %v1723_v43 = vpop.permute.xlu0 %1722 }
0x1768   :  { %v1725_v10 = vsel %vm1397_vm7, %v1723_v43, 0.0 }
0x1769   :  { %1726 = vadd.xlane.f32.xlu1 %v1725_v10 }
0x176b   :  { %v3926_v51 = vpop.permute.xlu0 %3925 }
0x176c   :  { %v3928_v7 = vsub.f32 %v8125_v61, %v3926_v51 }
0x176d   :  { %2614 = vadd.xlane.f32.xlu1 %v9068_v1 }
0x176e   :  { %v3935_v15 = vmul.f32 %v3928_v7, %v3928_v7 }
0x176f   :  { %v1742_v2 = vpop.permute.xlu0 %1741 }
0x1770   :  { %v1744_v0 = vadd.f32 %v1742_v2, %v1690_v4  ;;  %v9077_v4 = vld [vmem:[#allocation106_spill] sm:$0xff] }
0x1771   :  { %2661 = vadd.xlane.f32.xlu1 %v9069_v53  ;;  %v3061_v62 = vsub.f32 %v9077_v4, %v9076_v52 }
0x1772   :  { %v1745_v56 = vmul.f32 0.5, %v1744_v0 }
0x1773   :  { %v3068_v9 = vmul.f32 %v3061_v62, %v3061_v62 }
0x1774   :  { %v1746_v63 = vadd.f32 %v1745_v56, %v1738_v35 }
0x1775   :  { %2702 = vadd.xlane.f32.xlu1 %v9071_v41 }
0x1776   :  { %v4651_v50 = vadd.f32 -0.5, %v1746_v63 }
0x1778   :  { %1749 = vrot.lane.b32.xlu0 %v4651_v50, %s5969_s4 }
0x1786   :  { %2872 = vrot.lane.b32.xlu1 %v8516_v34, %s5972_s12 }
0x178a   :  { %3077 = vrot.lane.b32.xlu1 %v3075_v60, %s5970_s26 }
0x178e   :  { %3753 = vrot.lane.b32.xlu1 %v3751_v19, %s5970_s26 }
0x1792   :  { %2879 = vrot.lane.b32.xlu1 %v2877_v11, %s5958_s23 }
0x1796   :  { %3746 = vrot.lane.b32.xlu1 %v3744_v26, %s5958_s23 }
0x17ea   :  { %v1750_v55 = vpop.permute.xlu0 %1749 }
0x17eb   :  { %v1752_v20 = vsel %vm1397_vm7, %v1750_v55, 0.0 }
0x17ec   :  { %1753 = vadd.xlane.f32.xlu0 %v1752_v20 }
0x17f0   :  { %2749 = vadd.xlane.f32.xlu0 %v9075_v32 }
0x17f2   :  { %v1727_v39 = vpop.xlane.xlu1 %1726 }
0x17f3   :  { %v1728_v44 = vrot.slane %v1727_v39, 4 }
0x17f5   :  { %v1729_v54 = vadd.f32 %v1728_v44, %v1727_v39 }
0x17f6   :  { %v2615_v24 = vpop.xlane.xlu1 %2614 }
0x17f7   :  { %v1730_v5 = vrot.slane %v1729_v54, 2  ;;  %v2616_v36 = vrot.slane %v2615_v24, 4 }
0x17f9   :  { %v1731_v25 = vadd.f32 %v1730_v5, %v1729_v54  ;;  %v2617_v59 = vadd.f32 %v2616_v36, %v2615_v24  ;;  %v2914_v24 = vmul.f32 %v9074_v27, %v9074_v27 }
0x17fa   :  { %v2662_v31 = vpop.xlane.xlu1 %2661 }
0x17fb   :  { %v1732_v33 = vrot.slane %v1731_v25, 1  ;;  %v2663_v14 = vrot.slane %v2662_v31, 4  ;;  %v2618_v10 = vrot.slane %v2617_v59, 2 }
0x17fd   :  { %v1733_v21 = vadd.f32 %v1732_v33, %v1731_v25  ;;  %v2664_v37 = vadd.f32 %v2663_v14, %v2662_v31  ;;  %v2619_v63 = vadd.f32 %v2618_v10, %v2617_v59 }
0x17fe   :  { %v2703_v17 = vpop.xlane.xlu1 %2702 }
0x17ff   :  { %5361 = vpush %v1733_v21  ;;  %v2704_v16 = vrot.slane %v2703_v17, 4  ;;  %v2665_v0 = vrot.slane %v2664_v37, 2  ;;  %v2620_v12 = vrot.slane %v2619_v63, 1 }
0x1801   :  { %v2705_v43 = vadd.f32 %v2704_v16, %v2703_v17  ;;  %v2666_v18 = vadd.f32 %v2665_v0, %v2664_v37  ;;  %v2621_v44 = vadd.f32 %v2620_v12, %v2619_v63  ;;  %v2913_v37 = vsub.f32 0.0, %v8516_v34 }
0x1802   :  { %v2873_v1 = vpop.permute.xlu1 %2872 }
0x1803   :  { %v2706_v53 = vrot.slane %v2705_v43, 2  ;;  %v2667_v26 = vrot.slane %v2666_v18, 1  ;;  %v2875_v62 = vsub.f32 %v8516_v34, %v2873_v1  ;;  %v3105_v1 = vmul.f32 %v9077_v4, %v9077_v4 }
0x1804   :  { %v3972_v4 = vmul.f32 %v8125_v61, %v8125_v61 }
0x1805   :  { %v2707_v60 = vadd.f32 %v2706_v53, %v2705_v43  ;;  %v2668_v54 = vadd.f32 %v2667_v26, %v2666_v18  ;;  %v4752_v7 = vadd.f32 -0.5, %v2875_v62  ;;  %v3056_v53 = vmul.f32 %v9072_v47, %v9072_v47 }
0x1806   :  { %2886 = vrot.lane.b32.xlu0 %v2884_v23, %s5970_s26  ;;  %v3078_v8 = vpop.permute.xlu1 %3077 }
0x1807   :  { %v2708_v55 = vrot.slane %v2707_v60, 1 }
0x1809   :  { %v2709_v25 = vadd.f32 %v2708_v55, %v2707_v60  ;;  %v3781_v55 = vmul.f32 %v8068_v58, %v8068_v58 }
0x180a   :  { %3944 = vrot.lane.b32.xlu0 %v3942_v42, %s5970_s26  ;;  %v8545_v39 = vpop.permute.xlu1 %3753 }
0x180e   :  { %3070 = vrot.lane.b32.xlu0 %v3068_v9, %s5958_s23  ;;  %v2880_v21 = vpop.permute.xlu1 %2879 }
0x180f   :  { %v2882_v23 = vadd.f32 %v2880_v21, %v2865_v40 }
0x1812   :  { %3937 = vrot.lane.b32.xlu0 %v3935_v15, %s5958_s23  ;;  %v8551_v42 = vpop.permute.xlu1 %3746 }
0x1875   :  { %v1754_v2 = vpop.xlane.xlu0 %1753 }
0x1876   :  { %v1755_v51 = vrot.slane %v1754_v2, 4 }
0x1878   :  { %v1756_v35 = vadd.f32 %v1755_v51, %v1754_v2 }
0x1879   :  { %v2750_v56 = vpop.xlane.xlu0 %2749 }
0x187a   :  { %v1757_v41 = vrot.slane %v1756_v35, 2  ;;  %v2751_v50 = vrot.slane %v2750_v56, 4 }
0x187c   :  { %v2752_v28 = vadd.f32 %v2751_v50, %v2750_v56  ;;  %v1758_v19 = vadd.f32 %v1757_v41, %v1756_v35  ;;  %v3923_v41 = vmul.f32 %v8129_v6, %v8129_v6 }
0x187d   :  { %v2887_v29 = vpop.permute.xlu0 %2886 }
0x187e   :  { %v2753_v30 = vrot.slane %v2752_v28, 2  ;;  %5690 = vrcp.f32 %v2887_v29  ;;  %v1759_v11 = vrot.slane %v1758_v19, 1 }
0x187f   :  { %5692 = vlog2.f32 %v9072_v47 }
0x1880   :  { %v1760_v20 = vadd.f32 %v1759_v11, %v1758_v19  ;;  %v2754_v32 = vadd.f32 %v2753_v30, %v2752_v28  ;;  %5694 = vlog2.f32 %v8074_v49 }
0x1881   :  { %v3945_v13 = vpop.permute.xlu0 %3944  ;;  %5696 = vrcp.f32 %v3078_v8 }
0x1882   :  { %5363 = vpush %v1760_v20  ;;  %v2755_v5 = vrot.slane %v2754_v32, 1  ;;  %5698 = vrcp.f32 %v3945_v13 }
0x1883   :  { %5365 = vpush %v2621_v44  ;;  %5700 = vlog2.f32 %v8129_v6  ;;  %v3732_v6 = vmul.f32 %v8074_v49, %v8074_v49 }
0x1884   :  { %5367 = vpush %v2668_v54  ;;  %v2756_v33 = vadd.f32 %v2755_v5, %v2754_v32  ;;  %5702 = vrcp.f32 %v8545_v39 }
0x1885   :  { %5369 = vpush %v2709_v25  ;;  %v3071_v31 = vpop.permute.xlu0 %3070 }
0x1886   :  { %5371 = vpush %v2756_v33  ;;  %v3073_v35 = vadd.f32 %v3071_v31, %v3056_v53  ;;  %v3749_v33 = vadd.f32 %v8551_v42, %v3732_v6 }
0x1889   :  { %v3938_v17 = vpop.permute.xlu0 %3937 }
0x188a   :  { %v3940_v18 = vadd.f32 %v3938_v17, %v3923_v41 }
0x188b   :  { %v5691_v46 = vpop.eup %5690 }
0x188c   :  { %v2890_v52 = vmul.f32 %v5691_v46, %v2882_v23  ;;  %v5693_v2 = vpop.eup %5692 }
0x188d   :  { %v3055_v0 = vmul.f32 0.6931472, %v5693_v2  ;;  %v5695_v51 = vpop.eup %5694 }
0x188e   :  { %2892 = vrot.lane.b32.xlu1 %v2890_v52, %s5972_s12  ;;  %v8566_v34 = vmul.f32 0.6931472, %v5695_v51  ;;  %v5697_v56 = vpop.eup %5696 }
0x188f   :  { %v3081_v63 = vmul.f32 %v5697_v56, %v3073_v35  ;;  %v5699_v50 = vpop.eup %5698  ;;  %v3104_v46 = vsub.f32 0.0, %v3055_v0 }
0x1890   :  { %v3948_v8 = vmul.f32 %v5699_v50, %v3940_v18  ;;  %v5701_v20 = vpop.eup %5700  ;;  %v3780_v18 = vsub.f32 0.0, %v8566_v34 }
0x1891   :  { %v3922_v39 = vmul.f32 0.6931472, %v5701_v20  ;;  %v5703_v5 = vpop.eup %5702 }
0x1900   :  { %v2893_v9 = vpop.permute.xlu1 %2892 }
0x1901   :  { %v2895_v15 = vadd.f32 %v4752_v7, %v2893_v9 }
0x1903   :  { %2897 = vrot.lane.b32.xlu0 %v2895_v15, %s5967_s29 }
0x1907   :  { %2916 = vrot.lane.b32.xlu0 %v2914_v24, %s5958_s23 }
0x1975   :  { %v2898_v36 = vpop.permute.xlu0 %2897 }
0x1976   :  { %v2900_v14 = vsel %vm1397_vm7, %v2898_v36, 0.0 }
0x1977   :  { %2901 = vadd.xlane.f32.xlu1 %v2900_v14 }
0x1979   :  { %v2917_v16 = vpop.permute.xlu0 %2916 }
0x197a   :  { %v2919_v59 = vadd.f32 %v2917_v16, %v2865_v40  ;;  %v3757_v40 = vmul.f32 %v5703_v5, %v3749_v33 }
0x197c   :  { %v2920_v43 = vmul.f32 0.5, %v2919_v59 }
0x197e   :  { %v2921_v10 = vadd.f32 %v2920_v43, %v2913_v37 }
0x1980   :  { %v4753_v27 = vadd.f32 -0.5, %v2921_v10 }
0x1982   :  { %2924 = vrot.lane.b32.xlu0 %v4753_v27, %s5969_s4 }
0x1988   :  { %3107 = vrot.lane.b32.xlu1 %v3105_v1, %s5958_s23 }
0x198c   :  { %3063 = vrot.lane.b32.xlu1 %v3055_v0, %s5972_s12 }
0x1990   :  { %3739 = vrot.lane.b32.xlu1 %v8566_v34, %s5972_s12 }
0x1994   :  { %3974 = vrot.lane.b32.xlu1 %v3972_v4, %s5958_s23 }
0x1998   :  { %3083 = vrot.lane.b32.xlu1 %v3081_v63, %s5972_s12  ;;  %v3971_v63 = vsub.f32 0.0, %v3922_v39 }
0x199c   :  { %3950 = vrot.lane.b32.xlu1 %v3948_v8, %s5972_s12 }
0x19f4   :  { %v2925_v47 = vpop.permute.xlu0 %2924 }
0x19f5   :  { %v2927_v60 = vsel %vm1397_vm7, %v2925_v47, 0.0 }
0x19f6   :  { %2928 = vadd.xlane.f32.xlu0 %v2927_v60 }
0x1a00   :  { %v2902_v61 = vpop.xlane.xlu1 %2901 }
0x1a01   :  { %v2903_v28 = vrot.slane %v2902_v61, 4 }
0x1a03   :  { %v2904_v19 = vadd.f32 %v2903_v28, %v2902_v61  ;;  %v9078_v28 = vld [vmem:[#allocation24_spill] sm:$0xff] }
0x1a04   :  { %v3108_v29 = vpop.permute.xlu1 %3107 }
0x1a05   :  { %v2905_v12 = vrot.slane %v2904_v19, 2  ;;  %v3110_v54 = vadd.f32 %v3108_v29, %v3056_v53 }
0x1a07   :  { %v2906_v30 = vadd.f32 %v2905_v12, %v2904_v19  ;;  %v3111_v58 = vmul.f32 0.5, %v3110_v54  ;;  %v9079_v19 = vld [vmem:[#allocation25_spill] sm:$0xff] }
0x1a08   :  { %v3064_v11 = vpop.permute.xlu1 %3063 }
0x1a09   :  { %v2907_v26 = vrot.slane %v2906_v30, 1  ;;  %v3066_v25 = vsub.f32 %v3055_v0, %v3064_v11  ;;  %v3112_v7 = vadd.f32 %v3111_v58, %v3104_v46 }
0x1a0b   :  { %v2908_v32 = vadd.f32 %v2907_v26, %v2906_v30  ;;  %v4755_v23 = vadd.f32 -0.5, %v3066_v25  ;;  %v4756_v49 = vadd.f32 -0.5, %v3112_v7 }
0x1a0c   :  { %v3740_v44 = vpop.permute.xlu1 %3739  ;;  %3783 = vrot.lane.b32.xlu0 %v3781_v55, %s5958_s23  ;;  %s8612_s23 = spop %5359 }
0x1a0d   :  { %5373 = vpush %v2908_v32  ;;  %v3742_v27 = vsub.f32 %v8566_v34, %v3740_v44 }
0x1a0f   :  { %v4759_v51 = vadd.f32 -0.5, %v3742_v27 }
0x1a10   :  { %v3975_v21 = vpop.permute.xlu1 %3974  ;;  %3930 = vrot.lane.b32.xlu0 %v3922_v39, %s5972_s12 }
0x1a11   :  { %v3977_v1 = vadd.f32 %v3975_v21, %v3923_v41 }
0x1a13   :  { %v3978_v53 = vmul.f32 0.5, %v3977_v1 }
0x1a14   :  { %v3084_v52 = vpop.permute.xlu1 %3083  ;;  %3759 = vrot.lane.b32.xlu0 %v3757_v40, %s5972_s12 }
0x1a15   :  { %v3086_v62 = vadd.f32 %v4755_v23, %v3084_v52  ;;  %v3979_v8 = vadd.f32 %v3978_v53, %v3971_v63 }
0x1a17   :  { %v4763_v61 = vadd.f32 -0.5, %v3979_v8 }
0x1a18   :  { %3088 = vrot.lane.b32.xlu0 %v3086_v62, %s5967_s29  ;;  %v3951_v50 = vpop.permute.xlu1 %3950 }
0x1a1c   :  { %3115 = vrot.lane.b32.xlu0 %v4756_v49, %s5969_s4 }
0x1a7f   :  { %v2929_v9 = vpop.xlane.xlu0 %2928 }
0x1a80   :  { %v2930_v15 = vrot.slane %v2929_v9, 4 }
0x1a82   :  { %v2931_v42 = vadd.f32 %v2930_v15, %v2929_v9 }
0x1a83   :  { %v3784_v24 = vpop.permute.xlu0 %3783 }
0x1a84   :  { %v2932_v13 = vrot.slane %v2931_v42, 2  ;;  %v3786_v0 = vadd.f32 %v3784_v24, %v3732_v6 }
0x1a86   :  { %v2933_v31 = vadd.f32 %v2932_v13, %v2931_v42  ;;  %v3787_v56 = vmul.f32 0.5, %v3786_v0 }
0x1a87   :  { %v3931_v17 = vpop.permute.xlu0 %3930 }
0x1a88   :  { %v2934_v36 = vrot.slane %v2933_v31, 1  ;;  %v3933_v2 = vsub.f32 %v3922_v39, %v3931_v17  ;;  %v3788_v60 = vadd.f32 %v3787_v56, %v3780_v18 }
0x1a8a   :  { %v2935_v14 = vadd.f32 %v2934_v36, %v2933_v31  ;;  %v4762_v35 = vadd.f32 -0.5, %v3933_v2  ;;  %v4760_v41 = vadd.f32 -0.5, %v3788_v60 }
0x1a8b   :  { %v3760_v16 = vpop.permute.xlu0 %3759 }
0x1a8c   :  { %5375 = vpush %v2935_v14  ;;  %v3762_v4 = vadd.f32 %v4759_v51, %v3760_v16  ;;  %v3953_v47 = vadd.f32 %v4762_v35, %v3951_v50 }
0x1a8f   :  { %v3089_v59 = vpop.permute.xlu0 %3088 }
0x1a90   :  { %v3091_v37 = vsel %vm1397_vm7, %v3089_v59, 0.0 }
0x1a91   :  { %3092 = vadd.xlane.f32.xlu1 %v3091_v37 }
0x1a93   :  { %v3116_v43 = vpop.permute.xlu0 %3115 }
0x1a94   :  { %v3118_v10 = vsel %vm1397_vm7, %v3116_v43, 0.0 }
0x1a95   :  { %3119 = vadd.xlane.f32.xlu0 %v3118_v10 }
0x1aa2   :  { %3764 = vrot.lane.b32.xlu1 %v3762_v4, %s5967_s29 }
0x1aa6   :  { %3955 = vrot.lane.b32.xlu1 %v3953_v47, %s5967_s29  ;;  %s8614_s29 = spop %5361 }
0x1aaa   :  { %3982 = vrot.lane.b32.xlu1 %v4763_v61, %s5969_s4 }
0x1aab   :  { %3791 = vrot.lane.b32.xlu0 %v4760_v41, %s5969_s4  ;;  %s8616_s4 = spop %5363 }
0x1aac   :  { %s5366_s26 = spop %5365 }
0x1aad   :  { %s8618_s12 = spop %5367 }
0x1aae   :  { %s8620_s11 = spop %5369 }
0x1aaf   :  { %s8622_s16 = spop %5371 }
0x1ab0   :  { %s5374_s17 = spop %5373 }
0x1abd   :  { %s5376_s18 = spop %5375 }
0x1aca   :  { %3481 = vadd.xlane.f32.xlu0 %v9078_v28 }
0x1ace   :  { %3528 = vadd.xlane.f32.xlu1 %v9079_v19  ;;  %3569 = vadd.xlane.f32.xlu0 %v8041_v3 }
0x1ad2   :  { %3616 = vadd.xlane.f32.xlu0 %v8044_v57 }
0x1b1a   :  { %v3093_v34 = vpop.xlane.xlu1 %3092 }
0x1b1b   :  { %v3094_v29 = vrot.slane %v3093_v34, 4 }
0x1b1d   :  { %v3095_v12 = vadd.f32 %v3094_v29, %v3093_v34 }
0x1b1e   :  { %v3765_v30 = vpop.permute.xlu1 %3764  ;;  %v3120_v11 = vpop.xlane.xlu0 %3119 }
0x1b1f   :  { %v3096_v26 = vrot.slane %v3095_v12, 2  ;;  %v3121_v55 = vrot.slane %v3120_v11, 4  ;;  %v3767_v20 = vsel %vm1397_vm7, %v3765_v30, 0.0 }
0x1b20   :  { %3768 = vadd.xlane.f32.xlu1 %v3767_v20 }
0x1b21   :  { %v3122_v32 = vadd.f32 %v3121_v55, %v3120_v11  ;;  %v3097_v44 = vadd.f32 %v3096_v26, %v3095_v12 }
0x1b22   :  { %v3956_v6 = vpop.permute.xlu1 %3955  ;;  %v3792_v54 = vpop.permute.xlu0 %3791 }
0x1b23   :  { %v3123_v39 = vrot.slane %v3122_v32, 2  ;;  %v3958_v5 = vsel %vm1397_vm7, %v3956_v6, 0.0  ;;  %v3794_v3 = vsel %vm1397_vm7, %v3792_v54, 0.0  ;;  %v3098_v57 = vrot.slane %v3097_v44, 1 }
0x1b24   :  { %3959 = vadd.xlane.f32.xlu1 %v3958_v5  ;;  %3795 = vadd.xlane.f32.xlu0 %v3794_v3 }
0x1b25   :  { %v3099_v25 = vadd.f32 %v3098_v57, %v3097_v44  ;;  %v3124_v33 = vadd.f32 %v3123_v39, %v3122_v32 }
0x1b26   :  { %v3983_v21 = vpop.permute.xlu1 %3982 }
0x1b27   :  { %5377 = vpush %v3099_v25  ;;  %v3985_v40 = vsel %vm1397_vm7, %v3983_v21, 0.0  ;;  %v3125_v58 = vrot.slane %v3124_v33, 1 }
0x1b28   :  { %4348 = vadd.xlane.f32.xlu1 %v8468_v38  ;;  %3986 = vadd.xlane.f32.xlu0 %v3985_v40 }
0x1b29   :  { %v3126_v23 = vadd.f32 %v3125_v58, %v3124_v33 }
0x1b2b   :  { %5379 = vpush %v3126_v23 }
0x1b2c   :  { %4436 = vadd.xlane.f32.xlu1 %v8494_v48  ;;  %4395 = vadd.xlane.f32.xlu0 %v8473_v45 }
0x1b30   :  { %4483 = vadd.xlane.f32.xlu0 %v8497_v22 }
0x1b53   :  { %v3482_v46 = vpop.xlane.xlu0 %3481 }
0x1b54   :  { %v3483_v52 = vrot.slane %v3482_v46, 4 }
0x1b56   :  { %v3484_v62 = vadd.f32 %v3483_v52, %v3482_v46 }
0x1b57   :  { %v3529_v7 = vpop.xlane.xlu1 %3528  ;;  %v3570_v49 = vpop.xlane.xlu0 %3569 }
0x1b58   :  { %v3485_v9 = vrot.slane %v3484_v62, 2  ;;  %v3530_v15 = vrot.slane %v3529_v7, 4  ;;  %v3571_v42 = vrot.slane %v3570_v49, 4  ;;  %s8624_s20 = spop %5377 }
0x1b5a   :  { %v3531_v24 = vadd.f32 %v3530_v15, %v3529_v7  ;;  %v3572_v13 = vadd.f32 %v3571_v42, %v3570_v49  ;;  %v3486_v38 = vadd.f32 %v3485_v9, %v3484_v62 }
0x1b5b   :  { %v3617_v31 = vpop.xlane.xlu0 %3616 }
0x1b5c   :  { %v3532_v17 = vrot.slane %v3531_v24, 2  ;;  %v3573_v36 = vrot.slane %v3572_v13, 2  ;;  %v3618_v14 = vrot.slane %v3617_v31, 4  ;;  %v3487_v48 = vrot.slane %v3486_v38, 1  ;;  %s8626_s22 = spop %5379 }
0x1b5e   :  { %v3619_v16 = vadd.f32 %v3618_v14, %v3617_v31  ;;  %v3533_v45 = vadd.f32 %v3532_v17, %v3531_v24  ;;  %v3574_v59 = vadd.f32 %v3573_v36, %v3572_v13  ;;  %v3488_v22 = vadd.f32 %v3487_v48, %v3486_v38 }
0x1b60   :  { %v3620_v37 = vrot.slane %v3619_v16, 2  ;;  %v3534_v43 = vrot.slane %v3533_v45, 1  ;;  %v3575_v10 = vrot.slane %v3574_v59, 1  ;;  %5381 = vpush %v3488_v22 }
0x1b62   :  { %v3535_v27 = vadd.f32 %v3534_v43, %v3533_v45  ;;  %v3576_v1 = vadd.f32 %v3575_v10, %v3574_v59  ;;  %v3621_v2 = vadd.f32 %v3620_v37, %v3619_v16  ;;  %v2910_v37 = vstv %s5374_s17 }
0x1b63   :  { %v1543_v43 = vstv %s5358_s0  ;;  %v2911_v10 = vmul.f32 0.5, %v2910_v37 }
0x1b64   :  { %5383 = vpush %v3535_v27  ;;  %v3622_v0 = vrot.slane %v3621_v2, 1  ;;  %v2937_v27 = vstv %s5376_s18 }
0x1b65   :  { %5385 = vpush %v3576_v1  ;;  %v1544_v1 = vmul.f32 0.5, %v1543_v43 }
0x1b66   :  { %v3623_v51 = vadd.f32 %v3622_v0, %v3621_v2  ;;  %v2623_v2 = vstv %s5366_s26  ;;  %v1570_v0 = vstv %s8612_s23 }
0x1b68   :  { %5387 = vpush %v3623_v51  ;;  %v1735_v51 = vstv %s8614_s29 }
0x1b91   :  { %s8628_s14 = spop %5381 }
0x1b95   :  { %s8630_s9 = spop %5383 }
0x1b96   :  { %s8632_s10 = spop %5385 }
0x1b99   :  { %s8634_s19 = spop %5387 }
0x1ba9   :  { %v3769_v53 = vpop.xlane.xlu1 %3768 }
0x1baa   :  { %v3770_v35 = vrot.slane %v3769_v53, 4 }
0x1bac   :  { %v3771_v4 = vadd.f32 %v3770_v35, %v3769_v53  ;;  %v1762_v53 = vstv %s8616_s4 }
0x1bad   :  { %v3960_v56 = vpop.xlane.xlu1 %3959  ;;  %v3796_v63 = vpop.xlane.xlu0 %3795 }
0x1bae   :  { %v3772_v50 = vrot.slane %v3771_v4, 2  ;;  %v3961_v18 = vrot.slane %v3960_v56, 4  ;;  %v3797_v8 = vrot.slane %v3796_v63, 4 }
0x1bb0   :  { %v3962_v47 = vadd.f32 %v3961_v18, %v3960_v56  ;;  %v3798_v60 = vadd.f32 %v3797_v8, %v3796_v63  ;;  %v3773_v61 = vadd.f32 %v3772_v50, %v3771_v4  ;;  %v2670_v4 = vstv %s8618_s12 }
0x1bb1   :  { %v4349_v41 = vpop.xlane.xlu1 %4348  ;;  %v3987_v28 = vpop.xlane.xlu0 %3986  ;;  %v2912_v56 = vadd.f32 %v2911_v10, %v1544_v1  ;;  %v2938_v63 = vmul.f32 0.03125, %v2937_v27  ;;  %v2624_v18 = vmul.f32 0.25, %v2623_v2  ;;  %v3490_v8 = vstv %s8628_s14 }
0x1bb2   :  { %v3963_v19 = vrot.slane %v3962_v47, 2  ;;  %v3799_v34 = vrot.slane %v3798_v60, 2  ;;  %v4350_v29 = vrot.slane %v4349_v41, 4  ;;  %v3988_v12 = vrot.slane %v3987_v28, 4 }
0x1bb3   :  { %v3774_v30 = vrot.slane %v3773_v61, 1 }
0x1bb4   :  { %v4351_v11 = vadd.f32 %v4350_v29, %v4349_v41  ;;  %v3989_v26 = vadd.f32 %v3988_v12, %v3987_v28  ;;  %v3800_v55 = vadd.f32 %v3799_v34, %v3798_v60  ;;  %v3964_v20 = vadd.f32 %v3963_v19, %v3962_v47 }
0x1bb5   :  { %v4437_v32 = vpop.xlane.xlu1 %4436  ;;  %v4396_v44 = vpop.xlane.xlu0 %4395  ;;  %v3775_v6 = vadd.f32 %v3774_v30, %v3773_v61  ;;  %v1571_v47 = vmul.f32 0.03125, %v1570_v0  ;;  %v1736_v60 = vmul.f32 0.5, %v1735_v51  ;;  %v2711_v61 = vstv %s8620_s11 }
0x1bb6   :  { %v4352_v54 = vrot.slane %v4351_v11, 2  ;;  %v3990_v39 = vrot.slane %v3989_v26, 2  ;;  %v4438_v5 = vrot.slane %v4437_v32, 4  ;;  %v4397_v3 = vrot.slane %v4396_v44, 4 }
0x1bb7   :  { %5389 = vpush %v3775_v6  ;;  %v3801_v57 = vrot.slane %v3800_v55, 1  ;;  %v3965_v25 = vrot.slane %v3964_v20, 1  ;;  %v1763_v28 = vmul.f32 0.03125, %v1762_v53  ;;  %v2671_v19 = vmul.f32 0.25, %v2670_v4 }
0x1bb8   :  { %v4439_v33 = vadd.f32 %v4438_v5, %v4437_v32  ;;  %v4398_v21 = vadd.f32 %v4397_v3, %v4396_v44  ;;  %v3991_v40 = vadd.f32 %v3990_v39, %v3989_v26  ;;  %v4353_v58 = vadd.f32 %v4352_v54, %v4351_v11 }
0x1bb9   :  { %v4484_v23 = vpop.xlane.xlu0 %4483  ;;  %v3802_v46 = vadd.f32 %v3801_v57, %v3800_v55  ;;  %v3966_v52 = vadd.f32 %v3965_v25, %v3964_v20  ;;  %v3537_v34 = vstv %s8630_s9  ;;  %v2939_v12 = vadd.f32 %v2938_v63, %v1571_v47 }
0x1bba   :  { %v4440_v62 = vrot.slane %v4439_v33, 2  ;;  %v4399_v7 = vrot.slane %v4398_v21, 2  ;;  %v4485_v49 = vrot.slane %v4484_v23, 4  ;;  %v3992_v9 = vrot.slane %v3991_v40, 1 }
0x1bbb   :  { %5391 = vpush %v3802_v46  ;;  %v4354_v15 = vrot.slane %v4353_v58, 1  ;;  %v3101_v30 = vstv %s8624_s20  ;;  %v3491_v11 = vmul.f32 0.25, %v3490_v8  ;;  %v2625_v55 = vadd.f32 2117.2344, %v2624_v18 }
0x1bbc   :  { %v4441_v42 = vadd.f32 %v4440_v62, %v4439_v33  ;;  %v4486_v24 = vadd.f32 %v4485_v49, %v4484_v23  ;;  %5393 = vpush %v3966_v52  ;;  %v3993_v13 = vadd.f32 %v3992_v9, %v3991_v40  ;;  %v4400_v38 = vadd.f32 %v4399_v7, %v4398_v21 }
0x1bbd   :  { %v4355_v31 = vadd.f32 %v4354_v15, %v4353_v58  ;;  %v2712_v20 = vmul.f32 0.25, %v2711_v61  ;;  %v2758_v32 = vstv %s8622_s16  ;;  %v3128_v44 = vstv %s8626_s22 }
0x1bbe   :  { %v4487_v17 = vrot.slane %v4486_v24, 2  ;;  %5395 = vpush %v3993_v13  ;;  %v4401_v36 = vrot.slane %v4400_v38, 1  ;;  %v4442_v14 = vrot.slane %v4441_v42, 1  ;;  %v3538_v6 = vmul.f32 0.25, %v3537_v34 }
0x1bbf   :  { %5397 = vpush %v4355_v31  ;;  %v3578_v54 = vstv %s8632_s10  ;;  %v2672_v5 = vadd.f32 2117.2344, %v2671_v19  ;;  %v3102_v3 = vmul.f32 0.5, %v3101_v30  ;;  %v3492_v33 = vadd.f32 %v3491_v11, %v2625_v55 }
0x1bc0   :  { %v4488_v48 = vadd.f32 %v4487_v17, %v4486_v24  ;;  %v4402_v16 = vadd.f32 %v4401_v36, %v4400_v38  ;;  %v4443_v45 = vadd.f32 %v4442_v14, %v4441_v42  ;;  %v3625_v21 = vstv %s8634_s19 }
0x1bc1   :  { %v2759_v23 = vmul.f32 0.25, %v2758_v32  ;;  %v3129_v46 = vmul.f32 0.03125, %v3128_v44  ;;  %v3579_v52 = vmul.f32 0.25, %v3578_v54  ;;  %v3539_v62 = vadd.f32 %v3538_v6, %v2672_v5 }
0x1bc2   :  { %5399 = vpush %v4402_v16  ;;  %v4489_v59 = vrot.slane %v4488_v48, 1  ;;  %v3626_v15 = vmul.f32 0.25, %v3625_v21  ;;  %v2713_v38 = vadd.f32 2117.2344, %v2712_v20  ;;  %v3103_v31 = vadd.f32 %v3102_v3, %v1736_v60 }
0x1bc3   :  { %5401 = vpush %v4443_v45  ;;  %v2760_v36 = vadd.f32 2117.2344, %v2759_v23  ;;  %v3130_v14 = vadd.f32 %v3129_v46, %v1763_v28 }
0x1bc4   :  { %v4490_v22 = vadd.f32 %v4489_v59, %v4488_v48  ;;  %v3580_v16 = vadd.f32 %v3579_v52, %v2713_v38 }
0x1bc6   :  { %5403 = vpush %v4490_v22  ;;  %v3627_v22 = vadd.f32 %v3626_v15, %v2760_v36 }
0x1be8   :  { %s5390_s5 = spop %5389 }
0x1be9   :  { %v3777_v35 = vstv %s5390_s5 }
0x1bea   :  { %v3778_v50 = vmul.f32 0.5, %v3777_v35 }
0x1bec   :  { %v3779_v41 = vadd.f32 %v3778_v50, %v2912_v56  ;;  %s5392_s21 = spop %5391 }
0x1bed   :  { %v3804_v29 = vstv %s5392_s21  ;;  %s5394_s27 = spop %5393 }
0x1bee   :  { %4496 = vst.msk [vmem:[%s8687_s15] sm:$0x1] %vm4495_vm15, %v3779_v41  ;;  %v3805_v26 = vmul.f32 0.03125, %v3804_v29  ;;  %v3968_v57 = vstv %s5394_s27 }
0x1bef   :  { %s5396_s2 = spop %5395  ;;  %v3969_v7 = vmul.f32 0.5, %v3968_v57 }
0x1bf0   :  { %v3806_v39 = vadd.f32 %v3805_v26, %v2939_v12  ;;  %s5398_s7 = spop %5397  ;;  %v3995_v40 = vstv %s5396_s2 }
0x1bf1   :  { %v4357_v25 = vstv %s5398_s7  ;;  %v3996_v42 = vmul.f32 0.03125, %v3995_v40  ;;  %v3970_v45 = vadd.f32 %v3969_v7, %v3103_v31 }
0x1bf2   :  { %4498 = vst.msk [vmem:[%s8687_s15] sm:$0x1] %vm4497_vm0, %v3806_v39  ;;  %v4358_v58 = vmul.f32 0.25, %v4357_v25 }
0x1bf3   :  { %s5400_s30 = spop %5399  ;;  %v3997_v37 = vadd.f32 %v3996_v42, %v3130_v14 }
0x1bf4   :  { %v4359_v49 = vadd.f32 %v4358_v58, %v3492_v33  ;;  %v4404_v9 = vstv %s5400_s30  ;;  %s5402_s3 = spop %5401 }
0x1bf5   :  { %v4405_v24 = vmul.f32 0.25, %v4404_v9  ;;  %v4445_v13 = vstv %s5402_s3 }
0x1bf6   :  { %4500 = vst.msk [vmem:[%s8687_s15] sm:$0x1] %vm4499_vm1, %v4359_v49  ;;  %v4446_v17 = vmul.f32 0.25, %v4445_v13 }
0x1bf7   :  { %v4406_v48 = vadd.f32 %v4405_v24, %v3539_v62  ;;  %s5404_s24 = spop %5403 }
0x1bf8   :  { %v4492_v59 = vstv %s5404_s24  ;;  %v4447_v10 = vadd.f32 %v4446_v17, %v3580_v16 }
0x1bf9   :  { %4502 = vst.msk [vmem:[%s8687_s15] sm:$0x1] %vm4501_vm2, %v4406_v48  ;;  %v4493_v43 = vmul.f32 0.25, %v4492_v59 }
0x1bfa   :  { %4504 = vst.msk [vmem:[%s8687_s15] sm:$0x1] %vm4503_vm3, %v3970_v45 }
0x1bfb   :  { %4506 = vst.msk [vmem:[%s8687_s15] sm:$0x1] %vm4505_vm4, %v3997_v37  ;;  %v4494_v27 = vadd.f32 %v4493_v43, %v3627_v22 }
0x1bfc   :  { %4508 = vst.msk [vmem:[%s8687_s15] sm:$0x1] %vm4507_vm5, %v4447_v10 }
0x1bfd   :  { %4510 = vst.msk [vmem:[%s8687_s15] sm:$0x1] %vm4509_vm6, %v4494_v27 }
0x1bfe   :  { %4515 = vsyncpa [#allocation5], 1 }
0x1bff   :  { %4516 = vsyncpa [#allocation7], 1 }
0x1c00   :  { %4517 = vsyncpa [#allocation10], 1 }

</bundles_post_ra>
